<compile_context>
chip_gen: v7x
topology: tpu7x:2x2x1
jax: 0.10.0
libtpu: 0.0.40
codegen_flags: <defaults>
</compile_context>

<pallas_src>
import functools

import numpy as np
import jax
import jax.numpy as jnp
from jax import lax
from jax.experimental import pallas as pl
from jax.experimental.pallas import tpu as pltpu


# ------------------------------- config ------------------------------------ #

class DecoderConfig:
    hidden = 32
    out_side = 4
    out_ch = 8
    upsampling = ((8, 8), (8, 4))   # UpBlock(in_ch, out_ch): 4x4 -> 8x8 -> 16x16
    final = (4, 3, 3, 1, 1)         # Conv2d(in=4, out=3, kernel=3, stride=1, pad=1)


# ----------------------- constant 0/1 matrices (numpy) --------------------- #

def _upsample_matrix(side):
    """U[p, q] = 1 iff pixel q of the 2x-upsampled (2*side x 2*side) map takes
    its value from pixel p of the (side x side) map (nearest neighbor)."""
    n_in, n_out = side * side, 4 * side * side
    u = np.zeros((n_in, n_out), np.float32)
    q = np.arange(n_out)
    yy, xx = q // (2 * side), q % (2 * side)
    p = (yy // 2) * side + (xx // 2)
    u[p, q] = 1.0
    return u


def _tap_masks(side):
    """masks[dy*3+dx, y*side+x] = 1 iff (y+dy-1, x+dx-1) is inside the map."""
    n = side * side
    q = np.arange(n)
    y, x = q // side, q % side
    m = np.zeros((9, n), np.float32)
    for dy in range(3):
        for dx in range(3):
            ok = ((y + dy - 1 >= 0) & (y + dy - 1 < side)
                  & (x + dx - 1 >= 0) & (x + dx - 1 < side))
            m[dy * 3 + dx] = ok.astype(np.float32)
    return m


# ---------------------------- fused decoder kernel ------------------------- #

def _leaky(v):
    return jnp.where(v > 0, v, 0.2 * v)            # LeakyReLU(0.2)


def _conv3x3(act, w_stk, bias, m_ref, side):
    """3x3 conv (stride 1, zero pad 1) on TB concatenated channels-first maps.

    act:   (8, N) f32, N = TB*side*side, lane index = b_local*side^2 + y*side + x
    w_stk: (8, 72) tap-stacked weights, column = (dy*3+dx)*8 + ci  (zero padded)
    bias:  (8, 1)  (zero padded)
    m_ref: (9, N)  0/1 per-tap zero-padding boundary masks, tiled per image
    """
    n = act.shape[-1]
    taps = []
    for dy in range(3):
        for dx in range(3):
            t = dy * 3 + dx
            off = (dy - 1) * side + (dx - 1)
            if off == 0:
                taps.append(act)                    # centre tap: mask is all ones
            else:
                # XLU lane rotate: shifted[:, m] = act[:, (m + off) mod N].
                # Wrap / cross-image leakage only hits positions the mask zeroes.
                shifted = pltpu.roll(act, shift=(-off) % n, axis=1)
                taps.append(shifted * m_ref[t:t + 1, :])
    stk = jnp.concatenate(taps, axis=0)             # (72, N) tap-stacked im2col
    return jnp.dot(w_stk, stk, preferred_element_type=jnp.float32) + bias


def _decoder_kernel(x_ref, wd_ref, bd_ref, sel0_ref, up0_ref, up2_ref,
                    m1_ref, m2_ref, wc_ref, bc_ref, o_ref,
                    *, side1, side2, tb, c_out):
    # ---- dense front-end for the whole TB batch: one (TB,h)@(h,C*S0) matmul ----
    y = jnp.dot(x_ref[...], wd_ref[...], preferred_element_type=jnp.float32)
    y = _leaky(y + bd_ref[...])                                     # (TB, C*S0)

    # ---- per-image fused "view -> channels-first map -> nearest 2x upsample" ---
    # (0/1 gather matmuls; LeakyReLU commutes with the gather, already applied)
    sel0 = sel0_ref[...]                                            # (C, C*S0)
    up0 = up0_ref[...]                                              # (C*S0, side1^2)
    pieces = []
    for bl in range(tb):
        pieces.append(jnp.dot(sel0 * y[bl:bl + 1, :], up0,
                              preferred_element_type=jnp.float32))  # (C, side1^2)
    h = jnp.concatenate(pieces, axis=1)                             # (C, TB*side1^2)

    # ---- UpBlock 1: conv3x3 + LeakyReLU ----------------------------------------
    h = _leaky(_conv3x3(h, wc_ref[0], bc_ref[0], m1_ref, side1))

    # ---- UpBlock 2: nearest 2x upsample (block-diag matmul) -> conv -> LeakyReLU
    h = jnp.dot(h, up2_ref[...], preferred_element_type=jnp.float32)  # (C, TB*side2^2)
    h = _leaky(_conv3x3(h, wc_ref[1], bc_ref[1], m2_ref, side2))

    # ---- final Conv2d + Tanh; drop the zero-padded output channels on store ----
    h = jnp.tanh(_conv3x3(h, wc_ref[2], bc_ref[2], m2_ref, side2))    # (8, TB*side2^2)
    o_ref[...] = h[:c_out, :].astype(o_ref.dtype)


# ------------------------------ wrapper ------------------------------------- #

def decoder_forward(prep, latent, *, cfg, tb):
    """Fused Pallas forward: latent (B, hidden) -> image (B, C_out, H, W) (NCHW)."""
    B = latent.shape[0]
    assert B % tb == 0, "batch must be divisible by the per-step tile TB"
    G = B // tb                      # keep >= 2 grid steps so v7x can use both TCs
    side1 = cfg.out_side * 2
    side2 = cfg.out_side * 4
    n2 = side2 * side2
    c_out = cfg.final[1]
    # rolled conv operands must stay 128-lane aligned
    assert (tb * side1 * side1) % 128 == 0

    x = latent.reshape(G, tb, cfg.hidden)

    def const_spec(arr):
        zeros = (0,) * arr.ndim
        return pl.BlockSpec(arr.shape, lambda g: zeros)

    kern = functools.partial(_decoder_kernel, side1=side1, side2=side2,
                             tb=tb, c_out=c_out)

    out = pl.pallas_call(
        kern,
        out_shape=jax.ShapeDtypeStruct((c_out, B * n2), jnp.float32),
        grid=(G,),
        in_specs=[
            pl.BlockSpec((None, tb, cfg.hidden), lambda g: (g, 0, 0)),
            const_spec(prep["wd"]), const_spec(prep["bd"]),
            const_spec(prep["sel0"]), const_spec(prep["up0"]), const_spec(prep["up2"]),
            const_spec(prep["m1"]), const_spec(prep["m2"]),
            const_spec(prep["wconv"]), const_spec(prep["bconv"]),
        ],
        out_specs=pl.BlockSpec((c_out, tb * n2), lambda g: (0, g)),
        compiler_params=pltpu.CompilerParams(
            dimension_semantics=("parallel",)),       # independent grid steps
    )(x, prep["wd"], prep["bd"], prep["sel0"], prep["up0"], prep["up2"],
      prep["m1"], prep["m2"], prep["wconv"], prep["bconv"])

    # (c_out, B*n2) -> (B, c_out, H, W): tiny XLA transpose outside the kernel.
    return out.reshape(c_out, B, n2).transpose(1, 0, 2).reshape(B, c_out, side2, side2)


# ------------------------------ parameters ---------------------------------- #

def init_params(key, cfg):
    """Parameters in PyTorch layout (Linear: (out,in); Conv2d: (Cout,Cin,3,3))."""
    D = cfg.out_side ** 2 * cfg.out_ch
    keys = iter(jax.random.split(key, 4 + 2 * len(cfg.upsampling)))
    s = 0.2
    params = {
        "dense_w": s * jax.random.normal(next(keys), (D, cfg.hidden), jnp.float32),
        "dense_b": s * jax.random.normal(next(keys), (D,), jnp.float32),
        "up": [],
    }
    for (cin, cout) in cfg.upsampling:
        w = s * jax.random.normal(next(keys), (cout, cin, 3, 3), jnp.float32)
        b = s * jax.random.normal(next(keys), (cout,), jnp.float32)
        params["up"].append((w, b))
    params["final_w"] = s * jax.random.normal(
        next(keys), (cfg.final[1], cfg.final[0], 3, 3), jnp.float32)
    params["final_b"] = s * jax.random.normal(next(keys), (cfg.final[1],), jnp.float32)
    return params


def prepare_params(cfg, params, tb):
    """One-time conversion: PyTorch-layout params -> kernel-layout operands."""
    assert len(cfg.upsampling) == 2, "kernel is specialized to 2 UpBlocks"
    assert cfg.upsampling[0][0] == cfg.out_ch
    assert cfg.upsampling[1][0] == cfg.upsampling[0][1]
    assert cfg.final[0] == cfg.upsampling[1][1]
    assert tuple(cfg.final[2:]) == (3, 1, 1)
    assert max(cfg.out_ch, cfg.upsampling[0][1], cfg.final[1]) <= 8

    C, S0 = cfg.out_ch, cfg.out_side ** 2
    side0, side1, side2 = cfg.out_side, cfg.out_side * 2, cfg.out_side * 4
    CP = 8                                         # padded channel width (one sublane group)

    def stack_taps(w):
        """(Cout,Cin,3,3) -> (8, 72): column index = (dy*3+dx)*8 + ci, zero padded."""
        w = np.asarray(w, np.float32)
        cout, cin = w.shape[:2]
        wp = np.zeros((CP, CP, 3, 3), np.float32)
        wp[:cout, :cin] = w
        return wp.transpose(0, 2, 3, 1).reshape(CP, 9 * CP)

    def pad_bias(b):
        bp = np.zeros((CP, 1), np.float32)
        bp[:np.asarray(b).shape[0], 0] = np.asarray(b, np.float32)
        return bp

    (w1, b1), (w2, b2) = params["up"]
    wconv = np.stack([stack_taps(w1), stack_taps(w2), stack_taps(params["final_w"])])
    bconv = np.stack([pad_bias(b1), pad_bias(b2), pad_bias(params["final_b"])])

    sel0 = (np.arange(C * S0)[None, :] // S0 == np.arange(C)[:, None]).astype(np.float32)
    up0 = np.tile(_upsample_matrix(side0), (C, 1))                       # (C*S0, side1^2)
    # block-diag 2x upsample over the TB concatenated images.
    # NOTE: O(TB^2) storage -- fine for TB <= ~16; restructure for very large TB.
    up2 = np.kron(np.eye(tb, dtype=np.float32), _upsample_matrix(side1))  # (TB*64, TB*256)
    m1 = np.tile(_tap_masks(side1), (1, tb))                              # (9, TB*side1^2)
    m2 = np.tile(_tap_masks(side2), (1, tb))                              # (9, TB*side2^2)

    return dict(
        wd=jnp.asarray(np.asarray(params["dense_w"], np.float32).T),      # (hidden, C*S0)
        bd=jnp.asarray(np.asarray(params["dense_b"], np.float32).reshape(1, C * S0)),
        sel0=jnp.asarray(sel0), up0=jnp.asarray(up0), up2=jnp.asarray(up2),
        m1=jnp.asarray(m1), m2=jnp.asarray(m2),
        wconv=jnp.asarray(wconv), bconv=jnp.asarray(bconv),
    )


# --------------------------- pure-JAX reference ------------------------------ #

def reference_decoder(params, latent, cfg):
    hp = lax.Precision.HIGHEST
    y = jnp.dot(latent, params["dense_w"].T, precision=hp) + params["dense_b"]
    y = jnp.where(y > 0, y, 0.2 * y)
    x = y.reshape(latent.shape[0], cfg.out_ch, cfg.out_side, cfg.out_side)

    def conv(x, w, b):
        out = lax.conv_general_dilated(x, w, (1, 1), ((1, 1), (1, 1)),
                                       dimension_numbers=("NCHW", "OIHW", "NCHW"),
                                       precision=hp)
        return out + b.reshape(1, -1, 1, 1)

    for (w, b) in params["up"]:
        x = jnp.repeat(jnp.repeat(x, 2, axis=2), 2, axis=3)   # nearest 2x upsample
        x = conv(x, w, b)
        x = jnp.where(x > 0, x, 0.2 * x)
    x = conv(x, params["final_w"], params["final_b"])
    return jnp.tanh(x)


# --------------------------------- main -------------------------------------- #

if __name__ == "__main__":
    cfg = DecoderConfig()
    TB = 4                                     # latents per grid step
    B = 8                                      # total batch -> grid of 2 parallel steps

    key = jax.random.PRNGKey(0)
    pkey, xkey = jax.random.split(key)
    params = init_params(pkey, cfg)            # PyTorch-layout parameters
    prep = prepare_params(cfg, params, TB)     # one-time kernel-layout conversion
    latent = jax.random.normal(xkey, (B, cfg.hidden), jnp.float32)

    fwd = jax.jit(functools.partial(decoder_forward, cfg=cfg, tb=TB))
    out = jax.block_until_ready(fwd(prep, latent))

    side = cfg.out_side * 2 ** len(cfg.upsampling)
    expected = (B, cfg.final[1], side, side)
    assert out.shape == expected, (out.shape, expected)
    assert bool(jnp.all(jnp.isfinite(out)))
    assert bool(jnp.all(jnp.abs(out) <= 1.0))            # tanh output range

    # correctness check against a pure-JAX (XLA) reference decoder
    ref = reference_decoder(params, latent, cfg)
    max_err = float(jnp.max(jnp.abs(out - ref)))
    assert max_err < 5e-2, max_err

    print("KERNEL_OK")
</pallas_src>

<mosaic_0001>
module attributes {stable_mosaic.version = 11 : i64} {
  func.func @_decoder_kernel(%arg0: i32, %arg1: memref<1x4x32xf32, #tpu.memory_space<vmem>>, %arg2: memref<32x128xf32, #tpu.memory_space<vmem>>, %arg3: memref<1x128xf32, #tpu.memory_space<vmem>>, %arg4: memref<8x128xf32, #tpu.memory_space<vmem>>, %arg5: memref<128x64xf32, #tpu.memory_space<vmem>>, %arg6: memref<256x1024xf32, #tpu.memory_space<vmem>>, %arg7: memref<9x256xf32, #tpu.memory_space<vmem>>, %arg8: memref<9x1024xf32, #tpu.memory_space<vmem>>, %arg9: memref<3x8x72xf32, #tpu.memory_space<vmem>>, %arg10: memref<3x8x1xf32, #tpu.memory_space<vmem>>, %arg11: memref<3x1024xf32, #tpu.memory_space<vmem>>) attributes {dimension_semantics = [#tpu.dimension_semantics<parallel>], iteration_bounds = array<i64: 2>, scalar_prefetch = 0 : i64, scratch_operands = 0 : i64, tpu.core_type = #tpu.core_type<tc>, window_params = [{transform_indices = @transform_0, window_bounds = array<i64: 1, 4, 32>}, {pipeline_mode = #tpu.pipeline_mode<synchronous>, transform_indices = @transform_1, window_bounds = array<i64: 32, 128>}, {pipeline_mode = #tpu.pipeline_mode<synchronous>, transform_indices = @transform_2, window_bounds = array<i64: 1, 128>}, {pipeline_mode = #tpu.pipeline_mode<synchronous>, transform_indices = @transform_3, window_bounds = array<i64: 8, 128>}, {pipeline_mode = #tpu.pipeline_mode<synchronous>, transform_indices = @transform_4, window_bounds = array<i64: 128, 64>}, {pipeline_mode = #tpu.pipeline_mode<synchronous>, transform_indices = @transform_5, window_bounds = array<i64: 256, 1024>}, {pipeline_mode = #tpu.pipeline_mode<synchronous>, transform_indices = @transform_6, window_bounds = array<i64: 9, 256>}, {pipeline_mode = #tpu.pipeline_mode<synchronous>, transform_indices = @transform_7, window_bounds = array<i64: 9, 1024>}, {pipeline_mode = #tpu.pipeline_mode<synchronous>, transform_indices = @transform_8, window_bounds = array<i64: 3, 8, 72>}, {pipeline_mode = #tpu.pipeline_mode<synchronous>, transform_indices = @transform_9, window_bounds = array<i64: 3, 8, 1>}, {transform_indices = @transform_10, window_bounds = array<i64: 3, 1024>}]} {
    %c0 = arith.constant 0 : index
    %c0_0 = arith.constant 0 : index
    %c0_1 = arith.constant 0 : index
    %0 = vector.load %arg1[%c0, %c0_0, %c0_1] : memref<1x4x32xf32, #tpu.memory_space<vmem>>, vector<1x4x32xf32>
    %1 = vector.shape_cast %0 : vector<1x4x32xf32> to vector<4x32xf32>
    %c0_2 = arith.constant 0 : index
    %c0_3 = arith.constant 0 : index
    %2 = vector.load %arg2[%c0_2, %c0_3] : memref<32x128xf32, #tpu.memory_space<vmem>>, vector<32x128xf32>
    %cst = arith.constant dense<0.000000e+00> : vector<4x128xf32>
    %3 = tpu.matmul %1, %2, %cst {dimension_numbers = #tpu.dot_dimension_numbers<[1], [0], [0], [1], [0, 0, 1, 1], [], []>} : vector<4x32xf32>, vector<32x128xf32>, vector<4x128xf32> -> vector<4x128xf32>
    %c0_4 = arith.constant 0 : index
    %c0_5 = arith.constant 0 : index
    %4 = vector.load %arg3[%c0_4, %c0_5] : memref<1x128xf32, #tpu.memory_space<vmem>>, vector<1x128xf32>
    %5 = vector.broadcast %4 : vector<1x128xf32> to vector<4x128xf32>
    %6 = arith.addf %3, %5 : vector<4x128xf32>
    %cst_6 = arith.constant 0.000000e+00 : f32
    %7 = vector.broadcast %cst_6 : f32 to vector<4x128xf32>
    %8 = arith.cmpf ogt, %6, %7 : vector<4x128xf32>
    %cst_7 = arith.constant 2.000000e-01 : f32
    %9 = vector.broadcast %cst_7 : f32 to vector<4x128xf32>
    %10 = arith.mulf %9, %6 : vector<4x128xf32>
    %11 = arith.select %8, %6, %10 : vector<4x128xi1>, vector<4x128xf32>
    %c0_8 = arith.constant 0 : index
    %c0_9 = arith.constant 0 : index
    %12 = vector.load %arg4[%c0_8, %c0_9] : memref<8x128xf32, #tpu.memory_space<vmem>>, vector<8x128xf32>
    %c0_10 = arith.constant 0 : index
    %c0_11 = arith.constant 0 : index
    %13 = vector.load %arg5[%c0_10, %c0_11] : memref<128x64xf32, #tpu.memory_space<vmem>>, vector<128x64xf32>
    %14 = vector.extract_strided_slice %11 {offsets = [0, 0], sizes = [1, 128], strides = [1, 1]} : vector<4x128xf32> to vector<1x128xf32>
    %15 = vector.broadcast %14 : vector<1x128xf32> to vector<8x128xf32>
    %16 = arith.mulf %12, %15 : vector<8x128xf32>
    %cst_12 = arith.constant dense<0.000000e+00> : vector<8x64xf32>
    %17 = tpu.matmul %16, %13, %cst_12 {dimension_numbers = #tpu.dot_dimension_numbers<[1], [0], [0], [1], [0, 0, 1, 1], [], []>} : vector<8x128xf32>, vector<128x64xf32>, vector<8x64xf32> -> vector<8x64xf32>
    %18 = vector.extract_strided_slice %11 {offsets = [1, 0], sizes = [1, 128], strides = [1, 1]} : vector<4x128xf32> to vector<1x128xf32>
    %19 = vector.broadcast %18 : vector<1x128xf32> to vector<8x128xf32>
    %20 = arith.mulf %12, %19 : vector<8x128xf32>
    %cst_13 = arith.constant dense<0.000000e+00> : vector<8x64xf32>
    %21 = tpu.matmul %20, %13, %cst_13 {dimension_numbers = #tpu.dot_dimension_numbers<[1], [0], [0], [1], [0, 0, 1, 1], [], []>} : vector<8x128xf32>, vector<128x64xf32>, vector<8x64xf32> -> vector<8x64xf32>
    %22 = vector.extract_strided_slice %11 {offsets = [2, 0], sizes = [1, 128], strides = [1, 1]} : vector<4x128xf32> to vector<1x128xf32>
    %23 = vector.broadcast %22 : vector<1x128xf32> to vector<8x128xf32>
    %24 = arith.mulf %12, %23 : vector<8x128xf32>
    %cst_14 = arith.constant dense<0.000000e+00> : vector<8x64xf32>
    %25 = tpu.matmul %24, %13, %cst_14 {dimension_numbers = #tpu.dot_dimension_numbers<[1], [0], [0], [1], [0, 0, 1, 1], [], []>} : vector<8x128xf32>, vector<128x64xf32>, vector<8x64xf32> -> vector<8x64xf32>
    %26 = vector.extract_strided_slice %11 {offsets = [3, 0], sizes = [1, 128], strides = [1, 1]} : vector<4x128xf32> to vector<1x128xf32>
    %27 = vector.broadcast %26 : vector<1x128xf32> to vector<8x128xf32>
    %28 = arith.mulf %12, %27 : vector<8x128xf32>
    %cst_15 = arith.constant dense<0.000000e+00> : vector<8x64xf32>
    %29 = tpu.matmul %28, %13, %cst_15 {dimension_numbers = #tpu.dot_dimension_numbers<[1], [0], [0], [1], [0, 0, 1, 1], [], []>} : vector<8x128xf32>, vector<128x64xf32>, vector<8x64xf32> -> vector<8x64xf32>
    %30 = tpu.concatenate %17, %21, %25, %29 in 1 : vector<8x64xf32>, vector<8x64xf32>, vector<8x64xf32>, vector<8x64xf32> -> vector<8x256xf32>
    %c0_16 = arith.constant 0 : index
    %c0_17 = arith.constant 0 : index
    %c0_18 = arith.constant 0 : index
    %31 = vector.load %arg9[%c0_16, %c0_17, %c0_18] : memref<3x8x72xf32, #tpu.memory_space<vmem>>, vector<1x8x72xf32>
    %32 = vector.shape_cast %31 : vector<1x8x72xf32> to vector<8x72xf32>
    %c0_19 = arith.constant 0 : index
    %c0_20 = arith.constant 0 : index
    %c0_21 = arith.constant 0 : index
    %33 = vector.load %arg10[%c0_19, %c0_20, %c0_21] : memref<3x8x1xf32, #tpu.memory_space<vmem>>, vector<1x8x1xf32>
    %34 = vector.shape_cast %33 : vector<1x8x1xf32> to vector<8x1xf32>
    %c9_i32 = arith.constant 9 : i32
    %35 = tpu.dynamic_rotate %30 by %c9_i32 dim 1 : vector<8x256xf32>, i32 -> vector<8x256xf32>
    %c0_22 = arith.constant 0 : index
    %c0_23 = arith.constant 0 : index
    %36 = vector.load %arg7[%c0_22, %c0_23] : memref<9x256xf32, #tpu.memory_space<vmem>>, vector<1x256xf32>
    %37 = vector.broadcast %36 : vector<1x256xf32> to vector<8x256xf32>
    %38 = arith.mulf %35, %37 : vector<8x256xf32>
    %c8_i32 = arith.constant 8 : i32
    %39 = tpu.dynamic_rotate %30 by %c8_i32 dim 1 : vector<8x256xf32>, i32 -> vector<8x256xf32>
    %c1 = arith.constant 1 : index
    %c0_24 = arith.constant 0 : index
    %40 = vector.load %arg7[%c1, %c0_24] : memref<9x256xf32, #tpu.memory_space<vmem>>, vector<1x256xf32>
    %41 = vector.broadcast %40 : vector<1x256xf32> to vector<8x256xf32>
    %42 = arith.mulf %39, %41 : vector<8x256xf32>
    %c7_i32 = arith.constant 7 : i32
    %43 = tpu.dynamic_rotate %30 by %c7_i32 dim 1 : vector<8x256xf32>, i32 -> vector<8x256xf32>
    %c2 = arith.constant 2 : index
    %c0_25 = arith.constant 0 : index
    %44 = vector.load %arg7[%c2, %c0_25] : memref<9x256xf32, #tpu.memory_space<vmem>>, vector<1x256xf32>
    %45 = vector.broadcast %44 : vector<1x256xf32> to vector<8x256xf32>
    %46 = arith.mulf %43, %45 : vector<8x256xf32>
    %c1_i32 = arith.constant 1 : i32
    %47 = tpu.dynamic_rotate %30 by %c1_i32 dim 1 : vector<8x256xf32>, i32 -> vector<8x256xf32>
    %c3 = arith.constant 3 : index
    %c0_26 = arith.constant 0 : index
    %48 = vector.load %arg7[%c3, %c0_26] : memref<9x256xf32, #tpu.memory_space<vmem>>, vector<1x256xf32>
    %49 = vector.broadcast %48 : vector<1x256xf32> to vector<8x256xf32>
    %50 = arith.mulf %47, %49 : vector<8x256xf32>
    %c255_i32 = arith.constant 255 : i32
    %51 = tpu.dynamic_rotate %30 by %c255_i32 dim 1 : vector<8x256xf32>, i32 -> vector<8x256xf32>
    %c5 = arith.constant 5 : index
    %c0_27 = arith.constant 0 : index
    %52 = vector.load %arg7[%c5, %c0_27] : memref<9x256xf32, #tpu.memory_space<vmem>>, vector<1x256xf32>
    %53 = vector.broadcast %52 : vector<1x256xf32> to vector<8x256xf32>
    %54 = arith.mulf %51, %53 : vector<8x256xf32>
    %c249_i32 = arith.constant 249 : i32
    %55 = tpu.dynamic_rotate %30 by %c249_i32 dim 1 : vector<8x256xf32>, i32 -> vector<8x256xf32>
    %c6 = arith.constant 6 : index
    %c0_28 = arith.constant 0 : index
    %56 = vector.load %arg7[%c6, %c0_28] : memref<9x256xf32, #tpu.memory_space<vmem>>, vector<1x256xf32>
    %57 = vector.broadcast %56 : vector<1x256xf32> to vector<8x256xf32>
    %58 = arith.mulf %55, %57 : vector<8x256xf32>
    %c248_i32 = arith.constant 248 : i32
    %59 = tpu.dynamic_rotate %30 by %c248_i32 dim 1 : vector<8x256xf32>, i32 -> vector<8x256xf32>
    %c7 = arith.constant 7 : index
    %c0_29 = arith.constant 0 : index
    %60 = vector.load %arg7[%c7, %c0_29] : memref<9x256xf32, #tpu.memory_space<vmem>>, vector<1x256xf32>
    %61 = vector.broadcast %60 : vector<1x256xf32> to vector<8x256xf32>
    %62 = arith.mulf %59, %61 : vector<8x256xf32>
    %c247_i32 = arith.constant 247 : i32
    %63 = tpu.dynamic_rotate %30 by %c247_i32 dim 1 : vector<8x256xf32>, i32 -> vector<8x256xf32>
    %c8 = arith.constant 8 : index
    %c0_30 = arith.constant 0 : index
    %64 = vector.load %arg7[%c8, %c0_30] : memref<9x256xf32, #tpu.memory_space<vmem>>, vector<1x256xf32>
    %65 = vector.broadcast %64 : vector<1x256xf32> to vector<8x256xf32>
    %66 = arith.mulf %63, %65 : vector<8x256xf32>
    %67 = tpu.concatenate %38, %42, %46, %50, %30, %54, %58, %62, %66 in 0 : vector<8x256xf32>, vector<8x256xf32>, vector<8x256xf32>, vector<8x256xf32>, vector<8x256xf32>, vector<8x256xf32>, vector<8x256xf32>, vector<8x256xf32>, vector<8x256xf32> -> vector<72x256xf32>
    %cst_31 = arith.constant dense<0.000000e+00> : vector<8x256xf32>
    %68 = tpu.matmul %32, %67, %cst_31 {dimension_numbers = #tpu.dot_dimension_numbers<[1], [0], [0], [1], [0, 0, 1, 1], [], []>} : vector<8x72xf32>, vector<72x256xf32>, vector<8x256xf32> -> vector<8x256xf32>
    %69 = vector.broadcast %34 : vector<8x1xf32> to vector<8x256xf32>
    %70 = arith.addf %68, %69 : vector<8x256xf32>
    %cst_32 = arith.constant 0.000000e+00 : f32
    %71 = vector.broadcast %cst_32 : f32 to vector<8x256xf32>
    %72 = arith.cmpf ogt, %70, %71 : vector<8x256xf32>
    %cst_33 = arith.constant 2.000000e-01 : f32
    %73 = vector.broadcast %cst_33 : f32 to vector<8x256xf32>
    %74 = arith.mulf %73, %70 : vector<8x256xf32>
    %75 = arith.select %72, %70, %74 : vector<8x256xi1>, vector<8x256xf32>
    %c0_34 = arith.constant 0 : index
    %c0_35 = arith.constant 0 : index
    %76 = vector.load %arg6[%c0_34, %c0_35] : memref<256x1024xf32, #tpu.memory_space<vmem>>, vector<256x1024xf32>
    %cst_36 = arith.constant dense<0.000000e+00> : vector<8x1024xf32>
    %77 = tpu.matmul %75, %76, %cst_36 {dimension_numbers = #tpu.dot_dimension_numbers<[1], [0], [0], [1], [0, 0, 1, 1], [], []>} : vector<8x256xf32>, vector<256x1024xf32>, vector<8x1024xf32> -> vector<8x1024xf32>
    %c1_37 = arith.constant 1 : index
    %c0_38 = arith.constant 0 : index
    %c0_39 = arith.constant 0 : index
    %78 = vector.load %arg9[%c1_37, %c0_38, %c0_39] : memref<3x8x72xf32, #tpu.memory_space<vmem>>, vector<1x8x72xf32>
    %79 = vector.shape_cast %78 : vector<1x8x72xf32> to vector<8x72xf32>
    %c1_40 = arith.constant 1 : index
    %c0_41 = arith.constant 0 : index
    %c0_42 = arith.constant 0 : index
    %80 = vector.load %arg10[%c1_40, %c0_41, %c0_42] : memref<3x8x1xf32, #tpu.memory_space<vmem>>, vector<1x8x1xf32>
    %81 = vector.shape_cast %80 : vector<1x8x1xf32> to vector<8x1xf32>
    %c17_i32 = arith.constant 17 : i32
    %82 = tpu.dynamic_rotate %77 by %c17_i32 dim 1 : vector<8x1024xf32>, i32 -> vector<8x1024xf32>
    %c0_43 = arith.constant 0 : index
    %c0_44 = arith.constant 0 : index
    %83 = vector.load %arg8[%c0_43, %c0_44] : memref<9x1024xf32, #tpu.memory_space<vmem>>, vector<1x1024xf32>
    %84 = vector.broadcast %83 : vector<1x1024xf32> to vector<8x1024xf32>
    %85 = arith.mulf %82, %84 : vector<8x1024xf32>
    %c16_i32 = arith.constant 16 : i32
    %86 = tpu.dynamic_rotate %77 by %c16_i32 dim 1 : vector<8x1024xf32>, i32 -> vector<8x1024xf32>
    %c1_45 = arith.constant 1 : index
    %c0_46 = arith.constant 0 : index
    %87 = vector.load %arg8[%c1_45, %c0_46] : memref<9x1024xf32, #tpu.memory_space<vmem>>, vector<1x1024xf32>
    %88 = vector.broadcast %87 : vector<1x1024xf32> to vector<8x1024xf32>
    %89 = arith.mulf %86, %88 : vector<8x1024xf32>
    %c15_i32 = arith.constant 15 : i32
    %90 = tpu.dynamic_rotate %77 by %c15_i32 dim 1 : vector<8x1024xf32>, i32 -> vector<8x1024xf32>
    %c2_47 = arith.constant 2 : index
    %c0_48 = arith.constant 0 : index
    %91 = vector.load %arg8[%c2_47, %c0_48] : memref<9x1024xf32, #tpu.memory_space<vmem>>, vector<1x1024xf32>
    %92 = vector.broadcast %91 : vector<1x1024xf32> to vector<8x1024xf32>
    %93 = arith.mulf %90, %92 : vector<8x1024xf32>
    %c1_i32_49 = arith.constant 1 : i32
    %94 = tpu.dynamic_rotate %77 by %c1_i32_49 dim 1 : vector<8x1024xf32>, i32 -> vector<8x1024xf32>
    %c3_50 = arith.constant 3 : index
    %c0_51 = arith.constant 0 : index
    %95 = vector.load %arg8[%c3_50, %c0_51] : memref<9x1024xf32, #tpu.memory_space<vmem>>, vector<1x1024xf32>
    %96 = vector.broadcast %95 : vector<1x1024xf32> to vector<8x1024xf32>
    %97 = arith.mulf %94, %96 : vector<8x1024xf32>
    %c1023_i32 = arith.constant 1023 : i32
    %98 = tpu.dynamic_rotate %77 by %c1023_i32 dim 1 : vector<8x1024xf32>, i32 -> vector<8x1024xf32>
    %c5_52 = arith.constant 5 : index
    %c0_53 = arith.constant 0 : index
    %99 = vector.load %arg8[%c5_52, %c0_53] : memref<9x1024xf32, #tpu.memory_space<vmem>>, vector<1x1024xf32>
    %100 = vector.broadcast %99 : vector<1x1024xf32> to vector<8x1024xf32>
    %101 = arith.mulf %98, %100 : vector<8x1024xf32>
    %c1009_i32 = arith.constant 1009 : i32
    %102 = tpu.dynamic_rotate %77 by %c1009_i32 dim 1 : vector<8x1024xf32>, i32 -> vector<8x1024xf32>
    %c6_54 = arith.constant 6 : index
    %c0_55 = arith.constant 0 : index
    %103 = vector.load %arg8[%c6_54, %c0_55] : memref<9x1024xf32, #tpu.memory_space<vmem>>, vector<1x1024xf32>
    %104 = vector.broadcast %103 : vector<1x1024xf32> to vector<8x1024xf32>
    %105 = arith.mulf %102, %104 : vector<8x1024xf32>
    %c1008_i32 = arith.constant 1008 : i32
    %106 = tpu.dynamic_rotate %77 by %c1008_i32 dim 1 : vector<8x1024xf32>, i32 -> vector<8x1024xf32>
    %c7_56 = arith.constant 7 : index
    %c0_57 = arith.constant 0 : index
    %107 = vector.load %arg8[%c7_56, %c0_57] : memref<9x1024xf32, #tpu.memory_space<vmem>>, vector<1x1024xf32>
    %108 = vector.broadcast %107 : vector<1x1024xf32> to vector<8x1024xf32>
    %109 = arith.mulf %106, %108 : vector<8x1024xf32>
    %c1007_i32 = arith.constant 1007 : i32
    %110 = tpu.dynamic_rotate %77 by %c1007_i32 dim 1 : vector<8x1024xf32>, i32 -> vector<8x1024xf32>
    %c8_58 = arith.constant 8 : index
    %c0_59 = arith.constant 0 : index
    %111 = vector.load %arg8[%c8_58, %c0_59] : memref<9x1024xf32, #tpu.memory_space<vmem>>, vector<1x1024xf32>
    %112 = vector.broadcast %111 : vector<1x1024xf32> to vector<8x1024xf32>
    %113 = arith.mulf %110, %112 : vector<8x1024xf32>
    %114 = tpu.concatenate %85, %89, %93, %97, %77, %101, %105, %109, %113 in 0 : vector<8x1024xf32>, vector<8x1024xf32>, vector<8x1024xf32>, vector<8x1024xf32>, vector<8x1024xf32>, vector<8x1024xf32>, vector<8x1024xf32>, vector<8x1024xf32>, vector<8x1024xf32> -> vector<72x1024xf32>
    %cst_60 = arith.constant dense<0.000000e+00> : vector<8x1024xf32>
    %115 = tpu.matmul %79, %114, %cst_60 {dimension_numbers = #tpu.dot_dimension_numbers<[1], [0], [0], [1], [0, 0, 1, 1], [], []>} : vector<8x72xf32>, vector<72x1024xf32>, vector<8x1024xf32> -> vector<8x1024xf32>
    %116 = vector.broadcast %81 : vector<8x1xf32> to vector<8x1024xf32>
    %117 = arith.addf %115, %116 : vector<8x1024xf32>
    %cst_61 = arith.constant 0.000000e+00 : f32
    %118 = vector.broadcast %cst_61 : f32 to vector<8x1024xf32>
    %119 = arith.cmpf ogt, %117, %118 : vector<8x1024xf32>
    %cst_62 = arith.constant 2.000000e-01 : f32
    %120 = vector.broadcast %cst_62 : f32 to vector<8x1024xf32>
    %121 = arith.mulf %120, %117 : vector<8x1024xf32>
    %122 = arith.select %119, %117, %121 : vector<8x1024xi1>, vector<8x1024xf32>
    %c2_63 = arith.constant 2 : index
    %c0_64 = arith.constant 0 : index
    %c0_65 = arith.constant 0 : index
    %123 = vector.load %arg9[%c2_63, %c0_64, %c0_65] : memref<3x8x72xf32, #tpu.memory_space<vmem>>, vector<1x8x72xf32>
    %124 = vector.shape_cast %123 : vector<1x8x72xf32> to vector<8x72xf32>
    %c2_66 = arith.constant 2 : index
    %c0_67 = arith.constant 0 : index
    %c0_68 = arith.constant 0 : index
    %125 = vector.load %arg10[%c2_66, %c0_67, %c0_68] : memref<3x8x1xf32, #tpu.memory_space<vmem>>, vector<1x8x1xf32>
    %126 = vector.shape_cast %125 : vector<1x8x1xf32> to vector<8x1xf32>
    %c17_i32_69 = arith.constant 17 : i32
    %127 = tpu.dynamic_rotate %122 by %c17_i32_69 dim 1 : vector<8x1024xf32>, i32 -> vector<8x1024xf32>
    %c0_70 = arith.constant 0 : index
    %c0_71 = arith.constant 0 : index
    %128 = vector.load %arg8[%c0_70, %c0_71] : memref<9x1024xf32, #tpu.memory_space<vmem>>, vector<1x1024xf32>
    %129 = vector.broadcast %128 : vector<1x1024xf32> to vector<8x1024xf32>
    %130 = arith.mulf %127, %129 : vector<8x1024xf32>
    %c16_i32_72 = arith.constant 16 : i32
    %131 = tpu.dynamic_rotate %122 by %c16_i32_72 dim 1 : vector<8x1024xf32>, i32 -> vector<8x1024xf32>
    %c1_73 = arith.constant 1 : index
    %c0_74 = arith.constant 0 : index
    %132 = vector.load %arg8[%c1_73, %c0_74] : memref<9x1024xf32, #tpu.memory_space<vmem>>, vector<1x1024xf32>
    %133 = vector.broadcast %132 : vector<1x1024xf32> to vector<8x1024xf32>
    %134 = arith.mulf %131, %133 : vector<8x1024xf32>
    %c15_i32_75 = arith.constant 15 : i32
    %135 = tpu.dynamic_rotate %122 by %c15_i32_75 dim 1 : vector<8x1024xf32>, i32 -> vector<8x1024xf32>
    %c2_76 = arith.constant 2 : index
    %c0_77 = arith.constant 0 : index
    %136 = vector.load %arg8[%c2_76, %c0_77] : memref<9x1024xf32, #tpu.memory_space<vmem>>, vector<1x1024xf32>
    %137 = vector.broadcast %136 : vector<1x1024xf32> to vector<8x1024xf32>
    %138 = arith.mulf %135, %137 : vector<8x1024xf32>
    %c1_i32_78 = arith.constant 1 : i32
    %139 = tpu.dynamic_rotate %122 by %c1_i32_78 dim 1 : vector<8x1024xf32>, i32 -> vector<8x1024xf32>
    %c3_79 = arith.constant 3 : index
    %c0_80 = arith.constant 0 : index
    %140 = vector.load %arg8[%c3_79, %c0_80] : memref<9x1024xf32, #tpu.memory_space<vmem>>, vector<1x1024xf32>
    %141 = vector.broadcast %140 : vector<1x1024xf32> to vector<8x1024xf32>
    %142 = arith.mulf %139, %141 : vector<8x1024xf32>
    %c1023_i32_81 = arith.constant 1023 : i32
    %143 = tpu.dynamic_rotate %122 by %c1023_i32_81 dim 1 : vector<8x1024xf32>, i32 -> vector<8x1024xf32>
    %c5_82 = arith.constant 5 : index
    %c0_83 = arith.constant 0 : index
    %144 = vector.load %arg8[%c5_82, %c0_83] : memref<9x1024xf32, #tpu.memory_space<vmem>>, vector<1x1024xf32>
    %145 = vector.broadcast %144 : vector<1x1024xf32> to vector<8x1024xf32>
    %146 = arith.mulf %143, %145 : vector<8x1024xf32>
    %c1009_i32_84 = arith.constant 1009 : i32
    %147 = tpu.dynamic_rotate %122 by %c1009_i32_84 dim 1 : vector<8x1024xf32>, i32 -> vector<8x1024xf32>
    %c6_85 = arith.constant 6 : index
    %c0_86 = arith.constant 0 : index
    %148 = vector.load %arg8[%c6_85, %c0_86] : memref<9x1024xf32, #tpu.memory_space<vmem>>, vector<1x1024xf32>
    %149 = vector.broadcast %148 : vector<1x1024xf32> to vector<8x1024xf32>
    %150 = arith.mulf %147, %149 : vector<8x1024xf32>
    %c1008_i32_87 = arith.constant 1008 : i32
    %151 = tpu.dynamic_rotate %122 by %c1008_i32_87 dim 1 : vector<8x1024xf32>, i32 -> vector<8x1024xf32>
    %c7_88 = arith.constant 7 : index
    %c0_89 = arith.constant 0 : index
    %152 = vector.load %arg8[%c7_88, %c0_89] : memref<9x1024xf32, #tpu.memory_space<vmem>>, vector<1x1024xf32>
    %153 = vector.broadcast %152 : vector<1x1024xf32> to vector<8x1024xf32>
    %154 = arith.mulf %151, %153 : vector<8x1024xf32>
    %c1007_i32_90 = arith.constant 1007 : i32
    %155 = tpu.dynamic_rotate %122 by %c1007_i32_90 dim 1 : vector<8x1024xf32>, i32 -> vector<8x1024xf32>
    %c8_91 = arith.constant 8 : index
    %c0_92 = arith.constant 0 : index
    %156 = vector.load %arg8[%c8_91, %c0_92] : memref<9x1024xf32, #tpu.memory_space<vmem>>, vector<1x1024xf32>
    %157 = vector.broadcast %156 : vector<1x1024xf32> to vector<8x1024xf32>
    %158 = arith.mulf %155, %157 : vector<8x1024xf32>
    %159 = tpu.concatenate %130, %134, %138, %142, %122, %146, %150, %154, %158 in 0 : vector<8x1024xf32>, vector<8x1024xf32>, vector<8x1024xf32>, vector<8x1024xf32>, vector<8x1024xf32>, vector<8x1024xf32>, vector<8x1024xf32>, vector<8x1024xf32>, vector<8x1024xf32> -> vector<72x1024xf32>
    %cst_93 = arith.constant dense<0.000000e+00> : vector<8x1024xf32>
    %160 = tpu.matmul %124, %159, %cst_93 {dimension_numbers = #tpu.dot_dimension_numbers<[1], [0], [0], [1], [0, 0, 1, 1], [], []>} : vector<8x72xf32>, vector<72x1024xf32>, vector<8x1024xf32> -> vector<8x1024xf32>
    %161 = vector.broadcast %126 : vector<8x1xf32> to vector<8x1024xf32>
    %162 = arith.addf %160, %161 : vector<8x1024xf32>
    %163 = math.tanh %162 : vector<8x1024xf32>
    %164 = vector.extract_strided_slice %163 {offsets = [0, 0], sizes = [3, 1024], strides = [1, 1]} : vector<8x1024xf32> to vector<3x1024xf32>
    %c0_94 = arith.constant 0 : index
    %c0_95 = arith.constant 0 : index
    %165 = vector.load %arg11[%c0_94, %c0_95] : memref<3x1024xf32, #tpu.memory_space<vmem>>, vector<3x1024xf32>
    tpu.vector_store %arg11[%c0_94, %c0_95], %164 {strides = array<i32>} : memref<3x1024xf32, #tpu.memory_space<vmem>>, vector<3x1024xf32>,
    return
  }
  func.func @transform_0(%arg0: i32) -> (i32, i32, i32) {
    %c0_i32 = arith.constant 0 : i32
    %c0_i32_0 = arith.constant 0 : i32
    %c0_i32_1 = arith.constant 0 : i32
    return %arg0, %c0_i32, %c0_i32_0 : i32, i32, i32
  }
  func.func @transform_1(%arg0: i32) -> (i32, i32) {
    %c0_i32 = arith.constant 0 : i32
    %c0_i32_0 = arith.constant 0 : i32
    %c0_i32_1 = arith.constant 0 : i32
    return %c0_i32, %c0_i32_0 : i32, i32
  }
  func.func @transform_2(%arg0: i32) -> (i32, i32) {
    %c0_i32 = arith.constant 0 : i32
    %c0_i32_0 = arith.constant 0 : i32
    %c0_i32_1 = arith.constant 0 : i32
    return %c0_i32, %c0_i32_0 : i32, i32
  }
  func.func @transform_3(%arg0: i32) -> (i32, i32) {
    %c0_i32 = arith.constant 0 : i32
    %c0_i32_0 = arith.constant 0 : i32
    %c0_i32_1 = arith.constant 0 : i32
    return %c0_i32, %c0_i32_0 : i32, i32
  }
  func.func @transform_4(%arg0: i32) -> (i32, i32) {
    %c0_i32 = arith.constant 0 : i32
    %c0_i32_0 = arith.constant 0 : i32
    %c0_i32_1 = arith.constant 0 : i32
    return %c0_i32, %c0_i32_0 : i32, i32
  }
  func.func @transform_5(%arg0: i32) -> (i32, i32) {
    %c0_i32 = arith.constant 0 : i32
    %c0_i32_0 = arith.constant 0 : i32
    %c0_i32_1 = arith.constant 0 : i32
    return %c0_i32, %c0_i32_0 : i32, i32
  }
  func.func @transform_6(%arg0: i32) -> (i32, i32) {
    %c0_i32 = arith.constant 0 : i32
    %c0_i32_0 = arith.constant 0 : i32
    %c0_i32_1 = arith.constant 0 : i32
    return %c0_i32, %c0_i32_0 : i32, i32
  }
  func.func @transform_7(%arg0: i32) -> (i32, i32) {
    %c0_i32 = arith.constant 0 : i32
    %c0_i32_0 = arith.constant 0 : i32
    %c0_i32_1 = arith.constant 0 : i32
    return %c0_i32, %c0_i32_0 : i32, i32
  }
  func.func @transform_8(%arg0: i32) -> (i32, i32, i32) {
    %c0_i32 = arith.constant 0 : i32
    %c0_i32_0 = arith.constant 0 : i32
    %c0_i32_1 = arith.constant 0 : i32
    %c0_i32_2 = arith.constant 0 : i32
    return %c0_i32, %c0_i32_0, %c0_i32_1 : i32, i32, i32
  }
  func.func @transform_9(%arg0: i32) -> (i32, i32, i32) {
    %c0_i32 = arith.constant 0 : i32
    %c0_i32_0 = arith.constant 0 : i32
    %c0_i32_1 = arith.constant 0 : i32
    %c0_i32_2 = arith.constant 0 : i32
    return %c0_i32, %c0_i32_0, %c0_i32_1 : i32, i32, i32
  }
  func.func @transform_10(%arg0: i32) -> (i32, i32) {
    %c0_i32 = arith.constant 0 : i32
    %c0_i32_0 = arith.constant 0 : i32
    return %c0_i32, %arg0 : i32, i32
  }
}

</mosaic_0001>

<bundles_post_ra>
// kernel: decoder_forward.1
= control target key start
LH: loop header
LB: loop body
LE: loop exit
PB: predicated region body
PF: predicated region fallthrough
CT: control target
= control target key end

     0   :  { %15 = vsyncpa [#allocation3], 0  ;;  %s4133_s13 = smov 0   ;;  %s5814_s0 = inlined_call_operand.vmem [shape: f32[2,4,32], index: 0, kind: input, shape index: {}]   ;;  %s5815_s1 = inlined_call_operand.vmem [shape: f32[32,128], index: 1, kind: input, shape index: {}]   ;;  %s5816_s2 = inlined_call_operand.vmem [shape: f32[1,128], index: 2, kind: input, shape index: {}]   ;;  %s5817_s3 = inlined_call_operand.vmem [shape: f32[8,128], index: 3, kind: input, shape index: {}]   ;;  %s5818_s4 = inlined_call_operand.vmem [shape: f32[128,64], index: 4, kind: input, shape index: {}]   ;;  %s5819_s5 = inlined_call_operand.hbm [shape: f32[256,1024], index: 5, kind: input, shape index: {}]   ;;  %s5820_s6 = inlined_call_operand.vmem [shape: f32[9,256], index: 6, kind: input, shape index: {}]   ;;  %s5821_s7 = inlined_call_operand.vmem [shape: f32[9,1024], index: 7, kind: input, shape index: {}]   ;;  %s5822_s8 = inlined_call_operand.vmem [shape: f32[3,8,72], index: 8, kind: input, shape index: {}]   ;;  %s5823_s9 = inlined_call_operand.vmem [shape: f32[3,8,1], index: 9, kind: input, shape index: {}]   ;;  %s5824_s10 = inlined_call_operand.vmem [shape: f32[3,2048], index: 10, kind: output, shape index: {}]  }
   0x1 LB: > { %s4139_s14 = sadd.s32 4294967295, %s4054_s13   ;;  %p3186_p0 = scmp.ge.s32.totalorder %s4054_s13, 1  ;;  %s4054_s13 = sphi %s4133_s13, %s21_s13  }
   0x2   : > { %p267_p1 = scmp.lt.s32.totalorder %s4054_s13, 3  ;;  %s4056_s15 = smov [#allocation2]  }
   0x3   : > { %s291_s16 = sshll.u32 %s4056_s15, 4  ;;  %p5825_p3 = scmp.eq.s32.totalorder %s4139_s14, 0  ;;  %s292_s16 = int_to_ptr.vmem [resolvable:$true] %s291_s16 }
   0x4   : > { %p4143_p2 = pnand %p3186_p0, %p267_p1  ;;  %s4016_s21 = scalar_lea.hbm %s5819_s5, 32768 }
   0x5   : > { %p4017_p6 = scmp.ne.s32.totalorder %s5819_s5, %s4016_s21  ;;  %p4023_p10 = scmp.lt.u32.totalorder %s4016_s21, %s5819_s5 }
   0x6   : > { %s5909_s17 = scalar_select %p4143_p2, 1, 0 }
   0x7   : > { %p3962_p4 = pneg %p4143_p2 }
   0x9   : > { %p4152_p5 = pnand %p5825_p3, %p3962_p4 }
   0xb   : > { %p4018_p7 = pneg %p4152_p5 }
   0xd   : > { %p4019_p8 = pnand %p4018_p7, %p4017_p6 }
   0xf   : > { %p4020_p9 = pneg %p4019_p8 }
  0x11   : > { %p4025_p11 = pnand %p4023_p10, %p4020_p9 }
  0x13   : > { %4028 = shalt.err (!%p4025_p11)
}
  0x14   : > { %s4029_s26 = scalar_lea.vmem %s292_s16, 32768  ;;  %p4037_p1 = scmp.lt.s32.totalorder %s292_s16, %s292_s16 }
  0x15   : > { %p4030_p12 = scmp.ne.s32.totalorder %s292_s16, %s4029_s26  ;;  %p4038_p4 = scmp.lt.s32.totalorder %s4029_s26, %s4029_s26 }
  0x17   : > { %p4032_p13 = pnand %p4030_p12, %p4018_p7  ;;  %p4039_p3 = por %p4038_p4, %p4037_p1 }
  0x19   : > { %p4033_p0 = pneg %p4032_p13 }
  0x1b   : > { %p4040_p2 = pnand %p4039_p3, %p4033_p0 }
  0x1d   : > { %4043 = shalt.err (!%p4040_p2)
}
  0x1e   : > { %s4057_s27 = smov 1024   ;;  %s4058_s28 = smov 64  }
  0x1f   : > { %3965 = dma.hbm_to_vmem [thread:$0]  (!%p4152_p5), %s5819_s5, 32768, %s292_s16, [#allocation3], %s4057_s27, %s4057_s27, %s4058_s28  }
  0x20   : > { %p5911_p6 = scmp.ne.s32.totalorder %s5909_s17, 0 }
  0x22   : > { %326 = sbr.rel (%p5911_p6) target bundleno = 2114 (0x842), region = 60 }
  0x29   : > { %p5912_p8 = scmp.eq.s32.totalorder %s4139_s14, 0 }
  0x2b   : > { %4049 = dma.done.wait (%p5912_p8), [#allocation3], 32768   ;;  %p5913_p7 = pmov %p5912_p8 }
  0x2c   : > { %p363_p2 = scmp.lt.s32.totalorder %s4139_s14, 1  ;;  %v4059_v0 = vmov 0.0|0.0   ;;  %vm4060_vm0 = vmmov 0   ;;  %v5827_v1 = vmov 0.0   ;;  %v374_v2 = vld [vmem:[%s5815_s1] sm:$0xff]  ;;  %v375_v3 = vld [vmem:[%s5815_s1 + $0x8] sm:$0xff]  ;;  %v479_v33 = vlaneseq }
  0x2d   : > { %4051 = vsyncadd (%p5913_p7), [#allocation3], 4294934528  ;;  %3456 = vmatprep.subr.bf16.mxu0 %v4059_v0  ;;  %3313 = vmatprep.mubr.msk.f32.mxu0 %vm4060_vm0, %v5827_v1  ;;  %v376_v4 = vld [vmem:[%s5815_s1 + $0x10] sm:$0xff]  ;;  %v3457_v5 = vpack.c.bf16 %v375_v3, %v374_v2  ;;  %v377_v6 = vld [vmem:[%s5815_s1 + $0x18] sm:$0xff]  ;;  %vm385_vm1 = vcmask 261120   ;;  %s4062_s26 = smov 64  }
  0x2e   : > { %3462 = vmatprep.subr.bf16.mxu1 %v4059_v0  ;;  %3348 = vmatprep.mubr.msk.f32.mxu1 %vm4060_vm0, %v5827_v1  ;;  %s364_s11 = scalar_select %p363_p2, %s4139_s14, 1  ;;  %v463_v7 = vld [vmem:[%s5818_s4] sm:$0xff]  ;;  %v464_v8 = vld [vmem:[%s5818_s4 + $0x8] sm:$0xff]  ;;  %v465_v9 = vld [vmem:[%s5818_s4 + $0x10] sm:$0xff]  ;;  %v3460_v11 = vpack.c.bf16 %v377_v6, %v376_v4  ;;  %v4297_v35 = vshrl.u32 %v479_v33, 7  ;;  %vm787_vm3 = vcmask 523264  }
  0x2f   : > { %v466_v10 = vld [vmem:[%s5818_s4 + $0x18] sm:$0xff]  ;;  %3458 = vmatpush3.bf16.msra.mxu0 %v3457_v5  ;;  %v4210_v12 = vpack.c.bf16 %v464_v8, %v463_v7  ;;  %v467_v14 = vld [vmem:[%s5818_s4 + $0x20] sm:$0xff]  ;;  %v468_v15 = vld [vmem:[%s5818_s4 + $0x28] sm:$0xff]  ;;  %s4063_s27 = smov 9   ;;  %s4064_s28 = smov 8   ;;  %v4071_v6 = vmov 0  }
  0x30   : > { %s3191_s22 = sshll.u32 %s364_s11, 2  ;;  %3459 = vmatprep.subr.bf16.mxu0 %v4059_v0  ;;  %v4217_v13 = vpack.c.bf16 %v466_v10, %v465_v9  ;;  %v4228_v17 = vpack.c.bf16 %v468_v15, %v467_v14  ;;  %v469_v18 = vld [vmem:[%s5818_s4 + $0x30] sm:$0xff]  ;;  %v470_v19 = vld [vmem:[%s5818_s4 + $0x38] sm:$0xff]  ;;  %v471_v21 = vld [vmem:[%s5818_s4 + $0x40] sm:$0xff]  ;;  %v4300_v39 = vsub.s32 0, %v4297_v35  ;;  %v4303_v40 = vsub.s32 1, %v4297_v35  ;;  %3998 = vset.pattern.permute.xlu0 %v4071_v6 }
  0x31   : > { %s366_s15 = scalar_lea.vmem %s5814_s0, %s3191_s22  ;;  %3464 = vmatpush3.bf16.msra.mxu1 %v4210_v12  ;;  %v4242_v20 = vpack.c.bf16 %v470_v19, %v469_v18  ;;  %v472_v22 = vld [vmem:[%s5818_s4 + $0x48] sm:$0xff]  ;;  %v473_v24 = vld [vmem:[%s5818_s4 + $0x50] sm:$0xff]  ;;  %v474_v25 = vld [vmem:[%s5818_s4 + $0x58] sm:$0xff]  ;;  %v4337_v48 = vsub.s32 2, %v4297_v35  ;;  %v4340_v49 = vsub.s32 3, %v4297_v35  ;;  %s4065_s29 = smov 7   ;;  %3999 = vset.pattern.permute.xlu1 %v4071_v6 }
  0x32   : > { %3465 = vmatprep.subr.bf16.mxu1 %v4059_v0  ;;  %v373_v16 = vld [vmem:[%s366_s15] sm:$0xf]  ;;  %v4254_v23 = vpack.c.bf16 %v472_v22, %v471_v21  ;;  %v4266_v26 = vpack.c.bf16 %v474_v25, %v473_v24  ;;  %v476_v28 = vld [vmem:[%s5818_s4 + $0x68] sm:$0xff]  ;;  %v477_v30 = vld [vmem:[%s5818_s4 + $0x70] sm:$0xff]  ;;  %s4066_s30 = smov 1   ;;  %s4067_s11 = smov 127  }
  0x33   : > { %3461 = vmatpush3.bf16.msra.mxu0 %v3460_v11  ;;  %v475_v27 = vld [vmem:[%s5818_s4 + $0x60] sm:$0xff]  ;;  %v478_v31 = vld [vmem:[%s5818_s4 + $0x78] sm:$0xff]  ;;  %s4068_s12 = smov 121   ;;  %s4069_s15 = smov 120   ;;  %v1056_v4 = vld [vmem:[#allocation2 + $0x8] sm:$0xff]  ;;  %vm974_vm12 = vcmask 588800  }
  0x34   : > { %3486 = vmatprep.subr.bf16.mxu0 %v4059_v0  ;;  %v3481_v29 = vpack.c.bf16 %v476_v28, %v475_v27  ;;  %v3484_v32 = vpack.c.bf16 %v478_v31, %v477_v30  ;;  %v3194_v34 = vld [vmem:[%s5816_s2] ss:$0 sm:$0xff]  ;;  %s4070_s16 = smov 119   ;;  %v1064_v5 = vld [vmem:[#allocation2 + $0x48] sm:$0xff]  ;;  %s4072_s21 = smov 16  }
  0x35   : > { %3467 = vmatpush3.bf16.msra.mxu1 %v4217_v13  ;;  %v462_v43 = vld [vmem:[%s5817_s3] sm:$0xff]  ;;  %v3574_v7 = vpack.c.bf16 %v1064_v5, %v1056_v4  ;;  %v1072_v11 = vld [vmem:[#allocation2 + $0x88] sm:$0xff]  ;;  %s4073_s22 = smov 17   ;;  %s4074_s23 = smov 15  }
  0x36   : > { %3314 = vmatmul.mubr.msk.f32.vlgmr.msra.gmra.mrb[0].mxu0 %vm385_vm1, %v373_v16  ;;  %3468 = vmatprep.subr.bf16.mxu1 %v4059_v0  ;;  %v791_v3 = vld [vmem:[%s5823_s9] sm:$0xff]  ;;  %v1096_v18 = vld [vmem:[#allocation2 + $0x148] sm:$0xff]  ;;  %s4075_s24 = smov 113   ;;  %s4076_s25 = smov 111  }
  0x37   : > { %3488 = vmatpush3.bf16.msra.mxu0 %v4210_v12  ;;  %3383 = vmatprep.mubr.msk.f32.mxu0 %vm4060_vm0, %v5827_v1  ;;  %v1055_v8 = vld [vmem:[#allocation2] sm:$0xff]  ;;  %v1112_v24 = vld [vmem:[#allocation2 + $0x1c8] sm:$0xff] }
  0x38   : > { %3489 = vmatprep.subr.bf16.mxu0 %v4059_v0  ;;  %v1063_v9 = vld [vmem:[#allocation2 + $0x40] sm:$0xff]  ;;  %v1128_v30 = vld [vmem:[#allocation2 + $0x248] sm:$0xff] }
  0x39   : > { %3470 = vmatpush3.bf16.msra.mxu1 %v4228_v17  ;;  %v3576_v10 = vpack.c.bf16 %v1063_v9, %v1055_v8  ;;  %v1071_v14 = vld [vmem:[#allocation2 + $0x80] sm:$0xff]  ;;  %v1200_v4 = vld [vmem:[#allocation2 + $0x488] sm:$0xff] }
  0x3a   : > { %3471 = vmatprep.subr.bf16.mxu1 %v4059_v0  ;;  %v1079_v15 = vld [vmem:[#allocation2 + $0xc0] sm:$0xff]  ;;  %v1208_v5 = vld [vmem:[#allocation2 + $0x4c8] sm:$0xff] }
  0x3b   : > { %3491 = vmatpush3.bf16.msra.mxu0 %v4217_v13  ;;  %v3580_v16 = vpack.c.bf16 %v1079_v15, %v1071_v14  ;;  %v1095_v21 = vld [vmem:[#allocation2 + $0x140] sm:$0xff]  ;;  %v3610_v6 = vpack.c.bf16 %v1208_v5, %v1200_v4 }
  0x3c   : > { %3492 = vmatprep.subr.bf16.mxu0 %v4059_v0  ;;  %v1111_v27 = vld [vmem:[#allocation2 + $0x1c0] sm:$0xff] }
  0x3d   : > { %3473 = vmatpush3.bf16.msra.mxu1 %v4242_v20  ;;  %v1207_v8 = vld [vmem:[#allocation2 + $0x4c0] sm:$0xff] }
  0x3e   : > { %3474 = vmatprep.subr.bf16.mxu1 %v4059_v0  ;;  %v1223_v14 = vld [vmem:[#allocation2 + $0x540] sm:$0xff] }
  0x3f   : > { %3494 = vmatpush3.bf16.msra.mxu0 %v4228_v17 }
  0x40   : > { %3495 = vmatprep.subr.bf16.mxu0 %v4059_v0 }
  0x41   : > { %3476 = vmatpush3.bf16.msra.mxu1 %v4254_v23 }
  0x42   : > { %3477 = vmatprep.subr.bf16.mxu1 %v4059_v0 }
  0x43   : > { %3497 = vmatpush3.bf16.msra.mxu0 %v4242_v20 }
  0x44   : > { %3498 = vmatprep.subr.bf16.mxu0 %v4059_v0 }
  0x45   : > { %3479 = vmatpush3.bf16.msra.mxu1 %v4266_v26 }
  0x46   : > { %3480 = vmatprep.subr.bf16.mxu1 %v4059_v0 }
  0x47   : > { %3500 = vmatpush3.bf16.msra.mxu0 %v4254_v23 }
  0x48   : > { %3501 = vmatprep.subr.bf16.mxu0 %v4059_v0 }
  0x49   : > { %3482 = vmatpush3.bf16.msra.mxu1 %v3481_v29 }
  0x4a   : > { %3483 = vmatprep.subr.bf16.mxu1 %v4059_v0 }
  0x4b   : > { %3503 = vmatpush3.bf16.msra.mxu0 %v4266_v26 }
  0x4c   : > { %3504 = vmatprep.subr.bf16.mxu0 %v4059_v0 }
  0x4d   : > { %3485 = vmatpush3.bf16.msra.mxu1 %v3484_v32 }
  0x4e   : > { %3510 = vmatprep.subr.bf16.mxu1 %v4059_v0 }
  0x4f   : > { %3506 = vmatpush3.bf16.msra.mxu0 %v3481_v29 }
  0x50   : > { %3507 = vmatprep.subr.bf16.mxu0 %v4059_v0 }
  0x53   : > { %3509 = vmatpush3.bf16.msra.mxu0 %v3484_v32 }
  0x54   : > { %3534 = vmatprep.subr.bf16.mxu0 %v4059_v0 }
 0x109   : > { %v455_v36 = vpop.f32.mrb[0].mxu0 }
 0x10a   : > { %v456_v37 = vadd.f32 %v3194_v34, %v455_v36  ;;  %v3315_v38 = vpop.f32.mrb[1].mxu0  ;;  %v1127_v34 = vld [vmem:[#allocation2 + $0x240] sm:$0xff] }
 0x10b   : > { %v1144_v38 = vld [vmem:[#allocation2 + $0x2c8] sm:$0xff] }
 0x10c   : > { %vm459_vm2 = vcmp.gt.f32.partialorder %v456_v37, 0.0  ;;  %v460_v41 = vmul.f32 0.2, %v456_v37 }
 0x10e   : > { %v461_v42 = vsel %vm459_vm2, %v456_v37, %v460_v41  ;;  %v1136_v37 = vld [vmem:[#allocation2 + $0x288] sm:$0xff] }
 0x10f   : > { %v557_v44 = vrot.slane %v461_v42, %v4303_v40  ;;  %v482_v45 = vrot.slane %v461_v42, %v4300_v39  ;;  %v632_v50 = vrot.slane %v461_v42, %v4337_v48  ;;  %v707_v51 = vrot.slane %v461_v42, %v4340_v49  ;;  %v1135_v42 = vld [vmem:[#allocation2 + $0x280] sm:$0xff] }
 0x110   : > { %v3594_v41 = vpack.c.bf16 %v1144_v38, %v1136_v37  ;;  %v1288_v37 = vld [vmem:[#allocation2 + $0x748] sm:$0xff] }
 0x111   : > { %v483_v46 = vmul.f32 %v482_v45, %v462_v43  ;;  %v558_v47 = vmul.f32 %v557_v44, %v462_v43  ;;  %v633_v52 = vmul.f32 %v632_v50, %v462_v43  ;;  %v708_v53 = vmul.f32 %v707_v51, %v462_v43  ;;  %v1143_v43 = vld [vmem:[#allocation2 + $0x2c0] sm:$0xff]  ;;  %v1152_v45 = vld [vmem:[#allocation2 + $0x308] sm:$0xff] }
 0x112   : > { %v3596_v44 = vpack.c.bf16 %v1143_v43, %v1135_v42  ;;  %v1151_v50 = vld [vmem:[#allocation2 + $0x300] sm:$0xff]  ;;  %v4381_v42 = vand.u32 127, %v479_v33 }
 0x113   : > { %3349 = vmatmul.mubr.f32.vlgmr.msra.gmra.mrb[0].mxu1 %v483_v46  ;;  %3384 = vmatmul.mubr.f32.vlgmr.msra.gmra.mrb[2].mxu0 %v558_v47  ;;  %v1160_v46 = vld [vmem:[#allocation2 + $0x348] sm:$0xff]  ;;  %v1159_v51 = vld [vmem:[#allocation2 + $0x340] sm:$0xff] }
 0x114   : > { %3512 = vmatpush3.bf16.msra.mxu1 %v4210_v12  ;;  %3536 = vmatpush3.bf16.msra.mxu0 %v4210_v12  ;;  %v1080_v12 = vld [vmem:[#allocation2 + $0xc8] sm:$0xff]  ;;  %v3598_v47 = vpack.c.bf16 %v1160_v46, %v1152_v45  ;;  %vm798_vm4 = vcmp.lt.s32.totalorder %v4381_v42, 9  ;;  %vm819_vm5 = vcmp.lt.s32.totalorder %v4381_v42, 8  ;;  %vm841_vm6 = vcmp.lt.s32.totalorder %v4381_v42, 7 }
 0x115   : > { %3513 = vmatprep.subr.bf16.mxu1 %v4059_v0  ;;  %3537 = vmatprep.subr.bf16.mxu0 %v4059_v0  ;;  %v801_v45 = vld [vmem:[%s5820_s6] ss:$8 sm:$0x3]  ;;  %v3196_v46 = vld [vmem:[%s5820_s6 + $0x1] ss:$8 sm:$0x3] }
 0x116   : > { %3418 = vmatprep.mubr.msk.f32.mxu1 %vm4060_vm0, %v5827_v1  ;;  %3453 = vmatprep.mubr.msk.f32.mxu0 %vm4060_vm0, %v5827_v1  ;;  %v828_v33 = vrot.slane %v3196_v46, %v4300_v39  ;;  %vm863_vm7 = vcmp.lt.s32.totalorder %v4381_v42, 1  ;;  %vm885_vm8 = vcmp.lt.s32.totalorder %v4381_v42, 127  ;;  %vm907_vm9 = vcmp.lt.s32.totalorder %v4381_v42, 121 }
 0x117   : > { %vm929_vm10 = vcmp.lt.s32.totalorder %v4381_v42, 120  ;;  %vm951_vm11 = vcmp.lt.s32.totalorder %v4381_v42, 119  ;;  %vm1615_vm15 = vcmp.lt.s32.totalorder %v4381_v42, 17  ;;  %vm1692_vm0 = vcmp.lt.s32.totalorder %v4381_v42, 16 }
 0x118   : > { %3515 = vmatpush3.bf16.msra.mxu1 %v4217_v13  ;;  %3539 = vmatpush3.bf16.msra.mxu0 %v4217_v13  ;;  %v3578_v13 = vpack.c.bf16 %v1080_v12, %v1072_v11  ;;  %v1224_v11 = vld [vmem:[#allocation2 + $0x548] sm:$0xff]  ;;  %vm1770_vm1 = vcmp.lt.s32.totalorder %v4381_v42, 15  ;;  %vm2080_vm2 = vcmp.lt.s32.totalorder %v4381_v42, 112 }
 0x119   : > { %3516 = vmatprep.subr.bf16.mxu1 %v4059_v0  ;;  %3540 = vmatprep.subr.bf16.mxu0 %v4059_v0 }
 0x11c   : > { %3518 = vmatpush3.bf16.msra.mxu1 %v4228_v17  ;;  %3542 = vmatpush3.bf16.msra.mxu0 %v4228_v17  ;;  %v1088_v17 = vld [vmem:[#allocation2 + $0x108] sm:$0xff] }
 0x11d   : > { %3519 = vmatprep.subr.bf16.mxu1 %v4059_v0  ;;  %3543 = vmatprep.subr.bf16.mxu0 %v4059_v0  ;;  %v3582_v19 = vpack.c.bf16 %v1096_v18, %v1088_v17  ;;  %v1240_v17 = vld [vmem:[#allocation2 + $0x5c8] sm:$0xff] }
 0x120   : > { %3521 = vmatpush3.bf16.msra.mxu1 %v4242_v20  ;;  %3545 = vmatpush3.bf16.msra.mxu0 %v4242_v20  ;;  %v1087_v20 = vld [vmem:[#allocation2 + $0x100] sm:$0xff] }
 0x121   : > { %3522 = vmatprep.subr.bf16.mxu1 %v4059_v0  ;;  %3546 = vmatprep.subr.bf16.mxu0 %v4059_v0  ;;  %v3584_v22 = vpack.c.bf16 %v1095_v21, %v1087_v20  ;;  %v1239_v20 = vld [vmem:[#allocation2 + $0x5c0] sm:$0xff] }
 0x124   : > { %3524 = vmatpush3.bf16.msra.mxu1 %v4254_v23  ;;  %3548 = vmatpush3.bf16.msra.mxu0 %v4254_v23  ;;  %v1104_v23 = vld [vmem:[#allocation2 + $0x188] sm:$0xff] }
 0x125   : > { %3525 = vmatprep.subr.bf16.mxu1 %v4059_v0  ;;  %3549 = vmatprep.subr.bf16.mxu0 %v4059_v0  ;;  %v3586_v25 = vpack.c.bf16 %v1112_v24, %v1104_v23  ;;  %v1256_v23 = vld [vmem:[#allocation2 + $0x648] sm:$0xff] }
 0x128   : > { %3527 = vmatpush3.bf16.msra.mxu1 %v4266_v26  ;;  %3551 = vmatpush3.bf16.msra.mxu0 %v4266_v26  ;;  %v1103_v26 = vld [vmem:[#allocation2 + $0x180] sm:$0xff] }
 0x129   : > { %3528 = vmatprep.subr.bf16.mxu1 %v4059_v0  ;;  %3552 = vmatprep.subr.bf16.mxu0 %v4059_v0  ;;  %v3588_v28 = vpack.c.bf16 %v1111_v27, %v1103_v26  ;;  %v1255_v26 = vld [vmem:[#allocation2 + $0x640] sm:$0xff] }
 0x12c   : > { %3530 = vmatpush3.bf16.msra.mxu1 %v3481_v29  ;;  %3554 = vmatpush3.bf16.msra.mxu0 %v3481_v29  ;;  %v1120_v29 = vld [vmem:[#allocation2 + $0x208] sm:$0xff] }
 0x12d   : > { %3531 = vmatprep.subr.bf16.mxu1 %v4059_v0  ;;  %3555 = vmatprep.subr.bf16.mxu0 %v4059_v0  ;;  %v3590_v31 = vpack.c.bf16 %v1128_v30, %v1120_v29  ;;  %v1272_v29 = vld [vmem:[#allocation2 + $0x6c8] sm:$0xff] }
 0x130   : > { %3533 = vmatpush3.bf16.msra.mxu1 %v3484_v32  ;;  %3557 = vmatpush3.bf16.msra.mxu0 %v3484_v32  ;;  %v1119_v32 = vld [vmem:[#allocation2 + $0x200] sm:$0xff] }
 0x131   : > { %3575 = vmatprep.subr.bf16.mxu0 %v3574_v7  ;;  %v3592_v36 = vpack.c.bf16 %v1127_v34, %v1119_v32  ;;  %v1199_v7 = vld [vmem:[#allocation2 + $0x480] sm:$0xff] }
 0x132   : > { %v3612_v9 = vpack.c.bf16 %v1207_v8, %v1199_v7  ;;  %v1271_v32 = vld [vmem:[#allocation2 + $0x6c0] sm:$0xff] }
 0x133   : > { %3419 = vmatmul.mubr.f32.vlgmr.msra.gmra.mrb[2].mxu1 %v633_v52  ;;  %3454 = vmatmul.mubr.f32.vlgmr.msra.gmra.mrb[4].mxu0 %v708_v53  ;;  %v3600_v52 = vpack.c.bf16 %v1159_v51, %v1151_v50  ;;  %v1168_v53 = vld [vmem:[#allocation2 + $0x388] sm:$0xff]  ;;  %v806_v50 = vrot.slane %v801_v45, %v4300_v39  ;;  %v810_v51 = vrot.slane %v801_v45, %v4303_v40 }
 0x134   : > { %1042 = vmatprep.mubr.f32.mxu1 %v5827_v1  ;;  %3577 = vmatpush1.bf16.msra.mxu0 %v3576_v10  ;;  %v1216_v10 = vld [vmem:[#allocation2 + $0x508] sm:$0xff] }
 0x135   : > { %3579 = vmatprep.subr.bf16.mxu0 %v3578_v13  ;;  %v3614_v12 = vpack.c.bf16 %v1224_v11, %v1216_v10  ;;  %v1215_v13 = vld [vmem:[#allocation2 + $0x500] sm:$0xff] }
 0x136   : > { %v3616_v15 = vpack.c.bf16 %v1223_v14, %v1215_v13 }
 0x138   : > { %3581 = vmatpush1.bf16.msra.mxu0 %v3580_v16  ;;  %v1232_v16 = vld [vmem:[#allocation2 + $0x588] sm:$0xff] }
 0x139   : > { %3583 = vmatprep.subr.bf16.mxu0 %v3582_v19  ;;  %v3618_v18 = vpack.c.bf16 %v1240_v17, %v1232_v16  ;;  %v1231_v19 = vld [vmem:[#allocation2 + $0x580] sm:$0xff] }
 0x13a   : > { %v3620_v21 = vpack.c.bf16 %v1239_v20, %v1231_v19 }
 0x13c   : > { %3585 = vmatpush1.bf16.msra.mxu0 %v3584_v22  ;;  %v1248_v22 = vld [vmem:[#allocation2 + $0x608] sm:$0xff] }
 0x13d   : > { %3587 = vmatprep.subr.bf16.mxu0 %v3586_v25  ;;  %v3622_v24 = vpack.c.bf16 %v1256_v23, %v1248_v22  ;;  %v1247_v25 = vld [vmem:[#allocation2 + $0x600] sm:$0xff] }
 0x13e   : > { %v3624_v27 = vpack.c.bf16 %v1255_v26, %v1247_v25 }
 0x140   : > { %3589 = vmatpush1.bf16.msra.mxu0 %v3588_v28  ;;  %v1264_v28 = vld [vmem:[#allocation2 + $0x688] sm:$0xff] }
 0x141   : > { %3591 = vmatprep.subr.bf16.mxu0 %v3590_v31  ;;  %v3626_v30 = vpack.c.bf16 %v1272_v29, %v1264_v28  ;;  %v1263_v31 = vld [vmem:[#allocation2 + $0x680] sm:$0xff] }
 0x142   : > { %v3628_v34 = vpack.c.bf16 %v1271_v32, %v1263_v31  ;;  %v3200_v32 = vld [vmem:[%s5820_s6 + $0x6] ss:$8 sm:$0x3] }
 0x144   : > { %3593 = vmatpush1.bf16.msra.mxu0 %v3592_v36  ;;  %v1280_v36 = vld [vmem:[#allocation2 + $0x708] sm:$0xff] }
 0x145   : > { %3595 = vmatprep.subr.bf16.mxu0 %v3594_v41  ;;  %v3630_v38 = vpack.c.bf16 %v1288_v37, %v1280_v36 }
 0x148   : > { %3597 = vmatpush1.bf16.msra.mxu0 %v3596_v44 }
 0x149   : > { %3599 = vmatprep.subr.bf16.mxu0 %v3598_v47 }
 0x14c   : > { %3601 = vmatpush1.bf16.msra.mxu0 %v3600_v52  ;;  %v832_v52 = vrot.slane %v3196_v46, %v4303_v40 }
 0x1e6   : > { %v550_v54 = vpop.f32.mrb[0].mxu1  ;;  %v625_v55 = vpop.f32.mrb[2].mxu0 }
 0x1e7   : > { %v3350_v56 = vpop.f32.mrb[1].mxu1  ;;  %780 = vrot.lane.b32.xlu0 %v625_v55, %s4062_s26  ;;  %v3385_v57 = vpop.f32.mrb[3].mxu0 }
 0x1e8   : > { %v1167_v56 = vld [vmem:[#allocation2 + $0x380] sm:$0xff] }
 0x1e9   : > { %v1175_v57 = vld [vmem:[#allocation2 + $0x3c0] sm:$0xff] }
 0x206   : > { %v700_v58 = vpop.f32.mrb[2].mxu1  ;;  %v775_v59 = vpop.f32.mrb[4].mxu0 }
 0x207   : > { %v3420_v60 = vpop.f32.mrb[3].mxu1  ;;  %784 = vrot.lane.b32.xlu0 %v775_v59, %s4062_s26  ;;  %v3455_v61 = vpop.f32.mrb[5].mxu0  ;;  %v1184_v59 = vld [vmem:[#allocation2 + $0x408] sm:$0xff]  ;;  %s4077_s26 = smov 112  }
 0x208   : > { %v1192_v60 = vld [vmem:[#allocation2 + $0x448] sm:$0xff] }
 0x209   : > { %v3606_v61 = vpack.c.bf16 %v1192_v60, %v1184_v59 }
 0x259   : > { %v781_v62 = vpop.permute.xlu0 %780 }
 0x25a   : > { %v4350_v63 = vsel %vm787_vm3, %v550_v54, %v781_v62  ;;  %v1176_v54 = vld [vmem:[#allocation2 + $0x3c8] sm:$0xff]  ;;  %v1183_v62 = vld [vmem:[#allocation2 + $0x400] sm:$0xff] }
 0x25b   : > { %792 = vrot.lane.b32.xlu1 %v4350_v63, %s4063_s27  ;;  %815 = vrot.lane.b32.xlu0 %v4350_v63, %s4064_s28  ;;  %v3602_v55 = vpack.c.bf16 %v1176_v54, %v1168_v53 }
 0x25d   : > { %3603 = vmatprep.subr.bf16.mxu0 %v3602_v55 }
 0x25f   : > { %837 = vrot.lane.b32.xlu0 %v4350_v63, %s4065_s29 }
 0x263   : > { %859 = vrot.lane.b32.xlu0 %v4350_v63, %s4066_s30 }
 0x267   : > { %881 = vrot.lane.b32.xlu0 %v4350_v63, %s4067_s11 }
 0x26b   : > { %903 = vrot.lane.b32.xlu0 %v4350_v63, %s4068_s12 }
 0x26f   : > { %925 = vrot.lane.b32.xlu0 %v4350_v63, %s4069_s15 }
 0x273   : > { %947 = vrot.lane.b32.xlu0 %v4350_v63, %s4070_s16 }
 0x277   : > { %971 = vperm.xlu0 %3998, %v791_v3  }
 0x279   : > { %v785_v0 = vpop.permute.xlu0 %784 }
 0x27a   : > { %v4364_v2 = vsel %vm787_vm3, %v700_v58, %v785_v0  ;;  %v3604_v58 = vpack.c.bf16 %v1175_v57, %v1167_v56  ;;  %v1191_v0 = vld [vmem:[#allocation2 + $0x440] sm:$0xff]  ;;  %vm2002_vm3 = vcmp.lt.s32.totalorder %v4381_v42, 113 }
 0x27b   : > { %794 = vrot.lane.b32.xlu1 %v4364_v2, %s4063_s27  ;;  %v3608_v3 = vpack.c.bf16 %v1191_v0, %v1183_v62  ;;  %v3197_v0 = vld [vmem:[%s5820_s6 + $0x2] ss:$8 sm:$0x3] }
 0x27c   : > { %3605 = vmatpush1.bf16.msra.mxu0 %v3604_v58  ;;  %v850_v7 = vrot.slane %v3197_v0, %v4300_v39 }
 0x27d   : > { %3607 = vmatprep.subr.bf16.mxu0 %v3606_v61 }
 0x27f   : > { %817 = vrot.lane.b32.xlu1 %v4364_v2, %s4064_s28 }
 0x280   : > { %3609 = vmatpush1.bf16.msra.mxu0 %v3608_v3  ;;  %v3198_v3 = vld [vmem:[%s5820_s6 + $0x3] ss:$8 sm:$0x3] }
 0x281   : > { %3611 = vmatprep.subr.bf16.mxu0 %v3610_v6  ;;  %v872_v10 = vrot.slane %v3198_v3, %v4300_v39  ;;  %v876_v11 = vrot.slane %v3198_v3, %v4303_v40  ;;  %v1066_v3 = vld [vmem:[#allocation2 + $0x58] sm:$0xff] }
 0x283   : > { %839 = vrot.lane.b32.xlu1 %v4364_v2, %s4065_s29 }
 0x284   : > { %3613 = vmatpush1.bf16.msra.mxu0 %v3612_v9  ;;  %v854_v9 = vrot.slane %v3197_v0, %v4303_v40  ;;  %v1058_v0 = vld [vmem:[#allocation2 + $0x18] sm:$0xff] }
 0x285   : > { %3615 = vmatprep.subr.bf16.mxu0 %v3614_v12  ;;  %v3199_v12 = vld [vmem:[%s5820_s6 + $0x5] ss:$8 sm:$0x3] }
 0x286   : > { %v898_v19 = vrot.slane %v3199_v12, %v4303_v40 }
 0x287   : > { %861 = vrot.lane.b32.xlu1 %v4364_v2, %s4066_s30 }
 0x288   : > { %3617 = vmatpush1.bf16.msra.mxu0 %v3616_v15 }
 0x289   : > { %3619 = vmatprep.subr.bf16.mxu0 %v3618_v18  ;;  %v894_v18 = vrot.slane %v3199_v12, %v4300_v39  ;;  %v790_v12 = vld [vmem:[%s5822_s8] sm:$0xff] }
 0x28b   : > { %883 = vrot.lane.b32.xlu1 %v4364_v2, %s4067_s11 }
 0x28c   : > { %3621 = vmatpush1.bf16.msra.mxu0 %v3620_v21 }
 0x28d   : > { %3623 = vmatprep.subr.bf16.mxu0 %v3622_v24 }
 0x28f   : > { %905 = vrot.lane.b32.xlu1 %v4364_v2, %s4068_s12 }
 0x290   : > { %3625 = vmatpush1.bf16.msra.mxu0 %v3624_v27 }
 0x291   : > { %3627 = vmatprep.subr.bf16.mxu0 %v3626_v30 }
 0x293   : > { %927 = vrot.lane.b32.xlu1 %v4364_v2, %s4069_s15 }
 0x294   : > { %3629 = vmatpush1.bf16.msra.mxu0 %v3628_v34  ;;  %v3201_v34 = vld [vmem:[%s5820_s6 + $0x7] ss:$8 sm:$0x3] }
 0x295   : > { %3631 = vmatprep.subr.bf16.mxu0 %v3630_v38  ;;  %v938_v45 = vrot.slane %v3201_v34, %v4300_v39  ;;  %v942_v46 = vrot.slane %v3201_v34, %v4303_v40  ;;  %v1121_v34 = vld [vmem:[#allocation2 + $0x210] sm:$0xff] }
 0x297   : > { %949 = vrot.lane.b32.xlu1 %v4364_v2, %s4070_s16 }
 0x2cd   : > { %v816_v41 = vpop.permute.xlu0 %815  ;;  %v793_v43 = vpop.permute.xlu1 %792 }
 0x2d1   : > { %v838_v44 = vpop.permute.xlu0 %837 }
 0x2d5   : > { %v860_v55 = vpop.permute.xlu0 %859 }
 0x2d9   : > { %v882_v8 = vpop.permute.xlu0 %881 }
 0x2dd   : > { %v904_v24 = vpop.permute.xlu0 %903 }
 0x2ed   : > { %v795_v47 = vpop.permute.xlu1 %794 }
 0x2ee   : > { %v799_v53 = vsel %vm798_vm4, %v793_v43, %v795_v47  ;;  %v800_v54 = vsel %vm798_vm4, %v795_v47, %v793_v43  ;;  %v926_v43 = vpop.permute.xlu0 %925  ;;  %vm2158_vm4 = vcmp.lt.s32.totalorder %v4381_v42, 111 }
 0x2ef   : > { %v813_v59 = vmul.f32 %v806_v50, %v800_v54  ;;  %v814_v60 = vmul.f32 %v810_v51, %v799_v53 }
 0x2f1   : > { %v818_v56 = vpop.permute.xlu1 %817 }
 0x2f2   : > { %v820_v57 = vsel %vm819_vm5, %v816_v41, %v818_v56  ;;  %v821_v58 = vsel %vm819_vm5, %v818_v56, %v816_v41  ;;  %v916_v41 = vrot.slane %v3200_v32, %v4300_v39 }
 0x2f3   : > { %v835_v61 = vmul.f32 %v828_v33, %v821_v58  ;;  %v836_v62 = vmul.f32 %v832_v52, %v820_v57  ;;  %v948_v57 = vpop.permute.xlu0 %947 }
 0x2f5   : > { %v3560_v4 = vpack.c.bf16 %v835_v61, %v813_v59  ;;  %v840_v5 = vpop.permute.xlu1 %839  ;;  %v3558_v6 = vpack.c.bf16 %v836_v62, %v814_v60 }
 0x2f6   : > { %v842_v13 = vsel %vm841_vm6, %v838_v44, %v840_v5  ;;  %v843_v14 = vsel %vm841_vm6, %v840_v5, %v838_v44  ;;  %v920_v44 = vrot.slane %v3200_v32, %v4303_v40 }
 0x2f7   : > { %3559 = vmatprep.subr.bf16.mxu1 %v3558_v6  ;;  %v857_v20 = vmul.f32 %v850_v7, %v843_v14  ;;  %v858_v21 = vmul.f32 %v854_v9, %v842_v13  ;;  %v1057_v6 = vld [vmem:[#allocation2 + $0x10] sm:$0xff]  ;;  %v1082_v9 = vld [vmem:[#allocation2 + $0xd8] sm:$0xff] }
 0x2f8   : > { %3561 = vmatpush1.bf16.msra.mxu1 %v3560_v4  ;;  %v1065_v7 = vld [vmem:[#allocation2 + $0x50] sm:$0xff] }
 0x2f9   : > { %v862_v15 = vpop.permute.xlu1 %861  ;;  %v3640_v13 = vpack.c.bf16 %v1065_v7, %v1057_v6  ;;  %v1201_v6 = vld [vmem:[#allocation2 + $0x490] sm:$0xff] }
 0x2fa   : > { %v864_v16 = vsel %vm863_vm7, %v860_v55, %v862_v15  ;;  %v865_v17 = vsel %vm863_vm7, %v862_v15, %v860_v55  ;;  %v1073_v15 = vld [vmem:[#allocation2 + $0x90] sm:$0xff] }
 0x2fb   : > { %v879_v22 = vmul.f32 %v872_v10, %v865_v17  ;;  %v880_v23 = vmul.f32 %v876_v11, %v864_v16  ;;  %v3638_v10 = vpack.c.bf16 %v1066_v3, %v1058_v0  ;;  %v1081_v16 = vld [vmem:[#allocation2 + $0xd0] sm:$0xff]  ;;  %v1090_v17 = vld [vmem:[#allocation2 + $0x118] sm:$0xff] }
 0x2fc   : > { %v1202_v0 = vld [vmem:[#allocation2 + $0x498] sm:$0xff]  ;;  %v1209_v7 = vld [vmem:[#allocation2 + $0x4d0] sm:$0xff] }
 0x2fd   : > { %v3564_v25 = vpack.c.bf16 %v879_v22, %v857_v20  ;;  %v884_v26 = vpop.permute.xlu1 %883  ;;  %v3562_v27 = vpack.c.bf16 %v880_v23, %v858_v21  ;;  %v1089_v21 = vld [vmem:[#allocation2 + $0x110] sm:$0xff]  ;;  %v1106_v23 = vld [vmem:[#allocation2 + $0x198] sm:$0xff] }
 0x2fe   : > { %v886_v28 = vsel %vm885_vm8, %v882_v8, %v884_v26  ;;  %v887_v29 = vsel %vm885_vm8, %v884_v26, %v882_v8  ;;  %v1074_v8 = vld [vmem:[#allocation2 + $0x98] sm:$0xff]  ;;  %v1097_v22 = vld [vmem:[#allocation2 + $0x150] sm:$0xff] }
 0x2ff   : > { %v901_v30 = vmul.f32 %v894_v18, %v886_v28  ;;  %v902_v31 = vmul.f32 %v898_v19, %v887_v29  ;;  %3563 = vmatprep.subr.bf16.mxu1 %v3562_v27  ;;  %v3642_v14 = vpack.c.bf16 %v1082_v9, %v1074_v8  ;;  %v1098_v18 = vld [vmem:[#allocation2 + $0x158] sm:$0xff]  ;;  %v3644_v19 = vpack.c.bf16 %v1081_v16, %v1073_v15  ;;  %v1105_v27 = vld [vmem:[#allocation2 + $0x190] sm:$0xff] }
 0x300   : > { %3565 = vmatpush1.bf16.msra.mxu1 %v3564_v25  ;;  %v3646_v20 = vpack.c.bf16 %v1098_v18, %v1090_v17  ;;  %v3648_v25 = vpack.c.bf16 %v1097_v22, %v1089_v21  ;;  %v1113_v28 = vld [vmem:[#allocation2 + $0x1d0] sm:$0xff]  ;;  %v1122_v29 = vld [vmem:[#allocation2 + $0x218] sm:$0xff] }
 0x301   : > { %v3568_v36 = vpack.c.bf16 %v901_v30, %v4350_v63  ;;  %v906_v37 = vpop.permute.xlu1 %905  ;;  %v3566_v38 = vpack.c.bf16 %v902_v31, %v4364_v2  ;;  %v3202_v63 = vld [vmem:[%s5820_s6 + $0x10] ss:$8 sm:$0x3]  ;;  %v3652_v31 = vpack.c.bf16 %v1113_v28, %v1105_v27 }
 0x302   : > { %v908_v47 = vsel %vm907_vm9, %v904_v24, %v906_v37  ;;  %v909_v50 = vsel %vm907_vm9, %v906_v37, %v904_v24  ;;  %v964_v52 = vrot.slane %v3202_v63, %v4303_v40  ;;  %v960_v61 = vrot.slane %v3202_v63, %v4300_v39  ;;  %v1114_v24 = vld [vmem:[#allocation2 + $0x1d8] sm:$0xff]  ;;  %v1233_v18 = vld [vmem:[#allocation2 + $0x590] sm:$0xff] }
 0x303   : > { %3567 = vmatprep.subr.bf16.mxu1 %v3566_v38  ;;  %v923_v53 = vmul.f32 %v916_v41, %v908_v47  ;;  %v924_v54 = vmul.f32 %v920_v44, %v909_v50  ;;  %v3650_v26 = vpack.c.bf16 %v1114_v24, %v1106_v23  ;;  %v1130_v30 = vld [vmem:[#allocation2 + $0x258] sm:$0xff]  ;;  %v1137_v44 = vld [vmem:[#allocation2 + $0x290] sm:$0xff] }
 0x304   : > { %3569 = vmatpush1.bf16.msra.mxu1 %v3568_v36  ;;  %v3654_v32 = vpack.c.bf16 %v1130_v30, %v1122_v29  ;;  %v1129_v36 = vld [vmem:[#allocation2 + $0x250] sm:$0xff]  ;;  %v1138_v37 = vld [vmem:[#allocation2 + $0x298] sm:$0xff] }
 0x305   : > { %v928_v2 = vpop.permute.xlu1 %927  ;;  %v1146_v38 = vld [vmem:[#allocation2 + $0x2d8] sm:$0xff]  ;;  %v3656_v41 = vpack.c.bf16 %v1129_v36, %v1121_v34  ;;  %v1249_v24 = vld [vmem:[#allocation2 + $0x610] sm:$0xff] }
 0x306   : > { %v930_v51 = vsel %vm929_vm10, %v926_v43, %v928_v2  ;;  %v931_v33 = vsel %vm929_vm10, %v928_v2, %v926_v43  ;;  %v3658_v43 = vpack.c.bf16 %v1146_v38, %v1138_v37  ;;  %v1162_v63 = vld [vmem:[#allocation2 + $0x358] sm:$0xff]  ;;  %v1153_v2 = vld [vmem:[#allocation2 + $0x310] sm:$0xff]  ;;  %v1279_v38 = vld [vmem:[#allocation2 + $0x700] sm:$0xff] }
 0x307   : > { %v945_v55 = vmul.f32 %v938_v45, %v930_v51  ;;  %v946_v56 = vmul.f32 %v942_v46, %v931_v33  ;;  %v1145_v45 = vld [vmem:[#allocation2 + $0x2d0] sm:$0xff]  ;;  %v1154_v46 = vld [vmem:[#allocation2 + $0x318] sm:$0xff] }
 0x308   : > { %v3660_v47 = vpack.c.bf16 %v1145_v45, %v1137_v44  ;;  %v3662_v50 = vpack.c.bf16 %v1162_v63, %v1154_v46  ;;  %v1161_v51 = vld [vmem:[#allocation2 + $0x350] sm:$0xff]  ;;  %v1170_v33 = vld [vmem:[#allocation2 + $0x398] sm:$0xff]  ;;  %v1296_v63 = vld [vmem:[#allocation2 + $0x788] sm:$0xff] }
 0x309   : > { %v3572_v58 = vpack.c.bf16 %v945_v55, %v923_v53  ;;  %v950_v59 = vpop.permute.xlu1 %949  ;;  %v3570_v60 = vpack.c.bf16 %v946_v56, %v924_v54  ;;  %v3664_v53 = vpack.c.bf16 %v1161_v51, %v1153_v2  ;;  %v1169_v55 = vld [vmem:[#allocation2 + $0x390] sm:$0xff]  ;;  %v1210_v3 = vld [vmem:[#allocation2 + $0x4d8] sm:$0xff] }
 0x30a   : > { %v953_v62 = vsel %vm951_vm11, %v950_v59, %v948_v57  ;;  %v952_v4 = vsel %vm951_vm11, %v948_v57, %v950_v59  ;;  %v1177_v56 = vld [vmem:[#allocation2 + $0x3d0] sm:$0xff]  ;;  %v1186_v57 = vld [vmem:[#allocation2 + $0x418] sm:$0xff] }
 0x30b   : > { %3571 = vmatprep.subr.bf16.mxu1 %v3570_v60  ;;  %v968_v5 = vmul.f32 %v964_v52, %v953_v62  ;;  %v967_v11 = vmul.f32 %v960_v61, %v952_v4  ;;  %v1178_v52 = vld [vmem:[#allocation2 + $0x3d8] sm:$0xff]  ;;  %v3668_v59 = vpack.c.bf16 %v1177_v56, %v1169_v55  ;;  %v1185_v61 = vld [vmem:[#allocation2 + $0x410] sm:$0xff] }
 0x30c   : > { %3573 = vmatpush1.bf16.msra.mxu1 %v3572_v58  ;;  %v3666_v54 = vpack.c.bf16 %v1178_v52, %v1170_v33  ;;  %v1194_v58 = vld [vmem:[#allocation2 + $0x458] sm:$0xff]  ;;  %v1193_v62 = vld [vmem:[#allocation2 + $0x450] sm:$0xff]  ;;  %v1295_v33 = vld [vmem:[#allocation2 + $0x780] sm:$0xff] }
 0x30d   : > { %994 = vmatprep.subr.mxu1 %v968_v5  ;;  %v3670_v60 = vpack.c.bf16 %v1194_v58, %v1186_v57  ;;  %v3672_v4 = vpack.c.bf16 %v1193_v62, %v1185_v61  ;;  %v3674_v5 = vpack.c.bf16 %v1210_v3, %v1202_v0  ;;  %v1218_v8 = vld [vmem:[#allocation2 + $0x518] sm:$0xff]  ;;  %v1265_v30 = vld [vmem:[#allocation2 + $0x690] sm:$0xff]  ;;  %v1303_v52 = vld [vmem:[#allocation2 + $0x7c0] sm:$0xff]  ;;  %v972_v3 = vpop.permute.xlu0 %971 }
 0x30e   : > { %v1226_v9 = vld [vmem:[#allocation2 + $0x558] sm:$0xff]  ;;  %v1289_v45 = vld [vmem:[#allocation2 + $0x750] sm:$0xff]  ;;  %v1060_v58 = vld [vmem:[#allocation2 + $0x28] sm:$0xff] }
 0x30f   : > { %v1242_v15 = vld [vmem:[#allocation2 + $0x5d8] sm:$0xff]  ;;  %v1297_v55 = vld [vmem:[#allocation2 + $0x790] sm:$0xff] }
 0x310   : > { %995 = vmatpush1.msra.mxu1 %v967_v11  ;;  %v3678_v11 = vpack.c.bf16 %v1226_v9, %v1218_v8  ;;  %v1258_v21 = vld [vmem:[#allocation2 + $0x658] sm:$0xff]  ;;  %v1305_v56 = vld [vmem:[#allocation2 + $0x7d0] sm:$0xff]  ;;  %v1067_v9 = vld [vmem:[#allocation2 + $0x60] sm:$0xff] }
 0x311   : > { %3203 = vmatmul.mubr.msk.f32.vlgmr.msra.gmra.mrb[4].mxu1 %vm974_vm12, %v790_v12  ;;  %3639 = vmatprep.subr.bf16.mxu1 %v3638_v10  ;;  %v3676_v10 = vpack.c.bf16 %v1209_v7, %v1201_v6  ;;  %v1217_v12 = vld [vmem:[#allocation2 + $0x510] sm:$0xff]  ;;  %v1274_v27 = vld [vmem:[#allocation2 + $0x6d8] sm:$0xff]  ;;  %v3700_v57 = vpack.c.bf16 %v1305_v56, %v1297_v55  ;;  %v1059_v7 = vld [vmem:[#allocation2 + $0x20] sm:$0xff] }
 0x312   : > { %3641 = vmatpush1.bf16.msra.mxu1 %v3640_v13  ;;  %v1225_v13 = vld [vmem:[#allocation2 + $0x550] sm:$0xff]  ;;  %v1290_v34 = vld [vmem:[#allocation2 + $0x758] sm:$0xff]  ;;  %v1124_v56 = vld [vmem:[#allocation2 + $0x228] sm:$0xff] }
 0x313   : > { %3643 = vmatprep.subr.bf16.mxu1 %v3642_v14  ;;  %v1234_v14 = vld [vmem:[#allocation2 + $0x598] sm:$0xff]  ;;  %v3680_v16 = vpack.c.bf16 %v1225_v13, %v1217_v12  ;;  %v1076_v13 = vld [vmem:[#allocation2 + $0xa8] sm:$0xff]  ;;  %v1117_v55 = vld [vmem:[#allocation2 + $0x1f0] sm:$0xff] }
 0x314   : > { %v3682_v17 = vpack.c.bf16 %v1242_v15, %v1234_v14  ;;  %v1306_v51 = vld [vmem:[#allocation2 + $0x7d8] sm:$0xff]  ;;  %v1084_v14 = vld [vmem:[#allocation2 + $0xe8] sm:$0xff] }
 0x315   : > { %v1070_v62 = vld [vmem:[#allocation2 + $0x78] sm:$0xff] }
 0x316   : > { %3645 = vmatpush1.bf16.msra.mxu1 %v3644_v19  ;;  %v1241_v19 = vld [vmem:[#allocation2 + $0x5d0] sm:$0xff] }
 0x317   : > { %3647 = vmatprep.subr.bf16.mxu1 %v3646_v20  ;;  %v1250_v20 = vld [vmem:[#allocation2 + $0x618] sm:$0xff]  ;;  %v3684_v22 = vpack.c.bf16 %v1241_v19, %v1233_v18  ;;  %v3704_v18 = vpack.c.bf16 %v1067_v9, %v1059_v7  ;;  %v1140_v7 = vld [vmem:[#allocation2 + $0x2a8] sm:$0xff] }
 0x318   : > { %v3686_v23 = vpack.c.bf16 %v1258_v21, %v1250_v20  ;;  %v1075_v20 = vld [vmem:[#allocation2 + $0xa0] sm:$0xff]  ;;  %v1142_v9 = vld [vmem:[#allocation2 + $0x2b8] sm:$0xff] }
 0x319   : > { %v1083_v21 = vld [vmem:[#allocation2 + $0xe0] sm:$0xff] }
 0x31a   : > { %3649 = vmatpush1.bf16.msra.mxu1 %v3648_v25  ;;  %v1257_v25 = vld [vmem:[#allocation2 + $0x650] sm:$0xff] }
 0x31b   : > { %3651 = vmatprep.subr.bf16.mxu1 %v3650_v26  ;;  %v1266_v26 = vld [vmem:[#allocation2 + $0x698] sm:$0xff]  ;;  %v3688_v28 = vpack.c.bf16 %v1257_v25, %v1249_v24  ;;  %v1085_v24 = vld [vmem:[#allocation2 + $0xf0] sm:$0xff]  ;;  %v1092_v25 = vld [vmem:[#allocation2 + $0x128] sm:$0xff] }
 0x31c   : > { %v3690_v29 = vpack.c.bf16 %v1274_v27, %v1266_v26  ;;  %v3706_v27 = vpack.c.bf16 %v1084_v14, %v1076_v13  ;;  %v1139_v13 = vld [vmem:[#allocation2 + $0x2a0] sm:$0xff] }
 0x31d   : > { %v1147_v14 = vld [vmem:[#allocation2 + $0x2e0] sm:$0xff] }
 0x31e   : > { %3653 = vmatpush1.bf16.msra.mxu1 %v3652_v31  ;;  %v1273_v31 = vld [vmem:[#allocation2 + $0x6d0] sm:$0xff] }
 0x31f   : > { %3655 = vmatprep.subr.bf16.mxu1 %v3654_v32  ;;  %v1282_v32 = vld [vmem:[#allocation2 + $0x718] sm:$0xff]  ;;  %v3692_v36 = vpack.c.bf16 %v1273_v31, %v1265_v30 }
 0x320   : > { %v3694_v37 = vpack.c.bf16 %v1290_v34, %v1282_v32  ;;  %v1094_v30 = vld [vmem:[#allocation2 + $0x138] sm:$0xff]  ;;  %v3708_v32 = vpack.c.bf16 %v1083_v21, %v1075_v20  ;;  %v1164_v20 = vld [vmem:[#allocation2 + $0x368] sm:$0xff] }
 0x321   : > { %v1102_v31 = vld [vmem:[#allocation2 + $0x178] sm:$0xff] }
 0x322   : > { %3657 = vmatpush1.bf16.msra.mxu1 %v3656_v41  ;;  %v1287_v41 = vld [vmem:[#allocation2 + $0x740] sm:$0xff]  ;;  %v1158_v21 = vld [vmem:[#allocation2 + $0x338] sm:$0xff] }
 0x323   : > { %3659 = vmatprep.subr.bf16.mxu1 %v3658_v43  ;;  %v1281_v43 = vld [vmem:[#allocation2 + $0x710] sm:$0xff]  ;;  %v3632_v44 = vpack.c.bf16 %v1287_v41, %v1279_v38  ;;  %v3774_v41 = vpack.c.bf16 %v1102_v31, %v1094_v30 }
 0x324   : > { %v3696_v46 = vpack.c.bf16 %v1289_v45, %v1281_v43  ;;  %v1093_v43 = vld [vmem:[#allocation2 + $0x130] sm:$0xff]  ;;  %v1108_v45 = vld [vmem:[#allocation2 + $0x1a8] sm:$0xff] }
 0x325   : > { %3633 = vmatpush1.bf16.msra.mxu0 %v3632_v44  ;;  %v1101_v44 = vld [vmem:[#allocation2 + $0x170] sm:$0xff] }
 0x326   : > { %3661 = vmatpush1.bf16.msra.mxu1 %v3660_v47  ;;  %v1304_v47 = vld [vmem:[#allocation2 + $0x7c8] sm:$0xff]  ;;  %v1157_v30 = vld [vmem:[#allocation2 + $0x330] sm:$0xff] }
 0x327   : > { %3663 = vmatprep.subr.bf16.mxu1 %v3662_v50  ;;  %v1298_v50 = vld [vmem:[#allocation2 + $0x798] sm:$0xff]  ;;  %v3634_v2 = vpack.c.bf16 %v1304_v47, %v1296_v63  ;;  %v1165_v31 = vld [vmem:[#allocation2 + $0x370] sm:$0xff] }
 0x328   : > { %v1110_v63 = vld [vmem:[#allocation2 + $0x1b8] sm:$0xff] }
 0x329   : > { %3635 = vmatprep.subr.bf16.mxu0 %v3634_v2  ;;  %v1118_v47 = vld [vmem:[#allocation2 + $0x1f8] sm:$0xff]  ;;  %v3776_v2 = vpack.c.bf16 %v1101_v44, %v1093_v43  ;;  %v1171_v43 = vld [vmem:[#allocation2 + $0x3a0] sm:$0xff] }
 0x32a   : > { %3665 = vmatpush1.bf16.msra.mxu1 %v3664_v53  ;;  %v3698_v53 = vpack.c.bf16 %v1306_v51, %v1298_v50  ;;  %v1107_v51 = vld [vmem:[#allocation2 + $0x1a0] sm:$0xff] }
 0x32b   : > { %3667 = vmatprep.subr.bf16.mxu1 %v3666_v54  ;;  %v3636_v54 = vpack.c.bf16 %v1303_v52, %v1295_v33  ;;  %v1115_v33 = vld [vmem:[#allocation2 + $0x1e0] sm:$0xff] }
 0x32c   : > { %v1179_v44 = vld [vmem:[#allocation2 + $0x3e0] sm:$0xff] }
 0x32d   : > { %3637 = vmatpush1.bf16.msra.mxu0 %v3636_v54  ;;  %v1109_v54 = vld [vmem:[#allocation2 + $0x1b0] sm:$0xff] }
 0x32e   : > { %3669 = vmatpush1.bf16.msra.mxu1 %v3668_v59  ;;  %v1068_v59 = vld [vmem:[#allocation2 + $0x68] sm:$0xff] }
 0x32f   : > { %3671 = vmatprep.subr.bf16.mxu1 %v3670_v60  ;;  %v1062_v60 = vld [vmem:[#allocation2 + $0x38] sm:$0xff]  ;;  %v3702_v61 = vpack.c.bf16 %v1068_v59, %v1060_v58 }
 0x330   : > { %v3766_v0 = vpack.c.bf16 %v1070_v62, %v1062_v60  ;;  %v1126_v58 = vld [vmem:[#allocation2 + $0x238] sm:$0xff]  ;;  %v3716_v60 = vpack.c.bf16 %v1115_v33, %v1107_v51  ;;  %v1123_v62 = vld [vmem:[#allocation2 + $0x220] sm:$0xff] }
 0x331   : > { %3703 = vmatprep.subr.bf16.mxu0 %v3702_v61  ;;  %v1134_v59 = vld [vmem:[#allocation2 + $0x278] sm:$0xff]  ;;  %v3780_v61 = vpack.c.bf16 %v1117_v55, %v1109_v54  ;;  %v1187_v54 = vld [vmem:[#allocation2 + $0x420] sm:$0xff] }
 0x332   : > { %3673 = vmatpush1.bf16.msra.mxu1 %v3672_v4  ;;  %v1190_v51 = vld [vmem:[#allocation2 + $0x438] sm:$0xff]  ;;  %v1195_v55 = vld [vmem:[#allocation2 + $0x460] sm:$0xff] }
 0x333   : > { %3675 = vmatprep.subr.bf16.mxu1 %v3674_v5  ;;  %v1198_v33 = vld [vmem:[#allocation2 + $0x478] sm:$0xff] }
 0x336   : > { %3677 = vmatpush1.bf16.msra.mxu1 %v3676_v10  ;;  %v1061_v10 = vld [vmem:[#allocation2 + $0x30] sm:$0xff] }
 0x337   : > { %3679 = vmatprep.subr.bf16.mxu1 %v3678_v11  ;;  %v1069_v11 = vld [vmem:[#allocation2 + $0x70] sm:$0xff] }
 0x338   : > { %v3768_v19 = vpack.c.bf16 %v1069_v11, %v1061_v10  ;;  %v1150_v10 = vld [vmem:[#allocation2 + $0x2f8] sm:$0xff] }
 0x33a   : > { %3681 = vmatpush1.bf16.msra.mxu1 %v3680_v16  ;;  %v1078_v16 = vld [vmem:[#allocation2 + $0xb8] sm:$0xff] }
 0x33b   : > { %3683 = vmatprep.subr.bf16.mxu1 %v3682_v17  ;;  %v1086_v17 = vld [vmem:[#allocation2 + $0xf8] sm:$0xff] }
 0x33e   : > { %3685 = vmatpush1.bf16.msra.mxu1 %v3684_v22 }
 0x33f   : > { %3687 = vmatprep.subr.bf16.mxu1 %v3686_v23  ;;  %v1077_v23 = vld [vmem:[#allocation2 + $0xb0] sm:$0xff] }
 0x340   : > { %v3772_v34 = vpack.c.bf16 %v1085_v24, %v1077_v23  ;;  %v3724_v23 = vpack.c.bf16 %v1147_v14, %v1139_v13  ;;  %v1222_v13 = vld [vmem:[#allocation2 + $0x538] sm:$0xff] }
 0x341   : > { %v1230_v14 = vld [vmem:[#allocation2 + $0x578] sm:$0xff] }
 0x342   : > { %3689 = vmatpush1.bf16.msra.mxu1 %v3688_v28  ;;  %v3770_v28 = vpack.c.bf16 %v1086_v17, %v1078_v16  ;;  %v3786_v16 = vpack.c.bf16 %v1150_v10, %v1142_v9  ;;  %v1141_v17 = vld [vmem:[#allocation2 + $0x2b0] sm:$0xff] }
 0x343   : > { %3691 = vmatprep.subr.bf16.mxu1 %v3690_v29  ;;  %v1100_v29 = vld [vmem:[#allocation2 + $0x168] sm:$0xff]  ;;  %v1205_v9 = vld [vmem:[#allocation2 + $0x4b0] sm:$0xff] }
 0x344   : > { %v3710_v38 = vpack.c.bf16 %v1100_v29, %v1092_v25  ;;  %v1155_v25 = vld [vmem:[#allocation2 + $0x320] sm:$0xff]  ;;  %v1213_v10 = vld [vmem:[#allocation2 + $0x4f0] sm:$0xff] }
 0x346   : > { %3693 = vmatpush1.bf16.msra.mxu1 %v3692_v36  ;;  %v1091_v36 = vld [vmem:[#allocation2 + $0x120] sm:$0xff] }
 0x347   : > { %3695 = vmatprep.subr.bf16.mxu1 %v3694_v37  ;;  %v1099_v37 = vld [vmem:[#allocation2 + $0x160] sm:$0xff] }
 0x348   : > { %v3712_v50 = vpack.c.bf16 %v1099_v37, %v1091_v36  ;;  %v1174_v36 = vld [vmem:[#allocation2 + $0x3b8] sm:$0xff] }
 0x349   : > { %v1182_v37 = vld [vmem:[#allocation2 + $0x3f8] sm:$0xff] }
 0x34a   : > { %3697 = vmatpush1.bf16.msra.mxu1 %v3696_v46  ;;  %v1116_v46 = vld [vmem:[#allocation2 + $0x1e8] sm:$0xff] }
 0x34b   : > { %3699 = vmatprep.subr.bf16.mxu1 %v3698_v53  ;;  %v3714_v52 = vpack.c.bf16 %v1116_v46, %v1108_v45  ;;  %v3778_v53 = vpack.c.bf16 %v1118_v47, %v1110_v63  ;;  %v3794_v46 = vpack.c.bf16 %v1182_v37, %v1174_v36  ;;  %v1173_v63 = vld [vmem:[#allocation2 + $0x3b0] sm:$0xff] }
 0x34c   : > { %v1181_v47 = vld [vmem:[#allocation2 + $0x3f0] sm:$0xff] }
 0x34d   : > { %v1237_v36 = vld [vmem:[#allocation2 + $0x5b0] sm:$0xff] }
 0x34e   : > { %3701 = vmatpush1.bf16.msra.mxu1 %v3700_v57  ;;  %v1132_v57 = vld [vmem:[#allocation2 + $0x268] sm:$0xff]  ;;  %v1245_v37 = vld [vmem:[#allocation2 + $0x5f0] sm:$0xff] }
 0x34f   : > { %3767 = vmatprep.subr.bf16.mxu1 %v3766_v0  ;;  %v1131_v0 = vld [vmem:[#allocation2 + $0x260] sm:$0xff] }
 0x350   : > { %v3720_v11 = vpack.c.bf16 %v1131_v0, %v1123_v62  ;;  %v1206_v62 = vld [vmem:[#allocation2 + $0x4b8] sm:$0xff] }
 0x351   : > { %v1214_v0 = vld [vmem:[#allocation2 + $0x4f8] sm:$0xff] }
 0x3e4   : > { %v1044_v4 = vpop.f32.mrb[4].mxu1 }
 0x3e5   : > { %v1045_v5 = vadd.f32 %v1044_v4, %v972_v3  ;;  %v1046_v6 = vpop.f32.mrb[5].mxu1  ;;  %v3782_v4 = vpack.c.bf16 %v1134_v59, %v1126_v58  ;;  %v1189_v58 = vld [vmem:[#allocation2 + $0x430] sm:$0xff] }
 0x3e6   : > { %v1047_v8 = vadd.f32 %v1046_v6, %v972_v3  ;;  %v3718_v3 = vpack.c.bf16 %v1132_v57, %v1124_v56  ;;  %v1133_v6 = vld [vmem:[#allocation2 + $0x270] sm:$0xff]  ;;  %v3798_v57 = vpack.c.bf16 %v1198_v33, %v1190_v51 }
 0x3e7   : > { %v1051_v12 = vmul.f32 0.2, %v1045_v5  ;;  %vm1049_vm14 = vcmp.gt.f32.partialorder %v1045_v5, 0.0  ;;  %v1197_v59 = vld [vmem:[#allocation2 + $0x470] sm:$0xff] }
 0x3e8   : > { %vm1050_vm13 = vcmp.gt.f32.partialorder %v1047_v8, 0.0  ;;  %v1052_v15 = vmul.f32 0.2, %v1047_v8  ;;  %v1253_v51 = vld [vmem:[#allocation2 + $0x630] sm:$0xff] }
 0x3e9   : > { %v4445_v26 = vsel %vm1049_vm14, %v1045_v5, %v1051_v12  ;;  %v1125_v5 = vld [vmem:[#allocation2 + $0x230] sm:$0xff] }
 0x3ea   : > { %v1054_v22 = vsel %vm1050_vm13, %v1047_v8, %v1052_v15  ;;  %v1148_v8 = vld [vmem:[#allocation2 + $0x2e8] sm:$0xff]  ;;  %v3784_v12 = vpack.c.bf16 %v1133_v6, %v1125_v5  ;;  %v1203_v5 = vld [vmem:[#allocation2 + $0x4a0] sm:$0xff]  ;;  %v1261_v33 = vld [vmem:[#allocation2 + $0x670] sm:$0xff] }
 0x3eb   : > { %1375 = vmatprep.mubr.f32.mxu0 %v1054_v22  ;;  %1446 = vmatprep.mubr.f32.mxu1 %v1054_v22  ;;  %v3722_v15 = vpack.c.bf16 %v1148_v8, %v1140_v7  ;;  %v1211_v6 = vld [vmem:[#allocation2 + $0x4e0] sm:$0xff]  ;;  %v3802_v8 = vpack.c.bf16 %v1214_v0, %v1206_v62  ;;  %v1269_v62 = vld [vmem:[#allocation2 + $0x6b0] sm:$0xff] }
 0x3ec   : > { %1376 = vmatmul.mubr.f32.vlgmr.msra.gmra.mrb[6].mxu0 %v4445_v26  ;;  %1447 = vmatmul.mubr.f32.vlgmr.msra.gmra.mrb[6].mxu1 %v4445_v26  ;;  %v1277_v0 = vld [vmem:[#allocation2 + $0x6f0] sm:$0xff] }
 0x3ed   : > { %3705 = vmatpush1.bf16.msra.mxu0 %v3704_v18  ;;  %3769 = vmatpush1.bf16.msra.mxu1 %v3768_v19  ;;  %v1149_v18 = vld [vmem:[#allocation2 + $0x2f0] sm:$0xff]  ;;  %v1156_v19 = vld [vmem:[#allocation2 + $0x328] sm:$0xff] }
 0x3ee   : > { %1517 = vmatprep.mubr.f32.mxu0 %v1054_v22  ;;  %1588 = vmatprep.mubr.f32.mxu1 %v1054_v22  ;;  %v1166_v22 = vld [vmem:[#allocation2 + $0x378] sm:$0xff]  ;;  %v3788_v24 = vpack.c.bf16 %v1149_v18, %v1141_v17  ;;  %v1219_v17 = vld [vmem:[#allocation2 + $0x520] sm:$0xff] }
 0x3ef   : > { %3707 = vmatprep.subr.bf16.mxu0 %v3706_v27  ;;  %3771 = vmatprep.subr.bf16.mxu1 %v3770_v28  ;;  %v1163_v27 = vld [vmem:[#allocation2 + $0x360] sm:$0xff]  ;;  %v3726_v28 = vpack.c.bf16 %v1164_v20, %v1156_v19  ;;  %v3790_v29 = vpack.c.bf16 %v1166_v22, %v1158_v21  ;;  %v3806_v20 = vpack.c.bf16 %v1230_v14, %v1222_v13  ;;  %v1221_v21 = vld [vmem:[#allocation2 + $0x530] sm:$0xff] }
 0x3f0   : > { %v1227_v18 = vld [vmem:[#allocation2 + $0x560] sm:$0xff]  ;;  %v1229_v22 = vld [vmem:[#allocation2 + $0x570] sm:$0xff] }
 0x3f1   : > { %3709 = vmatpush1.bf16.msra.mxu0 %v3708_v32  ;;  %3773 = vmatpush1.bf16.msra.mxu1 %v3772_v34  ;;  %v1172_v32 = vld [vmem:[#allocation2 + $0x3a8] sm:$0xff]  ;;  %v1285_v13 = vld [vmem:[#allocation2 + $0x730] sm:$0xff] }
 0x3f2   : > { %3711 = vmatprep.subr.bf16.mxu0 %v3710_v38  ;;  %3775 = vmatprep.subr.bf16.mxu1 %v3774_v41  ;;  %v1180_v34 = vld [vmem:[#allocation2 + $0x3e8] sm:$0xff]  ;;  %v3728_v38 = vpack.c.bf16 %v1163_v27, %v1155_v25  ;;  %v3792_v41 = vpack.c.bf16 %v1165_v31, %v1157_v30  ;;  %v1238_v25 = vld [vmem:[#allocation2 + $0x5b8] sm:$0xff]  ;;  %v1235_v30 = vld [vmem:[#allocation2 + $0x5a0] sm:$0xff] }
 0x3f3   : > { %v3730_v45 = vpack.c.bf16 %v1180_v34, %v1172_v32  ;;  %v1246_v27 = vld [vmem:[#allocation2 + $0x5f8] sm:$0xff]  ;;  %v1243_v31 = vld [vmem:[#allocation2 + $0x5e0] sm:$0xff]  ;;  %v1293_v14 = vld [vmem:[#allocation2 + $0x770] sm:$0xff] }
 0x3f4   : > { %v3810_v34 = vpack.c.bf16 %v1246_v27, %v1238_v25  ;;  %v1301_v25 = vld [vmem:[#allocation2 + $0x7b0] sm:$0xff] }
 0x3f5   : > { %3713 = vmatpush1.bf16.msra.mxu0 %v3712_v50  ;;  %3777 = vmatpush1.bf16.msra.mxu1 %v3776_v2  ;;  %v1188_v50 = vld [vmem:[#allocation2 + $0x428] sm:$0xff]  ;;  %v1309_v27 = vld [vmem:[#allocation2 + $0x7f0] sm:$0xff] }
 0x3f6   : > { %3715 = vmatprep.subr.bf16.mxu0 %v3714_v52  ;;  %3779 = vmatprep.subr.bf16.mxu1 %v3778_v53  ;;  %v1196_v2 = vld [vmem:[#allocation2 + $0x468] sm:$0xff]  ;;  %v3732_v52 = vpack.c.bf16 %v1179_v44, %v1171_v43  ;;  %v3796_v53 = vpack.c.bf16 %v1181_v47, %v1173_v63  ;;  %v1254_v43 = vld [vmem:[#allocation2 + $0x638] sm:$0xff]  ;;  %v1251_v63 = vld [vmem:[#allocation2 + $0x620] sm:$0xff] }
 0x3f7   : > { %v3734_v56 = vpack.c.bf16 %v1196_v2, %v1188_v50  ;;  %v1262_v44 = vld [vmem:[#allocation2 + $0x678] sm:$0xff]  ;;  %v1259_v47 = vld [vmem:[#allocation2 + $0x660] sm:$0xff] }
 0x3f8   : > { %v3814_v2 = vpack.c.bf16 %v1262_v44, %v1254_v43 }
 0x3f9   : > { %3717 = vmatpush1.bf16.msra.mxu0 %v3716_v60  ;;  %3781 = vmatpush1.bf16.msra.mxu1 %v3780_v61  ;;  %v1204_v60 = vld [vmem:[#allocation2 + $0x4a8] sm:$0xff] }
 0x3fa   : > { %3719 = vmatprep.subr.bf16.mxu0 %v3718_v3  ;;  %3783 = vmatprep.subr.bf16.mxu1 %v3782_v4  ;;  %v1212_v61 = vld [vmem:[#allocation2 + $0x4e8] sm:$0xff]  ;;  %v3736_v3 = vpack.c.bf16 %v1195_v55, %v1187_v54  ;;  %v3800_v4 = vpack.c.bf16 %v1197_v59, %v1189_v58  ;;  %v1270_v54 = vld [vmem:[#allocation2 + $0x6b8] sm:$0xff]  ;;  %v1267_v58 = vld [vmem:[#allocation2 + $0x6a0] sm:$0xff] }
 0x3fb   : > { %v3738_v7 = vpack.c.bf16 %v1212_v61, %v1204_v60  ;;  %v1278_v55 = vld [vmem:[#allocation2 + $0x6f8] sm:$0xff]  ;;  %v1275_v59 = vld [vmem:[#allocation2 + $0x6e0] sm:$0xff] }
 0x3fc   : > { %v3818_v61 = vpack.c.bf16 %v1278_v55, %v1270_v54  ;;  %v1624_v54 = vld [vmem:[%s5821_s7] ss:$8 sm:$0xf] }
 0x3fd   : > { %3721 = vmatpush1.bf16.msra.mxu0 %v3720_v11  ;;  %3785 = vmatpush1.bf16.msra.mxu1 %v3784_v12  ;;  %v1220_v11 = vld [vmem:[#allocation2 + $0x528] sm:$0xff] }
 0x3fe   : > { %3723 = vmatprep.subr.bf16.mxu0 %v3722_v15  ;;  %3787 = vmatprep.subr.bf16.mxu1 %v3786_v16  ;;  %v1228_v12 = vld [vmem:[#allocation2 + $0x568] sm:$0xff]  ;;  %v3740_v15 = vpack.c.bf16 %v1211_v6, %v1203_v5  ;;  %v3804_v16 = vpack.c.bf16 %v1213_v10, %v1205_v9  ;;  %v1286_v5 = vld [vmem:[#allocation2 + $0x738] sm:$0xff]  ;;  %v1283_v9 = vld [vmem:[#allocation2 + $0x720] sm:$0xff] }
 0x3ff   : > { %v3742_v19 = vpack.c.bf16 %v1228_v12, %v1220_v11  ;;  %v1294_v6 = vld [vmem:[#allocation2 + $0x778] sm:$0xff]  ;;  %v1291_v10 = vld [vmem:[#allocation2 + $0x760] sm:$0xff] }
 0x400   : > { %v3822_v12 = vpack.c.bf16 %v1294_v6, %v1286_v5  ;;  %v1625_v55 = vld [vmem:[%s5821_s7] ss:$8 sm:$0xf0] }
 0x401   : > { %3725 = vmatpush1.bf16.msra.mxu0 %v3724_v23  ;;  %3789 = vmatpush1.bf16.msra.mxu1 %v3788_v24  ;;  %v1236_v23 = vld [vmem:[#allocation2 + $0x5a8] sm:$0xff] }
 0x402   : > { %3727 = vmatprep.subr.bf16.mxu0 %v3726_v28  ;;  %3791 = vmatprep.subr.bf16.mxu1 %v3790_v29  ;;  %v1244_v24 = vld [vmem:[#allocation2 + $0x5e8] sm:$0xff]  ;;  %v3744_v28 = vpack.c.bf16 %v1227_v18, %v1219_v17  ;;  %v3808_v29 = vpack.c.bf16 %v1229_v22, %v1221_v21  ;;  %v1302_v17 = vld [vmem:[#allocation2 + $0x7b8] sm:$0xff]  ;;  %v1299_v21 = vld [vmem:[#allocation2 + $0x7a0] sm:$0xff] }
 0x403   : > { %v3746_v32 = vpack.c.bf16 %v1244_v24, %v1236_v23  ;;  %v1310_v18 = vld [vmem:[#allocation2 + $0x7f8] sm:$0xff]  ;;  %v1307_v24 = vld [vmem:[#allocation2 + $0x7e0] sm:$0xff] }
 0x404   : > { %v3826_v23 = vpack.c.bf16 %v1310_v18, %v1302_v17 }
 0x405   : > { %3729 = vmatpush1.bf16.msra.mxu0 %v3728_v38  ;;  %3793 = vmatpush1.bf16.msra.mxu1 %v3792_v41  ;;  %v1252_v38 = vld [vmem:[#allocation2 + $0x628] sm:$0xff] }
 0x406   : > { %3731 = vmatprep.subr.bf16.mxu0 %v3730_v45  ;;  %3795 = vmatprep.subr.bf16.mxu1 %v3794_v46  ;;  %v1260_v41 = vld [vmem:[#allocation2 + $0x668] sm:$0xff]  ;;  %v3748_v45 = vpack.c.bf16 %v1243_v31, %v1235_v30  ;;  %v3812_v46 = vpack.c.bf16 %v1245_v37, %v1237_v36 }
 0x407   : > { %v3750_v50 = vpack.c.bf16 %v1260_v41, %v1252_v38 }
 0x409   : > { %3733 = vmatpush1.bf16.msra.mxu0 %v3732_v52  ;;  %3797 = vmatpush1.bf16.msra.mxu1 %v3796_v53  ;;  %v1268_v52 = vld [vmem:[#allocation2 + $0x6a8] sm:$0xff] }
 0x40a   : > { %3735 = vmatprep.subr.bf16.mxu0 %v3734_v56  ;;  %3799 = vmatprep.subr.bf16.mxu1 %v3798_v57  ;;  %v1276_v53 = vld [vmem:[#allocation2 + $0x6e8] sm:$0xff]  ;;  %v3752_v56 = vpack.c.bf16 %v1259_v47, %v1251_v63  ;;  %v3816_v57 = vpack.c.bf16 %v1261_v33, %v1253_v51 }
 0x40b   : > { %v3754_v60 = vpack.c.bf16 %v1276_v53, %v1268_v52  ;;  %v3205_v33 = vld [vmem:[%s5823_s9 + $0x8] sm:$0xff] }
 0x40d   : > { %3737 = vmatpush1.bf16.msra.mxu0 %v3736_v3  ;;  %3801 = vmatpush1.bf16.msra.mxu1 %v3800_v4  ;;  %v1284_v3 = vld [vmem:[#allocation2 + $0x728] sm:$0xff] }
 0x40e   : > { %3739 = vmatprep.subr.bf16.mxu0 %v3738_v7  ;;  %3803 = vmatprep.subr.bf16.mxu1 %v3802_v8  ;;  %v1292_v4 = vld [vmem:[#allocation2 + $0x768] sm:$0xff]  ;;  %v3756_v7 = vpack.c.bf16 %v1275_v59, %v1267_v58  ;;  %v3820_v8 = vpack.c.bf16 %v1277_v0, %v1269_v62 }
 0x40f   : > { %v3758_v11 = vpack.c.bf16 %v1292_v4, %v1284_v3 }
 0x411   : > { %3741 = vmatpush1.bf16.msra.mxu0 %v3740_v15  ;;  %3805 = vmatpush1.bf16.msra.mxu1 %v3804_v16  ;;  %v1300_v15 = vld [vmem:[#allocation2 + $0x7a8] sm:$0xff] }
 0x412   : > { %3743 = vmatprep.subr.bf16.mxu0 %v3742_v19  ;;  %3807 = vmatprep.subr.bf16.mxu1 %v3806_v20  ;;  %v1308_v16 = vld [vmem:[#allocation2 + $0x7e8] sm:$0xff]  ;;  %v3760_v19 = vpack.c.bf16 %v1291_v10, %v1283_v9  ;;  %v3824_v20 = vpack.c.bf16 %v1293_v14, %v1285_v13 }
 0x413   : > { %v3762_v22 = vpack.c.bf16 %v1308_v16, %v1300_v15  ;;  %v3209_v9 = vld [vmem:[%s5821_s7 + $0x2] ss:$8 sm:$0xf0]  ;;  %v3210_v13 = vld [vmem:[%s5821_s7 + $0x3] ss:$8 sm:$0xf] }
 0x414   : > { %v3211_v14 = vld [vmem:[%s5821_s7 + $0x3] ss:$8 sm:$0xf0] }
 0x415   : > { %3745 = vmatpush1.bf16.msra.mxu0 %v3744_v28  ;;  %3809 = vmatpush1.bf16.msra.mxu1 %v3808_v29  ;;  %v3764_v28 = vpack.c.bf16 %v1307_v24, %v1299_v21  ;;  %v3828_v29 = vpack.c.bf16 %v1309_v27, %v1301_v25 }
 0x416   : > { %3747 = vmatprep.subr.bf16.mxu0 %v3746_v32  ;;  %3811 = vmatprep.subr.bf16.mxu1 %v3810_v34 }
 0x419   : > { %3749 = vmatpush1.bf16.msra.mxu0 %v3748_v45  ;;  %3813 = vmatpush1.bf16.msra.mxu1 %v3812_v46 }
 0x41a   : > { %3751 = vmatprep.subr.bf16.mxu0 %v3750_v50  ;;  %3815 = vmatprep.subr.bf16.mxu1 %v3814_v2 }
 0x41d   : > { %3753 = vmatpush1.bf16.msra.mxu0 %v3752_v56  ;;  %3817 = vmatpush1.bf16.msra.mxu1 %v3816_v57  ;;  %v3206_v56 = vld [vmem:[%s5821_s7 + $0x1] ss:$8 sm:$0xf] }
 0x41e   : > { %3755 = vmatprep.subr.bf16.mxu0 %v3754_v60  ;;  %3819 = vmatprep.subr.bf16.mxu1 %v3818_v61  ;;  %v3207_v57 = vld [vmem:[%s5821_s7 + $0x1] ss:$8 sm:$0xf0]  ;;  %v4636_v60 = vor.u32 %v1625_v55, %v1624_v54 }
 0x41f   : > { %v4638_v61 = vor.u32 %v3207_v57, %v3206_v56 }
 0x420   : > { %v4647_v3 = vrot.slane %v4636_v60, %v4340_v49  ;;  %v4688_v17 = vrot.slane %v4636_v60, %v4303_v40  ;;  %v4692_v18 = vrot.slane %v4636_v60, %v4337_v48 }
 0x421   : > { %3757 = vmatpush1.bf16.msra.mxu0 %v3756_v7  ;;  %3821 = vmatpush1.bf16.msra.mxu1 %v3820_v8  ;;  %v4652_v4 = vrot.slane %v4638_v61, %v4340_v49  ;;  %v3208_v8 = vld [vmem:[%s5821_s7 + $0x2] ss:$8 sm:$0xf] }
 0x422   : > { %3759 = vmatprep.subr.bf16.mxu0 %v3758_v11  ;;  %3823 = vmatprep.subr.bf16.mxu1 %v3822_v12  ;;  %5919 = vst [vmem:[#allocation10_spill] sm:$0xff] %v4647_v3  ;;  %v4672_v11 = vrot.slane %v4638_v61, %v4303_v40  ;;  %v4676_v12 = vrot.slane %v4638_v61, %v4337_v48  ;;  %5923 = vst [vmem:[#allocation14_spill] sm:$0xff] %v4688_v17 }
 0x423   : > { %5920 = vst [vmem:[#allocation11_spill] sm:$0xff] %v4652_v4  ;;  %5924 = vst [vmem:[#allocation15_spill] sm:$0xff] %v4692_v18 }
 0x424   : > { %5921 = vst [vmem:[#allocation12_spill] sm:$0xff] %v4672_v11  ;;  %5922 = vst [vmem:[#allocation13_spill] sm:$0xff] %v4676_v12 }
 0x425   : > { %3761 = vmatpush1.bf16.msra.mxu0 %v3760_v19  ;;  %3825 = vmatpush1.bf16.msra.mxu1 %v3824_v20 }
 0x426   : > { %3763 = vmatprep.subr.bf16.mxu0 %v3762_v22  ;;  %3827 = vmatprep.subr.bf16.mxu1 %v3826_v23  ;;  %v4694_v22 = vor.u32 %v3209_v9, %v3208_v8  ;;  %v4696_v23 = vor.u32 %v3211_v14, %v3210_v13 }
 0x429   : > { %3765 = vmatpush1.bf16.msra.mxu0 %v3764_v28  ;;  %3829 = vmatpush1.bf16.msra.mxu1 %v3828_v29 }
 0x42c   : > { %1518 = vmatmul.mubr.f32.vlgmr.msra.gmra.mrb[8].mxu0 %v4445_v26  ;;  %1589 = vmatmul.mubr.f32.vlgmr.msra.gmra.mrb[8].mxu1 %v4445_v26 }
 0x42d   : > { %2363 = vmatprep.mubr.f32.mxu1 %v5827_v1  ;;  %2292 = vmatprep.mubr.f32.mxu0 %v5827_v1 }
 0x4bf   : > { %v4453_v30 = vpop.f32.mrb[6].mxu0  ;;  %v4455_v31 = vpop.f32.mrb[6].mxu1 }
 0x4c0   : > { %1680 = vrot.lane.b32.xlu0 %v4455_v31, %s4072_s21  ;;  %1603 = vrot.lane.b32.xlu1 %v4455_v31, %s4073_s22  ;;  %v4461_v32 = vpop.f32.mrb[7].mxu0  ;;  %v4463_v34 = vpop.f32.mrb[7].mxu1 }
 0x4c4   : > { %1758 = vrot.lane.b32.xlu0 %v4455_v31, %s4074_s23  ;;  %1676 = vrot.lane.b32.xlu1 %v4453_v30, %s4072_s21 }
 0x4c8   : > { %1836 = vrot.lane.b32.xlu0 %v4455_v31, %s4066_s30  ;;  %1754 = vrot.lane.b32.xlu1 %v4453_v30, %s4074_s23 }
 0x4cc   : > { %1990 = vrot.lane.b32.xlu1 %v4455_v31, %s4075_s24  ;;  %1599 = vrot.lane.b32.xlu0 %v4453_v30, %s4073_s22 }
 0x4d0   : > { %2146 = vrot.lane.b32.xlu1 %v4455_v31, %s4076_s25  ;;  %1913 = vrot.lane.b32.xlu0 %v4455_v31, %s4067_s11 }
 0x4d4   : > { %2064 = vrot.lane.b32.xlu1 %v4453_v30, %s4077_s26  ;;  %1832 = vrot.lane.b32.xlu0 %v4453_v30, %s4066_s30 }
 0x4d8   : > { %2142 = vrot.lane.b32.xlu1 %v4453_v30, %s4076_s25  ;;  %2068 = vrot.lane.b32.xlu0 %v4455_v31, %s4077_s26 }
 0x4dc   : > { %1605 = vrot.lane.b32.xlu1 %v4463_v34, %s4073_s22  ;;  %1909 = vrot.lane.b32.xlu0 %v4453_v30, %s4067_s11 }
 0x4e0   : > { %1682 = vrot.lane.b32.xlu1 %v4463_v34, %s4072_s21  ;;  %1986 = vrot.lane.b32.xlu0 %v4453_v30, %s4075_s24 }
 0x4e4   : > { %1678 = vrot.lane.b32.xlu1 %v4461_v32, %s4072_s21  ;;  %1601 = vrot.lane.b32.xlu0 %v4461_v32, %s4073_s22 }
 0x4e8   : > { %1760 = vrot.lane.b32.xlu1 %v4463_v34, %s4074_s23  ;;  %1756 = vrot.lane.b32.xlu0 %v4461_v32, %s4074_s23 }
 0x4ec   : > { %1838 = vrot.lane.b32.xlu1 %v4463_v34, %s4066_s30  ;;  %1915 = vrot.lane.b32.xlu0 %v4463_v34, %s4067_s11 }
 0x4f0   : > { %1834 = vrot.lane.b32.xlu1 %v4461_v32, %s4066_s30  ;;  %1988 = vrot.lane.b32.xlu0 %v4461_v32, %s4075_s24 }
 0x4f4   : > { %1992 = vrot.lane.b32.xlu1 %v4463_v34, %s4075_s24 }
 0x4f8   : > { %2070 = vrot.lane.b32.xlu1 %v4463_v34, %s4077_s26 }
 0x4fc   : > { %1911 = vrot.lane.b32.xlu1 %v4461_v32, %s4067_s11 }
 0x4ff   : > { %v4519_v26 = vpop.f32.mrb[8].mxu0  ;;  %v4521_v36 = vpop.f32.mrb[8].mxu1 }
 0x500   : > { %5914 = vst [vmem:[#allocation5_spill] sm:$0xff] %v4519_v26  ;;  %5915 = vst [vmem:[#allocation6_spill] sm:$0xff] %v4521_v36  ;;  %v4523_v37 = vpop.f32.mrb[9].mxu1  ;;  %1994 = vrot.lane.b32.xlu0 %v4519_v26, %s4075_s24  ;;  %v4527_v38 = vpop.f32.mrb[9].mxu0  ;;  %2148 = vrot.lane.b32.xlu1 %v4463_v34, %s4076_s25 }
 0x501   : > { %5916 = vst [vmem:[#allocation7_spill] sm:$0xff] %v4523_v37  ;;  %5917 = vst [vmem:[#allocation8_spill] sm:$0xff] %v4527_v38 }
 0x504   : > { %2072 = vrot.lane.b32.xlu0 %v4519_v26, %s4077_s26  ;;  %2066 = vrot.lane.b32.xlu1 %v4461_v32, %s4077_s26 }
 0x508   : > { %1688 = vrot.lane.b32.xlu0 %v4521_v36, %s4072_s21  ;;  %2144 = vrot.lane.b32.xlu1 %v4461_v32, %s4076_s25 }
 0x50c   : > { %2150 = vrot.lane.b32.xlu0 %v4519_v26, %s4076_s25  ;;  %1917 = vrot.lane.b32.xlu1 %v4519_v26, %s4067_s11 }
 0x510   : > { %1766 = vrot.lane.b32.xlu0 %v4521_v36, %s4074_s23  ;;  %1611 = vrot.lane.b32.xlu1 %v4521_v36, %s4073_s22 }
 0x514   : > { %1607 = vrot.lane.b32.xlu0 %v4519_v26, %s4073_s22  ;;  %1844 = vrot.lane.b32.xlu1 %v4521_v36, %s4066_s30 }
 0x518   : > { %1921 = vrot.lane.b32.xlu0 %v4521_v36, %s4067_s11  ;;  %1684 = vrot.lane.b32.xlu1 %v4519_v26, %s4072_s21 }
 0x51c   : > { %1762 = vrot.lane.b32.xlu0 %v4519_v26, %s4074_s23  ;;  %1690 = vrot.lane.b32.xlu1 %v4523_v37, %s4072_s21 }
 0x520   : > { %1613 = vrot.lane.b32.xlu0 %v4523_v37, %s4073_s22  ;;  %1768 = vrot.lane.b32.xlu1 %v4523_v37, %s4074_s23 }
 0x524   : > { %1998 = vrot.lane.b32.xlu0 %v4521_v36, %s4075_s24  ;;  %1840 = vrot.lane.b32.xlu1 %v4519_v26, %s4066_s30 }
 0x528   : > { %1846 = vrot.lane.b32.xlu0 %v4523_v37, %s4066_s30  ;;  %1609 = vrot.lane.b32.xlu1 %v4527_v38, %s4073_s22 }
 0x52c   : > { %1686 = vrot.lane.b32.xlu0 %v4527_v38, %s4072_s21  ;;  %1842 = vrot.lane.b32.xlu1 %v4527_v38, %s4066_s30 }
 0x530   : > { %1764 = vrot.lane.b32.xlu0 %v4527_v38, %s4074_s23  ;;  %2076 = vrot.lane.b32.xlu1 %v4521_v36, %s4077_s26 }
 0x532   : > { %v1681_v41 = vpop.permute.xlu0 %1680  ;;  %v1604_v43 = vpop.permute.xlu1 %1603 }
 0x534   : > { %2154 = vrot.lane.b32.xlu0 %v4521_v36, %s4076_s25  ;;  %2078 = vrot.lane.b32.xlu1 %v4523_v37, %s4077_s26 }
 0x536   : > { %v4583_v44 = vpop.permute.xlu0 %1758  ;;  %v4585_v45 = vpop.permute.xlu1 %1676 }
 0x538   : > { %1923 = vrot.lane.b32.xlu0 %v4523_v37, %s4067_s11  ;;  %2156 = vrot.lane.b32.xlu1 %v4523_v37, %s4076_s25 }
 0x53a   : > { %v4591_v46 = vpop.permute.xlu0 %1836  ;;  %v4593_v63 = vpop.permute.xlu1 %1754 }
 0x53c   : > { %2000 = vrot.lane.b32.xlu0 %v4523_v37, %s4075_s24  ;;  %1996 = vrot.lane.b32.xlu1 %v4527_v38, %s4075_s24 }
 0x53e   : > { %v4599_v47 = vpop.permute.xlu1 %1990  ;;  %v4601_v50 = vpop.permute.xlu0 %1599 }
 0x540   : > { %1919 = vrot.lane.b32.xlu0 %v4527_v38, %s4067_s11  ;;  %2152 = vrot.lane.b32.xlu1 %v4527_v38, %s4076_s25 }
 0x542   : > { %v4607_v2 = vpop.permute.xlu1 %2146  ;;  %v4609_v51 = vpop.permute.xlu0 %1913 }
 0x544   : > { %2074 = vrot.lane.b32.xlu0 %v4527_v38, %s4077_s26 }
 0x546   : > { %v4616_v52 = vpop.permute.xlu1 %2064  ;;  %v4618_v53 = vpop.permute.xlu0 %1832 }
 0x548   : > { %2222 = vperm.xlu0 %3998, %v3205_v33  }
 0x54a   : > { %v4632_v58 = vpop.permute.xlu1 %2142  ;;  %v4634_v59 = vpop.permute.xlu0 %2068 }
 0x54e   : > { %v4641_v62 = vpop.permute.xlu1 %1605  ;;  %v4643_v0 = vpop.permute.xlu0 %1909 }
 0x54f   : > { %5918 = vst [vmem:[#allocation9_spill] sm:$0xff] %v4641_v62  ;;  %v1620_v5 = vsel %vm1615_vm15, %v1604_v43, %v4641_v62  ;;  %v4987_v62 = vsub.s32 5, %v4297_v35 }
 0x550   : > { %v1671_v15 = vmul.f32 %v4647_v3, %v1620_v5  ;;  %v4721_v5 = vrot.slane %v4696_v23, %v4340_v49 }
 0x551   : > { %5957 = vst [vmem:[#allocation47_spill] sm:$0xff] %v4987_v62 }
 0x552   : > { %v4657_v6 = vpop.permute.xlu1 %1682  ;;  %v4659_v7 = vpop.permute.xlu0 %1986  ;;  %5927 = vst [vmem:[#allocation18_spill] sm:$0xff] %v4721_v5 }
 0x553   : > { %v1697_v10 = vsel %vm1692_vm0, %v1681_v41, %v4657_v6 }
 0x554   : > { %v1749_v16 = vmul.f32 %v4652_v4, %v1697_v10  ;;  %v3219_v4 = vld [vmem:[%s5821_s7 + $0x40] ss:$8 sm:$0xf0] }
 0x556   : > { %v1679_v19 = vpop.permute.xlu1 %1678  ;;  %v1602_v20 = vpop.permute.xlu0 %1601  ;;  %v3846_v21 = vpack.c.bf16 %v1749_v16, %v1671_v15  ;;  %v4738_v15 = vrot.slane %v4694_v22, %v4337_v48 }
 0x557   : > { %v1698_v24 = vsel %vm1692_vm0, %v1679_v19, %v1681_v41  ;;  %v1699_v25 = vsel %vm1692_vm0, %v4585_v45, %v1679_v19  ;;  %v1621_v27 = vsel %vm1615_vm15, %v1602_v20, %v1604_v43  ;;  %v1622_v28 = vsel %vm1615_vm15, %v4601_v50, %v1602_v20 }
 0x558   : > { %v1747_v29 = vmul.f32 %v4672_v11, %v1699_v25  ;;  %v1748_v33 = vmul.f32 %v4676_v12, %v1698_v24  ;;  %v1669_v54 = vmul.f32 %v4688_v17, %v1622_v28  ;;  %v1670_v55 = vmul.f32 %v4692_v18, %v1621_v27  ;;  %3847 = vmatprep.subr.bf16.mxu1 %v3846_v21 }
 0x559   : > { %v4717_v43 = vrot.slane %v4694_v22, %v4340_v49  ;;  %5929 = vst [vmem:[#allocation20_spill] sm:$0xff] %v4738_v15  ;;  %v4743_v19 = vrot.slane %v4696_v23, %v4337_v48 }
 0x55a   : > { %v3848_v41 = vpack.c.bf16 %v1748_v33, %v1670_v55  ;;  %v4713_v56 = vpop.permute.xlu1 %1760  ;;  %v3830_v57 = vpack.c.bf16 %v1747_v29, %v1669_v54  ;;  %v4727_v9 = vpop.permute.xlu0 %1756 }
 0x55b   : > { %5925 = vst [vmem:[#allocation16_spill] sm:$0xff] %v4713_v56  ;;  %5926 = vst [vmem:[#allocation17_spill] sm:$0xff] %v4717_v43  ;;  %v1775_v8 = vsel %vm1770_vm1, %v4583_v44, %v4713_v56  ;;  %v1776_v20 = vsel %vm1770_vm1, %v4727_v9, %v4583_v44 }
 0x55c   : > { %3831 = vmatprep.subr.bf16.mxu0 %v3830_v57  ;;  %3849 = vmatpush1.bf16.msra.mxu1 %v3848_v41  ;;  %v1827_v14 = vmul.f32 %v4717_v43, %v1775_v8  ;;  %5930 = vst [vmem:[#allocation21_spill] sm:$0xff] %v4743_v19  ;;  %v1826_v27 = vmul.f32 %v4738_v15, %v1776_v20 }
 0x55e   : > { %v4729_v10 = vpop.permute.xlu1 %1838  ;;  %v1916_v54 = vpop.permute.xlu0 %1915 }
 0x55f   : > { %5928 = vst [vmem:[#allocation19_spill] sm:$0xff] %v4729_v10  ;;  %v1852_v13 = vsel %vm863_vm7, %v4591_v46, %v4729_v10  ;;  %v1929_v15 = vsel %vm885_vm8, %v4609_v51, %v1916_v54 }
 0x560   : > { %v1904_v16 = vmul.f32 %v4721_v5, %v1852_v13  ;;  %v3213_v13 = vld [vmem:[%s5821_s7 + $0x5] ss:$8 sm:$0xf0]  ;;  %v3218_v5 = vld [vmem:[%s5821_s7 + $0x40] ss:$8 sm:$0xf] }
 0x561   : > { %v4853_v37 = vor.u32 %v3219_v4, %v3218_v5 }
 0x562   : > { %v4749_v21 = vpop.permute.xlu1 %1834  ;;  %v3850_v24 = vpack.c.bf16 %v1904_v16, %v1827_v14  ;;  %v4757_v41 = vpop.permute.xlu0 %1988 }
 0x563   : > { %v1853_v25 = vsel %vm863_vm7, %v4749_v21, %v4591_v46  ;;  %v3212_v46 = vld [vmem:[%s5821_s7 + $0x5] ss:$8 sm:$0xf] }
 0x564   : > { %v1903_v28 = vmul.f32 %v4743_v19, %v1853_v25  ;;  %3851 = vmatprep.subr.bf16.mxu1 %v3850_v24  ;;  %v4773_v20 = vor.u32 %v3213_v13, %v3212_v46  ;;  %v3216_v24 = vld [vmem:[%s5821_s7 + $0x7] ss:$8 sm:$0xf] }
 0x565   : > { %v3217_v25 = vld [vmem:[%s5821_s7 + $0x7] ss:$8 sm:$0xf0] }
 0x566   : > { %v3852_v29 = vpack.c.bf16 %v1903_v28, %v1826_v27  ;;  %v1993_v33 = vpop.permute.xlu1 %1992  ;;  %v3214_v27 = vld [vmem:[%s5821_s7 + $0x6] ss:$8 sm:$0xf]  ;;  %v4795_v1 = vrot.slane %v4773_v20, %v4337_v48 }
 0x567   : > { %v3215_v28 = vld [vmem:[%s5821_s7 + $0x6] ss:$8 sm:$0xf0]  ;;  %v2007_v26 = vsel %vm2002_vm3, %v4599_v47, %v1993_v33 }
 0x568   : > { %3853 = vmatpush1.bf16.msra.mxu1 %v3852_v29  ;;  %v4787_v29 = vor.u32 %v3217_v25, %v3216_v24  ;;  %5933 = vst [vmem:[#allocation24_spill] sm:$0xff] %v4795_v1  ;;  %v4797_v19 = vor.u32 %v3215_v28, %v3214_v27  ;;  %v4809_v25 = vrot.slane %v4773_v20, %v4340_v49 }
 0x569   : > { %v1980_v11 = vmul.f32 %v4795_v1, %v1929_v15 }
 0x56a   : > { %v2071_v55 = vpop.permute.xlu1 %2070  ;;  %5934 = vst [vmem:[#allocation25_spill] sm:$0xff] %v4797_v19  ;;  %v4805_v24 = vrot.slane %v4787_v29, %v4340_v49  ;;  %5936 = vst [vmem:[#allocation27_spill] sm:$0xff] %v4809_v25  ;;  %v4817_v27 = vrot.slane %v4797_v19, %v4340_v49  ;;  %v4826_v18 = vrot.slane %v4787_v29, %v4337_v48 }
 0x56b   : > { %v2085_v1 = vsel %vm2080_vm2, %v4634_v59, %v2071_v55  ;;  %v4847_v38 = vrot.slane %v4797_v19, %v4337_v48 }
 0x56c   : > { %5935 = vst [vmem:[#allocation26_spill] sm:$0xff] %v4805_v24  ;;  %5937 = vst [vmem:[#allocation28_spill] sm:$0xff] %v4817_v27 }
 0x56d   : > { %5940 = vst [vmem:[#allocation31_spill] sm:$0xff] %v4826_v18  ;;  %5941 = vst [vmem:[#allocation32_spill] sm:$0xff] %v4847_v38  ;;  %v2058_v4 = vmul.f32 %v4847_v38, %v2007_v26  ;;  %v4957_v38 = vrot.slane %v4787_v29, %v4300_v39 }
 0x56e   : > { %v4759_v44 = vpop.permute.xlu1 %1911 }
 0x572   : > { %v4761_v57 = vpop.permute.xlu0 %1994  ;;  %v2149_v8 = vpop.permute.xlu1 %2148 }
 0x573   : > { %5931 = vst [vmem:[#allocation22_spill] sm:$0xff] %v4761_v57  ;;  %v2006_v17 = vsel %vm2002_vm3, %v1993_v33, %v4761_v57 }
 0x574   : > { %v2059_v57 = vmul.f32 %v4817_v27, %v2006_v17 }
 0x576   : > { %v4769_v14 = vpop.permute.xlu0 %2072  ;;  %v4771_v16 = vpop.permute.xlu1 %2066 }
 0x577   : > { %5932 = vst [vmem:[#allocation23_spill] sm:$0xff] %v4769_v14  ;;  %v2084_v43 = vsel %vm2080_vm2, %v2071_v55, %v4769_v14  ;;  %v3856_v55 = vpack.c.bf16 %v1980_v11, %v4455_v31  ;;  %v4877_v11 = vrot.slane %v4853_v37, %v4337_v48  ;;  %v4894_v48 = vsub.s32 7, %v4297_v35 }
 0x578   : > { %v2137_v3 = vmul.f32 %v4805_v24, %v2084_v43  ;;  %v4943_v24 = vrot.slane %v4773_v20, %v4303_v40 }
 0x579   : > { %5943 = vst [vmem:[#allocation34_spill] sm:$0xff] %v4877_v11 }
 0x57a   : > { %v4789_v46 = vpop.permute.xlu0 %1688  ;;  %v4791_v13 = vpop.permute.xlu1 %2144  ;;  %v3858_v17 = vpack.c.bf16 %v2137_v3, %v2059_v57  ;;  %5955 = vst [vmem:[#allocation45_spill] sm:$0xff] %v4943_v24 }
 0x57e   : > { %v4819_v28 = vpop.permute.xlu0 %2150  ;;  %v4821_v12 = vpop.permute.xlu1 %1917 }
 0x57f   : > { %5938 = vst [vmem:[#allocation29_spill] sm:$0xff] %v4819_v28  ;;  %5939 = vst [vmem:[#allocation30_spill] sm:$0xff] %v4821_v12  ;;  %v1928_v15 = vsel %vm885_vm8, %v1916_v54, %v4821_v12  ;;  %v2162_v5 = vsel %vm2158_vm4, %v2149_v8, %v4819_v28  ;;  %v4961_v28 = vrot.slane %v4787_v29, %v4303_v40 }
 0x580   : > { %v1981_v14 = vmul.f32 %v4809_v25, %v1928_v15  ;;  %v2136_v15 = vmul.f32 %v4826_v18, %v2085_v1  ;;  %v4865_v25 = vrot.slane %v4853_v37, %v4340_v49  ;;  %v2163_v49 = vsel %vm2158_vm4, %v4607_v2, %v2149_v8 }
 0x581   : > { %v2214_v57 = vmul.f32 %v4877_v11, %v2163_v49  ;;  %v4898_v8 = vrot.slane %v4694_v22, %v4303_v40  ;;  %v1854_v49 = vsel %vm863_vm7, %v4618_v53, %v4749_v21  ;;  %v4939_v11 = vrot.slane %v4773_v20, %v4300_v39 }
 0x582   : > { %v4855_v54 = vpop.permute.xlu0 %1766  ;;  %v4857_v12 = vpop.permute.xlu1 %1611  ;;  %v3854_v43 = vpack.c.bf16 %v1981_v14, %v4463_v34  ;;  %5942 = vst [vmem:[#allocation33_spill] sm:$0xff] %v4865_v25  ;;  %v3860_v1 = vpack.c.bf16 %v2136_v15, %v2058_v4  ;;  %v2215_v26 = vmul.f32 %v4865_v25, %v2162_v5  ;;  %v4891_v14 = vld [vmem:[%s5822_s8 + $0x8] sm:$0xff]  ;;  %v4906_v15 = vrot.slane %v4696_v23, %v4303_v40 }
 0x583   : > { %5945 = vst [vmem:[#allocation36_spill] sm:$0xff] %v4891_v14  ;;  %5946 = vst [vmem:[#allocation37_spill] sm:$0xff] %v4898_v8  ;;  %v4914_v4 = vrot.slane %v4797_v19, %v4303_v40  ;;  %v4918_v5 = vrot.slane %v4638_v61, %v4300_v39  ;;  %v4935_v25 = vrot.slane %v4636_v60, %v4894_v48 }
 0x584   : > { %3855 = vmatprep.subr.bf16.mxu1 %v3854_v43  ;;  %5948 = vst [vmem:[#allocation39_spill] sm:$0xff] %v4906_v15  ;;  %5954 = vst [vmem:[#allocation44_spill] sm:$0xff] %v4939_v11  ;;  %v1777_v18 = vsel %vm1770_vm1, %v4593_v63, %v4727_v9 }
 0x585   : > { %3857 = vmatpush1.bf16.msra.mxu1 %v3856_v55  ;;  %5949 = vst [vmem:[#allocation40_spill] sm:$0xff] %v4918_v5  ;;  %5953 = vst [vmem:[#allocation43_spill] sm:$0xff] %v4935_v25 }
 0x586   : > { %v4871_v34 = vpop.permute.xlu0 %1607  ;;  %3859 = vmatprep.subr.bf16.mxu1 %v3858_v17  ;;  %v4873_v31 = vpop.permute.xlu1 %1844  ;;  %v4910_v17 = vrot.slane %v4797_v19, %v4300_v39 }
 0x589   : > { %3861 = vmatpush1.bf16.msra.mxu1 %v3860_v1  ;;  %v5950_v1 = vmov 0.0  }
 0x58a   : > { %v4883_v3 = vpop.permute.xlu0 %1921  ;;  %2315 = vmatprep.subr.mxu1 %v2215_v26  ;;  %v4885_v33 = vpop.permute.xlu1 %1684  ;;  %v4927_v26 = vrot.slane %v4638_v61, %v4894_v48 }
 0x58b   : > { %5944 = vst [vmem:[#allocation35_spill] sm:$0xff] %v4883_v3 }
 0x58c   : > { %5951 = vst [vmem:[#allocation41_spill] sm:$0xff] %v4927_v26 }
 0x58d   : > { %2316 = vmatpush1.msra.mxu1 %v2214_v57  ;;  %v4931_v57 = vrot.slane %v4636_v60, %v4300_v39 }
 0x58e   : > { %v4900_v43 = vpop.permute.xlu0 %1762  ;;  %3221 = vmatmul.mubr.msk.f32.vlgmr.msra.gmra.mrb[10].mxu1 %vm974_vm12, %v4891_v14  ;;  %v1691_v55 = vpop.permute.xlu1 %1690 }
 0x58f   : > { %5947 = vst [vmem:[#allocation38_spill] sm:$0xff] %v4900_v43  ;;  %2505 = vmatprep.mubr.f32.mxu1 %v5950_v1  ;;  %5952 = vst [vmem:[#allocation42_spill] sm:$0xff] %v4931_v57  ;;  %v1693_v21 = vsel %vm1692_vm0, %v4789_v46, %v1691_v55  ;;  %v1700_v27 = vsel %vm1692_vm0, %v1691_v55, %v4585_v45  ;;  %v4964_v1 = vsub.s32 4, %v4297_v35  ;;  %v4990_v43 = vsub.s32 6, %v4297_v35 }
 0x590   : > { %v1902_v45 = vmul.f32 %v4906_v15, %v1854_v49  ;;  %v4969_v55 = vrot.slane %v4853_v37, %v4300_v39  ;;  %v1746_v19 = vmul.f32 %v4918_v5, %v1700_v27  ;;  %v1753_v56 = vmul.f32 %v4927_v26, %v1693_v21 }
 0x591   : > { %v1825_v15 = vmul.f32 %v4898_v8, %v1777_v18  ;;  %v5006_v21 = vrot.slane %v4694_v22, %v4964_v1  ;;  %v5010_v35 = vrot.slane %v4694_v22, %v4300_v39  ;;  %v5057_v26 = vrot.slane %v4696_v23, %v4990_v43 }
 0x592   : > { %v1614_v36 = vpop.permute.xlu0 %1613  ;;  %v1769_v14 = vpop.permute.xlu1 %1768  ;;  %5956 = vst [vmem:[#allocation46_spill] sm:$0xff] %v4969_v55  ;;  %v4984_v55 = vrot.slane %v4853_v37, %v4303_v40  ;;  %v5069_v5 = vrot.slane %v4694_v22, %v4987_v62 }
 0x593   : > { %v1616_v9 = vsel %vm1615_vm15, %v4857_v12, %v1614_v36  ;;  %v1623_v3 = vsel %vm1615_vm15, %v1614_v36, %v4601_v50  ;;  %v4994_v36 = vrot.slane %v4636_v60, %v4964_v1  ;;  %v4998_v50 = vrot.slane %v4638_v61, %v4964_v1  ;;  %5958 = vst [vmem:[#allocation48_spill] sm:$0xff] %v5006_v21 }
 0x594   : > { %v1668_v10 = vmul.f32 %v4931_v57, %v1623_v3  ;;  %v1675_v49 = vmul.f32 %v4935_v25, %v1616_v9  ;;  %5959 = vst [vmem:[#allocation49_spill] sm:$0xff] %v5010_v35  ;;  %v5014_v9 = vrot.slane %v4694_v22, %v4894_v48  ;;  %v3834_v25 = vpack.c.bf16 %v1902_v45, %v1825_v15 }
 0x595   : > { %v5033_v15 = vrot.slane %v4696_v23, %v4894_v48  ;;  %v5041_v45 = vrot.slane %v4636_v60, %v4990_v43  ;;  %5967 = vst [vmem:[#allocation57_spill] sm:$0xff] %v5057_v26  ;;  %5968 = vst [vmem:[#allocation58_spill] sm:$0xff] %v5069_v5 }
 0x596   : > { %v3832_v27 = vpack.c.bf16 %v1746_v19, %v1668_v10  ;;  %v5000_v18 = vpop.permute.xlu0 %1998  ;;  %v5002_v3 = vpop.permute.xlu1 %1840  ;;  %v3878_v40 = vpack.c.bf16 %v1753_v56, %v1675_v49  ;;  %v1930_v10 = vsel %vm885_vm8, %v4759_v44, %v4609_v51  ;;  %v5022_v56 = vrot.slane %v4696_v23, %v4964_v1 }
 0x597   : > { %v5026_v19 = vrot.slane %v4696_v23, %v4300_v39  ;;  %v1778_v49 = vsel %vm1770_vm1, %v1769_v14, %v4593_v63  ;;  %v5037_v51 = vrot.slane %v4636_v60, %v4987_v62  ;;  %5963 = vst [vmem:[#allocation53_spill] sm:$0xff] %v5041_v45  ;;  %v5049_v63 = vrot.slane %v4638_v61, %v4990_v43 }
 0x598   : > { %5960 = vst [vmem:[#allocation50_spill] sm:$0xff] %v5022_v56  ;;  %3833 = vmatpush1.bf16.msra.mxu0 %v3832_v27  ;;  %3879 = vmatprep.subr.bf16.mxu1 %v3878_v40  ;;  %v5045_v40 = vrot.slane %v4638_v61, %v4987_v62  ;;  %v1931_v60 = vsel %vm885_vm8, %v4643_v0, %v4759_v44 }
 0x599   : > { %5961 = vst [vmem:[#allocation51_spill] sm:$0xff] %v5026_v19  ;;  %3835 = vmatprep.subr.bf16.mxu0 %v3834_v25  ;;  %5962 = vst [vmem:[#allocation52_spill] sm:$0xff] %v5037_v51  ;;  %v5053_v25 = vrot.slane %v4696_v23, %v4987_v62  ;;  %v1979_v8 = vmul.f32 %v4943_v24, %v1930_v10  ;;  %v2086_v23 = vsel %vm2080_vm2, %v4771_v16, %v4634_v59 }
 0x59a   : > { %v1847_v27 = vpop.permute.xlu0 %1846  ;;  %v1610_v39 = vpop.permute.xlu1 %1609  ;;  %5964 = vst [vmem:[#allocation54_spill] sm:$0xff] %v5045_v40  ;;  %5965 = vst [vmem:[#allocation55_spill] sm:$0xff] %v5049_v63  ;;  %v1824_v57 = vmul.f32 %v5010_v35, %v1778_v49  ;;  %v2009_v24 = vsel %vm2002_vm3, %v4659_v7, %v4757_v41  ;;  %v5093_v49 = vrot.slane %v4694_v22, %v4990_v43 }
 0x59b   : > { %5966 = vst [vmem:[#allocation56_spill] sm:$0xff] %v5053_v25  ;;  %v1855_v61 = vsel %vm863_vm7, %v1847_v27, %v4618_v53  ;;  %v1848_v44 = vsel %vm863_vm7, %v4873_v31, %v1847_v27  ;;  %v2008_v53 = vsel %vm2002_vm3, %v4757_v41, %v4599_v47  ;;  %v1617_v59 = vsel %vm1615_vm15, %v1610_v39, %v4857_v12 }
 0x59c   : > { %v1901_v10 = vmul.f32 %v5026_v19, %v1855_v61  ;;  %5969 = vst [vmem:[#allocation59_spill] sm:$0xff] %v5093_v49  ;;  %v1978_v27 = vmul.f32 %v4939_v11, %v1931_v60  ;;  %v2087_v47 = vsel %vm2080_vm2, %v4616_v52, %v4771_v16  ;;  %v1771_v61 = vsel %vm1770_vm1, %v4855_v54, %v1769_v14 }
 0x59d   : > { %v2135_v12 = vmul.f32 %v4961_v28, %v2086_v23  ;;  %v1908_v62 = vmul.f32 %v5033_v15, %v1848_v44  ;;  %v3838_v60 = vpack.c.bf16 %v1979_v8, %v4461_v32  ;;  %v1674_v11 = vmul.f32 %v5041_v45, %v1617_v59 }
 0x59e   : > { %v3836_v41 = vpack.c.bf16 %v1901_v10, %v1824_v57  ;;  %v1687_v19 = vpop.permute.xlu0 %1686  ;;  %v1843_v35 = vpop.permute.xlu1 %1842  ;;  %v5113_v14 = vrot.slane %v4787_v29, %v4990_v43  ;;  %v5117_v57 = vrot.slane %v4787_v29, %v4894_v48  ;;  %v2057_v23 = vmul.f32 %v4914_v4, %v2008_v53 }
 0x59f   : > { %v1694_v22 = vsel %vm1692_vm0, %v1687_v19, %v4789_v46  ;;  %v2134_v44 = vmul.f32 %v4957_v38, %v2087_v47  ;;  %v1831_v46 = vmul.f32 %v5014_v9, %v1771_v61  ;;  %v1849_v32 = vsel %vm863_vm7, %v1843_v35, %v4873_v31 }
 0x5a0   : > { %v1752_v16 = vmul.f32 %v5049_v63, %v1694_v22  ;;  %3837 = vmatpush1.bf16.msra.mxu0 %v3836_v41  ;;  %5970 = vst [vmem:[#allocation60_spill] sm:$0xff] %v5113_v14  ;;  %5971 = vst [vmem:[#allocation61_spill] sm:$0xff] %v5117_v57  ;;  %v2056_v8 = vmul.f32 %v4910_v17, %v2009_v24  ;;  %v3840_v10 = vpack.c.bf16 %v1978_v27, %v4453_v30 }
 0x5a1   : > { %3839 = vmatprep.subr.bf16.mxu0 %v3838_v60  ;;  %v5131_v53 = vrot.slane %v4773_v20, %v4990_v43  ;;  %v2164_v47 = vsel %vm2158_vm4, %v4791_v13, %v4607_v2  ;;  %v3842_v24 = vpack.c.bf16 %v2135_v12, %v2057_v23  ;;  %v3882_v61 = vpack.c.bf16 %v1908_v62, %v1831_v46  ;;  %v5974_v12 = vld [vmem:[#allocation38_spill] sm:$0xff]  ;;  %v5975_v46 = vld [vmem:[#allocation9_spill] sm:$0xff] }
 0x5a2   : > { %v3880_v59 = vpack.c.bf16 %v1752_v16, %v1674_v11  ;;  %v1765_v41 = vpop.permute.xlu0 %1764  ;;  %v5127_v22 = vpop.permute.xlu1 %2076  ;;  %v1695_v30 = vsel %vm1692_vm0, %v4885_v33, %v1687_v19  ;;  %v1907_v11 = vmul.f32 %v5057_v26, %v1849_v32  ;;  %v3844_v60 = vpack.c.bf16 %v2134_v44, %v2056_v8 }
 0x5a3   : > { %5972 = vst [vmem:[#allocation62_spill] sm:$0xff] %v5131_v53  ;;  %v1772_v31 = vsel %vm1770_vm1, %v1765_v41, %v4855_v54  ;;  %v1696_v2 = vsel %vm1692_vm0, %v4657_v6, %v4885_v33  ;;  %v5151_v62 = vrot.slane %v4773_v20, %v4894_v48  ;;  %v2165_v54 = vsel %vm2158_vm4, %v4632_v58, %v4791_v13  ;;  %v5976_v13 = vld [vmem:[#allocation19_spill] sm:$0xff] }
 0x5a4   : > { %v1830_v27 = vmul.f32 %v5093_v49, %v1772_v31  ;;  %3841 = vmatpush1.bf16.msra.mxu0 %v3840_v10  ;;  %3881 = vmatpush1.bf16.msra.mxu1 %v3880_v59  ;;  %v1618_v19 = vsel %vm1615_vm15, %v4871_v34, %v1610_v39  ;;  %v1773_v16 = vsel %vm1770_vm1, %v5974_v12, %v1765_v41  ;;  %v6016_v49 = vld [vmem:[#allocation13_spill] sm:$0xff] }
 0x5a5   : > { %3843 = vmatprep.subr.bf16.mxu0 %v3842_v24  ;;  %3883 = vmatprep.subr.bf16.mxu1 %v3882_v61  ;;  %5973 = vst [vmem:[#allocation63_spill] sm:$0xff] %v5151_v62  ;;  %v2213_v44 = vmul.f32 %v4984_v55, %v2164_v47  ;;  %v1619_v32 = vsel %vm1615_vm15, %v5975_v46, %v4871_v34  ;;  %v5978_v34 = vld [vmem:[#allocation16_spill] sm:$0xff]  ;;  %v5979_v61 = vld [vmem:[#allocation25_spill] sm:$0xff] }
 0x5a6   : > { %v3884_v6 = vpack.c.bf16 %v1907_v11, %v1830_v27  ;;  %v5163_v33 = vpop.permute.xlu0 %2154  ;;  %v2079_v23 = vpop.permute.xlu1 %2078  ;;  %v1851_v39 = vsel %vm863_vm7, %v5976_v13, %v5002_v3  ;;  %v1751_v8 = vmul.f32 %v5045_v40, %v1695_v30  ;;  %v1750_v10 = vmul.f32 %v4998_v50, %v1696_v2 }
 0x5a7   : > { %v1850_v59 = vsel %vm863_vm7, %v5002_v3, %v1843_v35  ;;  %v5181_v41 = vrot.slane %v4853_v37, %v4894_v48  ;;  %v1774_v47 = vsel %vm1770_vm1, %v5978_v34, %v5974_v12  ;;  %v1673_v31 = vmul.f32 %v5037_v51, %v1618_v19  ;;  %v5981_v3 = vld [vmem:[#allocation46_spill] sm:$0xff]  ;;  %v5984_v34 = vld [vmem:[#allocation36_spill] sm:$0xff] }
 0x5a8   : > { %3845 = vmatpush1.bf16.msra.mxu0 %v3844_v60  ;;  %3885 = vmatpush1.bf16.msra.mxu1 %v3884_v6  ;;  %v1829_v24 = vmul.f32 %v5069_v5, %v1773_v16  ;;  %v5191_v30 = vrot.slane %v5979_v61, %v4990_v43  ;;  %v2212_v35 = vmul.f32 %v5981_v3, %v2165_v54  ;;  %v5983_v16 = vld [vmem:[#allocation35_spill] sm:$0xff] }
 0x5a9   : > { %5977 = vst [vmem:[#allocation38_spill] sm:$0xff] %v5181_v41  ;;  %2244 = vmatprep.subr.mxu0 %v2213_v44  ;;  %v1672_v11 = vmul.f32 %v4994_v36, %v1619_v32  ;;  %v1905_v27 = vmul.f32 %v5022_v56, %v1851_v39  ;;  %v5198_v12 = vrot.slane %v5979_v61, %v4894_v48 }
 0x5aa   : > { %5980 = vst [vmem:[#allocation9_spill] sm:$0xff] %v5191_v30  ;;  %v1924_v60 = vpop.permute.xlu0 %1923  ;;  %v2157_v2 = vpop.permute.xlu1 %2156  ;;  %v1906_v19 = vmul.f32 %v5053_v25, %v1850_v59  ;;  %v3862_v44 = vpack.c.bf16 %v1751_v8, %v1673_v31  ;;  %v1828_v32 = vmul.f32 %v5006_v21, %v1774_v47  ;;  %v2081_v48 = vsel %vm2080_vm2, %v5127_v22, %v2079_v23  ;;  %v5985_v8 = vld [vmem:[#allocation6_spill] sm:$0xff]  ;;  %v5986_v31 = vld [vmem:[#allocation7_spill] sm:$0xff]  ;;  %v6015_v25 = vld [vmem:[#allocation12_spill] sm:$0xff] }
 0x5ab   : > { %5982 = vst [vmem:[#allocation19_spill] sm:$0xff] %v5198_v12  ;;  %v1925_v6 = vsel %vm885_vm8, %v5983_v16, %v1924_v60  ;;  %v1932_v54 = vsel %vm885_vm8, %v1924_v60, %v4643_v0  ;;  %v3864_v46 = vpack.c.bf16 %v1750_v10, %v1672_v11  ;;  %v2088_v59 = vsel %vm2080_vm2, %v2079_v23, %v4616_v52  ;;  %v6017_v21 = vld [vmem:[#allocation17_spill] sm:$0xff] }
 0x5ac   : > { %v1984_v13 = vmul.f32 %v5131_v53, %v1925_v6  ;;  %v1985_v39 = vmul.f32 %v5151_v62, %v1932_v54  ;;  %2245 = vmatpush1.msra.mxu0 %v2212_v35  ;;  %v3866_v0 = vpack.c.bf16 %v1906_v19, %v1829_v24  ;;  %v5222_v35 = vrot.slane %v4773_v20, %v4964_v1  ;;  %v5989_v24 = vld [vmem:[#allocation47_spill] sm:$0xff] }
 0x5ad   : > { %3220 = vmatmul.mubr.msk.f32.vlgmr.msra.gmra.mrb[10].mxu0 %vm974_vm12, %v5984_v34  ;;  %3863 = vmatprep.subr.bf16.mxu0 %v3862_v44  ;;  %v5988_v60 = vmov 0.0   ;;  %v3868_v6 = vpack.c.bf16 %v1905_v27, %v1828_v32  ;;  %v5233_v19 = vrot.slane %v4773_v20, %v5989_v24  ;;  %v2140_v54 = vmul.f32 %v5113_v14, %v2081_v48 }
 0x5ae   : > { %v3888_v10 = vpack.c.bf16 %v1984_v13, %v5985_v8  ;;  %v2001_v47 = vpop.permute.xlu0 %2000  ;;  %3865 = vmatpush1.bf16.msra.mxu0 %v3864_v46  ;;  %v3886_v11 = vpack.c.bf16 %v1985_v39, %v5986_v31  ;;  %5987 = vst [vmem:[#allocation16_spill] sm:$0xff] %v5222_v35  ;;  %2434 = vmatprep.mubr.f32.mxu0 %v5988_v60  ;;  %v1997_v32 = vpop.permute.xlu1 %1996  ;;  %v5994_v8 = vld [vmem:[#allocation30_spill] sm:$0xff] }
 0x5af   : > { %v2003_v52 = vsel %vm2002_vm3, %v5000_v18, %v2001_v47  ;;  %v2010_v23 = vsel %vm2002_vm3, %v2001_v47, %v4659_v7  ;;  %3867 = vmatprep.subr.bf16.mxu0 %v3866_v0  ;;  %5990 = vst [vmem:[#allocation25_spill] sm:$0xff] %v5233_v19  ;;  %v2141_v44 = vmul.f32 %v5117_v57, %v2088_v59 }
 0x5b0   : > { %v2062_v46 = vmul.f32 %v5191_v30, %v2003_v52  ;;  %v2063_v27 = vmul.f32 %v5198_v12, %v2010_v23  ;;  %3887 = vmatprep.subr.bf16.mxu1 %v3886_v11  ;;  %v5241_v13 = vrot.slane %v4853_v37, %v4990_v43  ;;  %v2166_v7 = vsel %vm2158_vm4, %v2157_v2, %v4632_v58  ;;  %v5997_v52 = vld [vmem:[#allocation22_spill] sm:$0xff]  ;;  %v5998_v23 = vld [vmem:[#allocation5_spill] sm:$0xff] }
 0x5b1   : > { %3889 = vmatpush1.bf16.msra.mxu1 %v3888_v10  ;;  %v5248_v39 = vrot.slane %v5979_v61, %v4964_v1  ;;  %v5252_v48 = vrot.slane %v5979_v61, %v5989_v24  ;;  %v5262_v10 = vrot.slane %v4787_v29, %v4964_v1  ;;  %v5266_v47 = vrot.slane %v4787_v29, %v5989_v24 }
 0x5b2   : > { %5991 = vst [vmem:[#allocation46_spill] sm:$0xff] %v5241_v13  ;;  %v3892_v20 = vpack.c.bf16 %v2140_v54, %v2062_v46  ;;  %v1920_v59 = vpop.permute.xlu0 %1919  ;;  %3869 = vmatpush1.bf16.msra.mxu0 %v3868_v6  ;;  %v3890_v0 = vpack.c.bf16 %v2141_v44, %v2063_v27  ;;  %v2159_v61 = vsel %vm2158_vm4, %v5163_v33, %v2157_v2  ;;  %v2153_v44 = vpop.permute.xlu1 %2152  ;;  %v5999_v46 = vld [vmem:[#allocation8_spill] sm:$0xff] }
 0x5b3   : > { %5992 = vst [vmem:[#allocation35_spill] sm:$0xff] %v5248_v39  ;;  %5993 = vst [vmem:[#allocation36_spill] sm:$0xff] %v5252_v48  ;;  %v1926_v43 = vsel %vm885_vm8, %v1920_v59, %v5983_v16  ;;  %v1927_v58 = vsel %vm885_vm8, %v5994_v8, %v1920_v59  ;;  %v2219_v31 = vmul.f32 %v5181_v41, %v2166_v7 }
 0x5b4   : > { %5995 = vst [vmem:[#allocation6_spill] sm:$0xff] %v5262_v10  ;;  %5996 = vst [vmem:[#allocation7_spill] sm:$0xff] %v5266_v47  ;;  %v1982_v16 = vmul.f32 %v5222_v35, %v1927_v58  ;;  %v1983_v11 = vmul.f32 %v5233_v19, %v1926_v43  ;;  %3891 = vmatprep.subr.bf16.mxu1 %v3890_v0  ;;  %v2004_v6 = vsel %vm2002_vm3, %v1997_v32, %v5000_v18  ;;  %v6001_v0 = vld [vmem:[#allocation23_spill] sm:$0xff]  ;;  %v6013_v35 = vld [vmem:[#allocation14_spill] sm:$0xff] }
 0x5b5   : > { %v2005_v29 = vsel %vm2002_vm3, %v5997_v52, %v1997_v32  ;;  %3893 = vmatpush1.bf16.msra.mxu1 %v3892_v20  ;;  %v2218_v7 = vmul.f32 %v5241_v13, %v2159_v61  ;;  %v5285_v59 = vrot.slane %v4853_v37, %v5989_v24  ;;  %v2061_v43 = vmul.f32 %v5252_v48, %v2004_v6 }
 0x5b6   : > { %v3872_v54 = vpack.c.bf16 %v1982_v16, %v5998_v23  ;;  %v2075_v2 = vpop.permute.xlu0 %2074  ;;  %2457 = vmatprep.subr.mxu1 %v2219_v31  ;;  %v3870_v27 = vpack.c.bf16 %v1983_v11, %v5999_v46  ;;  %v2060_v20 = vmul.f32 %v5248_v39, %v2005_v29  ;;  %v2160_v24 = vsel %vm2158_vm4, %v2153_v44, %v5163_v33  ;;  %v6003_v16 = vld [vmem:[#allocation29_spill] sm:$0xff] }
 0x5b7   : > { %6000 = vst [vmem:[#allocation47_spill] sm:$0xff] %v5285_v59  ;;  %v2082_v18 = vsel %vm2080_vm2, %v2075_v2, %v5127_v22  ;;  %v2083_v32 = vsel %vm2080_vm2, %v6001_v0, %v2075_v2  ;;  %v5304_v31 = vrot.slane %v4853_v37, %v4964_v1  ;;  %v2161_v11 = vsel %vm2158_vm4, %v6003_v16, %v2153_v44 }
 0x5b8   : > { %v2138_v8 = vmul.f32 %v5262_v10, %v2083_v32  ;;  %v2139_v58 = vmul.f32 %v5266_v47, %v2082_v18  ;;  %3871 = vmatprep.subr.bf16.mxu0 %v3870_v27  ;;  %v2217_v6 = vmul.f32 %v5285_v59, %v2160_v24 }
 0x5b9   : > { %3873 = vmatpush1.bf16.msra.mxu0 %v3872_v54  ;;  %2458 = vmatpush1.msra.mxu1 %v2218_v7  ;;  %6002 = vst [vmem:[#allocation30_spill] sm:$0xff] %v5304_v31  ;;  %v2216_v33 = vmul.f32 %v5304_v31, %v2161_v11 }
 0x5ba   : > { %v3876_v22 = vpack.c.bf16 %v2138_v8, %v2060_v20  ;;  %3223 = vmatmul.mubr.msk.f32.vlgmr.msra.gmra.mrb[12].mxu1 %vm974_vm12, %v5984_v34  ;;  %v3874_v61 = vpack.c.bf16 %v2139_v58, %v2061_v43 }
 0x5bb   : > { %2939 = vmatprep.mubr.f32.mxu1 %v5988_v60 }
 0x5bc   : > { %3875 = vmatprep.subr.bf16.mxu0 %v3874_v61 }
 0x5bd   : > { %3877 = vmatpush1.bf16.msra.mxu0 %v3876_v22 }
 0x5be   : > { %2386 = vmatprep.subr.mxu0 %v2217_v6 }
 0x5c1   : > { %2387 = vmatpush1.msra.mxu0 %v2216_v33 }
 0x5c2   : > { %3222 = vmatmul.mubr.msk.f32.vlgmr.msra.gmra.mrb[12].mxu0 %vm974_vm12, %v5984_v34 }
 0x5c3   : > { %2868 = vmatprep.mubr.f32.mxu0 %v5988_v60 }
 0x5c7   : > { %v5315_v37 = vpop.permute.xlu0 %2222 }
 0x661   : > { %v2365_v1 = vpop.f32.mrb[10].mxu1 }
 0x662   : > { %v2366_v52 = vadd.f32 %v2365_v1, %v5315_v37  ;;  %v2367_v29 = vpop.f32.mrb[11].mxu1 }
 0x663   : > { %v2368_v23 = vadd.f32 %v2367_v29, %v5315_v37 }
 0x664   : > { %vm2514_vm5 = vcmp.gt.f32.partialorder %v2366_v52, 0.0  ;;  %v2522_v54 = vmul.f32 0.2, %v2366_v52 }
 0x665   : > { %v2523_v2 = vmul.f32 0.2, %v2368_v23  ;;  %vm2515_vm6 = vcmp.gt.f32.partialorder %v2368_v23, 0.0 }
 0x666   : > { %v5319_v44 = vsel %vm2514_vm5, %v2366_v52, %v2522_v54 }
 0x667   : > { %2672 = vrot.lane.b32.xlu0 %v5319_v44, %s4067_s11  ;;  %2544 = vrot.lane.b32.xlu1 %v5319_v44, %s4073_s22  ;;  %v5325_v34 = vsel %vm2515_vm6, %v2368_v23, %v2523_v2 }
 0x66b   : > { %2546 = vrot.lane.b32.xlu0 %v5325_v34, %s4073_s22  ;;  %2576 = vrot.lane.b32.xlu1 %v5319_v44, %s4072_s21 }
 0x66f   : > { %2578 = vrot.lane.b32.xlu0 %v5325_v34, %s4072_s21  ;;  %2608 = vrot.lane.b32.xlu1 %v5319_v44, %s4074_s23 }
 0x673   : > { %2610 = vrot.lane.b32.xlu0 %v5325_v34, %s4074_s23  ;;  %2640 = vrot.lane.b32.xlu1 %v5319_v44, %s4066_s30 }
 0x677   : > { %2642 = vrot.lane.b32.xlu0 %v5325_v34, %s4066_s30  ;;  %2704 = vrot.lane.b32.xlu1 %v5319_v44, %s4075_s24 }
 0x67b   : > { %2706 = vrot.lane.b32.xlu0 %v5325_v34, %s4075_s24  ;;  %2736 = vrot.lane.b32.xlu1 %v5319_v44, %s4077_s26 }
 0x67f   : > { %2738 = vrot.lane.b32.xlu0 %v5325_v34, %s4077_s26  ;;  %2768 = vrot.lane.b32.xlu1 %v5319_v44, %s4076_s25 }
 0x680   : > { %v2294_v46 = vpop.f32.mrb[10].mxu0 }
 0x681   : > { %v2295_v27 = vadd.f32 %v2294_v46, %v5315_v37  ;;  %v2296_v7 = vpop.f32.mrb[11].mxu0 }
 0x682   : > { %v2297_v32 = vadd.f32 %v2296_v7, %v5315_v37 }
 0x683   : > { %vm2512_vm9 = vcmp.gt.f32.partialorder %v2295_v27, 0.0  ;;  %v2520_v18 = vmul.f32 0.2, %v2295_v27  ;;  %2770 = vrot.lane.b32.xlu0 %v5325_v34, %s4076_s25  ;;  %2674 = vrot.lane.b32.xlu1 %v5325_v34, %s4067_s11 }
 0x684   : > { %v2521_v20 = vmul.f32 0.2, %v2297_v32  ;;  %vm2513_vm10 = vcmp.gt.f32.partialorder %v2297_v32, 0.0 }
 0x685   : > { %v5356_v0 = vsel %vm2512_vm9, %v2295_v27, %v2520_v18 }
 0x686   : > { %v5367_v8 = vsel %vm2513_vm10, %v2297_v32, %v2521_v20 }
 0x687   : > { %2700 = vrot.lane.b32.xlu0 %v5356_v0, %s4075_s24  ;;  %2540 = vrot.lane.b32.xlu1 %v5356_v0, %s4073_s22 }
 0x68b   : > { %2764 = vrot.lane.b32.xlu0 %v5356_v0, %s4076_s25  ;;  %2572 = vrot.lane.b32.xlu1 %v5356_v0, %s4072_s21 }
 0x68d   : > { %v2507_v43 = vpop.f32.mrb[12].mxu1 }
 0x68e   : > { %v2509_v58 = vpop.f32.mrb[13].mxu1  ;;  %v2508_v61 = vadd.f32 %v2507_v43, %v5315_v37 }
 0x68f   : > { %2542 = vrot.lane.b32.xlu0 %v5367_v8, %s4073_s22  ;;  %2604 = vrot.lane.b32.xlu1 %v5356_v0, %s4074_s23  ;;  %v2510_v6 = vadd.f32 %v2509_v58, %v5315_v37 }
 0x690   : > { %v2526_v16 = vmul.f32 0.2, %v2508_v61  ;;  %vm2518_vm11 = vcmp.gt.f32.partialorder %v2508_v61, 0.0 }
 0x691   : > { %v2527_v33 = vmul.f32 0.2, %v2510_v6  ;;  %vm2519_vm13 = vcmp.gt.f32.partialorder %v2510_v6, 0.0 }
 0x692   : > { %v5390_v11 = vsel %vm2518_vm11, %v2508_v61, %v2526_v16  ;;  %v6009_v61 = vld [vmem:[#allocation11_spill] sm:$0xff] }
 0x693   : > { %2574 = vrot.lane.b32.xlu0 %v5367_v8, %s4072_s21  ;;  %2636 = vrot.lane.b32.xlu1 %v5356_v0, %s4066_s30  ;;  %6004 = vst [vmem:[#allocation22_spill] sm:$0xff] %v5390_v11  ;;  %v5405_v1 = vsel %vm2519_vm13, %v2510_v6, %v2527_v33  ;;  %v3225_v6 = vld [vmem:[%s5823_s9 + $0x10] sm:$0xff] }
 0x694   : > { %6005 = vst [vmem:[#allocation5_spill] sm:$0xff] %v5405_v1 }
 0x695   : > { %v2436_v24 = vpop.f32.mrb[12].mxu0 }
 0x696   : > { %v2438_v22 = vpop.f32.mrb[13].mxu0  ;;  %v2437_v52 = vadd.f32 %v2436_v24, %v5315_v37  ;;  %v6008_v24 = vld [vmem:[#allocation10_spill] sm:$0xff] }
 0x697   : > { %2606 = vrot.lane.b32.xlu0 %v5367_v8, %s4074_s23  ;;  %2668 = vrot.lane.b32.xlu1 %v5356_v0, %s4067_s11  ;;  %v2439_v54 = vadd.f32 %v2438_v22, %v5315_v37 }
 0x698   : > { %v2524_v29 = vmul.f32 0.2, %v2437_v52  ;;  %vm2516_vm14 = vcmp.gt.f32.partialorder %v2437_v52, 0.0 }
 0x699   : > { %v2525_v2 = vmul.f32 0.2, %v2439_v54  ;;  %vm2517_vm5 = vcmp.gt.f32.partialorder %v2439_v54, 0.0 }
 0x69a   : > { %v5420_v23 = vsel %vm2516_vm14, %v2437_v52, %v2524_v29 }
 0x69b   : > { %2638 = vrot.lane.b32.xlu0 %v5367_v8, %s4066_s30  ;;  %2732 = vrot.lane.b32.xlu1 %v5356_v0, %s4077_s26  ;;  %6006 = vst [vmem:[#allocation8_spill] sm:$0xff] %v5420_v23  ;;  %v5443_v46 = vsel %vm2517_vm5, %v2439_v54, %v2525_v2 }
 0x69c   : > { %6007 = vst [vmem:[#allocation23_spill] sm:$0xff] %v5443_v46 }
 0x69f   : > { %2702 = vrot.lane.b32.xlu0 %v5367_v8, %s4075_s24  ;;  %2670 = vrot.lane.b32.xlu1 %v5367_v8, %s4067_s11 }
 0x6a3   : > { %2734 = vrot.lane.b32.xlu0 %v5367_v8, %s4077_s26  ;;  %2584 = vrot.lane.b32.xlu1 %v5390_v11, %s4072_s21 }
 0x6a7   : > { %2766 = vrot.lane.b32.xlu0 %v5367_v8, %s4076_s25  ;;  %2616 = vrot.lane.b32.xlu1 %v5390_v11, %s4074_s23 }
 0x6ab   : > { %2552 = vrot.lane.b32.xlu0 %v5390_v11, %s4073_s22  ;;  %2712 = vrot.lane.b32.xlu1 %v5390_v11, %s4075_s24 }
 0x6af   : > { %2648 = vrot.lane.b32.xlu0 %v5390_v11, %s4066_s30  ;;  %2554 = vrot.lane.b32.xlu1 %v5405_v1, %s4073_s22 }
 0x6b3   : > { %2680 = vrot.lane.b32.xlu0 %v5390_v11, %s4067_s11  ;;  %2618 = vrot.lane.b32.xlu1 %v5405_v1, %s4074_s23 }
 0x6b7   : > { %2586 = vrot.lane.b32.xlu0 %v5405_v1, %s4072_s21  ;;  %2682 = vrot.lane.b32.xlu1 %v5405_v1, %s4067_s11 }
 0x6bb   : > { %2650 = vrot.lane.b32.xlu0 %v5405_v1, %s4066_s30  ;;  %2708 = vrot.lane.b32.xlu1 %v5420_v23, %s4075_s24 }
 0x6bf   : > { %2714 = vrot.lane.b32.xlu0 %v5405_v1, %s4075_s24  ;;  %2740 = vrot.lane.b32.xlu1 %v5420_v23, %s4077_s26 }
 0x6c3   : > { %2676 = vrot.lane.b32.xlu0 %v5420_v23, %s4067_s11  ;;  %2580 = vrot.lane.b32.xlu1 %v5420_v23, %s4072_s21 }
 0x6c7   : > { %2548 = vrot.lane.b32.xlu0 %v5420_v23, %s4073_s22  ;;  %2772 = vrot.lane.b32.xlu1 %v5420_v23, %s4076_s25 }
 0x6cb   : > { %2644 = vrot.lane.b32.xlu0 %v5420_v23, %s4066_s30  ;;  %2612 = vrot.lane.b32.xlu1 %v5420_v23, %s4074_s23  ;;  %v6012_v23 = vld [vmem:[#allocation18_spill] sm:$0xff] }
 0x6cf   : > { %2582 = vrot.lane.b32.xlu0 %v5443_v46, %s4072_s21  ;;  %2550 = vrot.lane.b32.xlu1 %v5443_v46, %s4073_s22 }
 0x6d3   : > { %2614 = vrot.lane.b32.xlu0 %v5443_v46, %s4074_s23  ;;  %2646 = vrot.lane.b32.xlu1 %v5443_v46, %s4066_s30  ;;  %s3192_s23 = sshll.u32 %s4139_s14, 3 }
 0x6d4   : > { %p368_p3 = scmp.lt.s32.totalorder %s3192_s23, 15 }
 0x6d6   : > { %s6071_s23 = smov (!%p368_p3, %s3192_s23), 15 }
 0x6d7   : > { %2744 = vrot.lane.b32.xlu0 %v5390_v11, %s4077_s26  ;;  %2678 = vrot.lane.b32.xlu1 %v5443_v46, %s4067_s11 }
 0x6d9   : > { %v5457_v37 = vpop.permute.xlu0 %2672  ;;  %v2545_v27 = vpop.permute.xlu1 %2544 }
 0x6db   : > { %2710 = vrot.lane.b32.xlu0 %v5443_v46, %s4075_s24  ;;  %2742 = vrot.lane.b32.xlu1 %v5443_v46, %s4077_s26  ;;  %s3193_s24 = sshll.u32 %s6071_s23, 2 }
 0x6dc   : > { %s371_s14 = scalar_lea.vmem %s5824_s10, %s3193_s24 }
 0x6dd   : > { %v5463_v7 = vpop.permute.xlu0 %2546  ;;  %v2577_v18 = vpop.permute.xlu1 %2576 }
 0x6de   : > { %v2560_v32 = vsel %vm1615_vm15, %v2545_v27, %v5463_v7 }
 0x6df   : > { %2774 = vrot.lane.b32.xlu0 %v5443_v46, %s4076_s25  ;;  %2746 = vrot.lane.b32.xlu1 %v5405_v1, %s4077_s26  ;;  %v2567_v22 = vmul.f32 %v2560_v32, %v6008_v24 }
 0x6e1   : > { %v5472_v20 = vpop.permute.xlu0 %2578  ;;  %v2609_v43 = vpop.permute.xlu1 %2608 }
 0x6e2   : > { %v2592_v58 = vsel %vm1692_vm0, %v2577_v18, %v5472_v20 }
 0x6e3   : > { %v2599_v16 = vmul.f32 %v2592_v58, %v6009_v61  ;;  %2778 = vrot.lane.b32.xlu0 %v5405_v1, %s4076_s25  ;;  %2776 = vrot.lane.b32.xlu1 %v5390_v11, %s4076_s25 }
 0x6e5   : > { %v5486_v33 = vpop.permute.xlu0 %2610  ;;  %v2641_v52 = vpop.permute.xlu1 %2640  ;;  %v3910_v29 = vpack.c.bf16 %v2599_v16, %v2567_v22  ;;  %v6010_v16 = vld [vmem:[#allocation32_spill] sm:$0xff] }
 0x6e6   : > { %v2624_v48 = vsel %vm1770_vm1, %v2609_v43, %v5486_v33 }
 0x6e7   : > { %3911 = vmatprep.subr.bf16.mxu1 %v3910_v29  ;;  %2798 = vperm.xlu1 %3999, %v3225_v6   ;;  %v6011_v29 = vld [vmem:[#allocation31_spill] sm:$0xff]  ;;  %v2631_v56 = vmul.f32 %v2624_v48, %v6017_v21 }
 0x6e9   : > { %v5488_v54 = vpop.permute.xlu0 %2642  ;;  %v2705_v2 = vpop.permute.xlu1 %2704 }
 0x6ea   : > { %v2656_v59 = vsel %vm863_vm7, %v2641_v52, %v5488_v54 }
 0x6eb   : > { %v2663_v11 = vmul.f32 %v2656_v59, %v6012_v23 }
 0x6ed   : > { %v5490_v32 = vpop.permute.xlu0 %2706  ;;  %v2737_v58 = vpop.permute.xlu1 %2736  ;;  %v3914_v23 = vpack.c.bf16 %v2663_v11, %v2631_v56 }
 0x6ee   : > { %v2720_v24 = vsel %vm2002_vm3, %v2705_v2, %v5490_v32 }
 0x6ef   : > { %v5503_v6 = vmul.f32 %v2720_v24, %v6010_v16 }
 0x6f1   : > { %v5495_v61 = vpop.permute.xlu0 %2738  ;;  %v5497_v13 = vpop.permute.xlu1 %2768 }
 0x6f2   : > { %v2752_v22 = vsel %vm2080_vm2, %v2737_v58, %v5495_v61 }
 0x6f3   : > { %v5506_v31 = vmul.f32 %v2752_v22, %v6011_v29 }
 0x6f5   : > { %v5510_v41 = vpop.permute.xlu0 %2770  ;;  %v5512_v57 = vpop.permute.xlu1 %2674 }
 0x6f6   : > { %v5518_v14 = vsel %vm885_vm8, %v5457_v37, %v5512_v57 }
 0x6f9   : > { %v5520_v12 = vpop.permute.xlu0 %2700  ;;  %v2541_v24 = vpop.permute.xlu1 %2540 }
 0x6fd   : > { %v5522_v16 = vpop.permute.xlu0 %2764  ;;  %v2573_v22 = vpop.permute.xlu1 %2572 }
 0x701   : > { %v2543_v29 = vpop.permute.xlu0 %2542  ;;  %v2605_v30 = vpop.permute.xlu1 %2604 }
 0x702   : > { %v2561_v47 = vsel %vm1615_vm15, %v2543_v29, %v2545_v27  ;;  %v2562_v10 = vsel %vm1615_vm15, %v2541_v24, %v2543_v29  ;;  %v6014_v27 = vld [vmem:[#allocation15_spill] sm:$0xff] }
 0x703   : > { %v2565_v53 = vmul.f32 %v2562_v10, %v6013_v35  ;;  %v2566_v26 = vmul.f32 %v2561_v47, %v6014_v27 }
 0x705   : > { %v2575_v39 = vpop.permute.xlu0 %2574  ;;  %v2637_v46 = vpop.permute.xlu1 %2636 }
 0x706   : > { %v2593_v1 = vsel %vm1692_vm0, %v2575_v39, %v2577_v18  ;;  %v2594_v19 = vsel %vm1692_vm0, %v2573_v22, %v2575_v39 }
 0x707   : > { %v2597_v29 = vmul.f32 %v2594_v19, %v6015_v25  ;;  %v2598_v5 = vmul.f32 %v2593_v1, %v6016_v49  ;;  %v6018_v49 = vld [vmem:[#allocation20_spill] sm:$0xff] }
 0x709   : > { %v3912_v62 = vpack.c.bf16 %v2598_v5, %v2566_v26  ;;  %v2607_v45 = vpop.permute.xlu0 %2606  ;;  %v5544_v51 = vpop.permute.xlu1 %2668  ;;  %v3894_v59 = vpack.c.bf16 %v2597_v29, %v2565_v53  ;;  %v6019_v5 = vld [vmem:[#allocation21_spill] sm:$0xff] }
 0x70a   : > { %v2625_v39 = vsel %vm1770_vm1, %v2607_v45, %v2609_v43 }
 0x70b   : > { %3895 = vmatprep.subr.bf16.mxu0 %v3894_v59  ;;  %3913 = vmatpush1.bf16.msra.mxu1 %v3912_v62  ;;  %v2630_v21 = vmul.f32 %v2625_v39, %v6018_v49 }
 0x70c   : > { %3915 = vmatprep.subr.bf16.mxu1 %v3914_v23 }
 0x70d   : > { %v2639_v35 = vpop.permute.xlu0 %2638  ;;  %v5548_v10 = vpop.permute.xlu1 %2732 }
 0x70e   : > { %v2657_v25 = vsel %vm863_vm7, %v2639_v35, %v2641_v52 }
 0x70f   : > { %v2662_v26 = vmul.f32 %v2657_v25, %v6019_v5  ;;  %v6021_v5 = vld [vmem:[#allocation39_spill] sm:$0xff] }
 0x711   : > { %v3916_v19 = vpack.c.bf16 %v2662_v26, %v2630_v21  ;;  %v2703_v48 = vpop.permute.xlu0 %2702  ;;  %v2671_v53 = vpop.permute.xlu1 %2670 }
 0x712   : > { %v2721_v56 = vsel %vm2002_vm3, %v2703_v48, %v2705_v2 }
 0x713   : > { %3917 = vmatpush1.bf16.msra.mxu1 %v3916_v19  ;;  %v2725_v1 = vmul.f32 %v2721_v56, %v4914_v4  ;;  %v2658_v4 = vsel %vm863_vm7, %v2637_v46, %v2639_v35  ;;  %v2689_v56 = vsel %vm885_vm8, %v2671_v53, %v5457_v37 }
 0x714   : > { %v2661_v26 = vmul.f32 %v2658_v4, %v6021_v5  ;;  %v6025_v4 = vld [vmem:[#allocation45_spill] sm:$0xff] }
 0x715   : > { %v2735_v62 = vpop.permute.xlu0 %2734  ;;  %v5556_v47 = vpop.permute.xlu1 %2584  ;;  %v2693_v5 = vmul.f32 %v2689_v56, %v6025_v4  ;;  %v2722_v4 = vsel %vm2002_vm3, %v5520_v12, %v2703_v48 }
 0x716   : > { %v2753_v11 = vsel %vm2080_vm2, %v2735_v62, %v2737_v58  ;;  %v2626_v58 = vsel %vm1770_vm1, %v2605_v30, %v2607_v45 }
 0x717   : > { %v2757_v18 = vmul.f32 %v2753_v11, %v4961_v28  ;;  %v6022_v11 = vld [vmem:[#allocation42_spill] sm:$0xff] }
 0x719   : > { %v5562_v43 = vpop.permute.xlu0 %2766  ;;  %v5564_v52 = vpop.permute.xlu1 %2616  ;;  %v3906_v27 = vpack.c.bf16 %v2757_v18, %v2725_v1  ;;  %v6023_v1 = vld [vmem:[#allocation40_spill] sm:$0xff] }
 0x71d   : > { %v5566_v29 = vpop.permute.xlu0 %2552  ;;  %v5568_v59 = vpop.permute.xlu1 %2712 }
 0x71e   : > { %6020 = vst [vmem:[#allocation29_spill] sm:$0xff] %v5568_v59 }
 0x721   : > { %v5570_v2 = vpop.permute.xlu0 %2648  ;;  %v2555_v23 = vpop.permute.xlu1 %2554 }
 0x722   : > { %v2563_v28 = vsel %vm1615_vm15, %v2555_v23, %v2541_v24  ;;  %v6024_v24 = vld [vmem:[#allocation37_spill] sm:$0xff] }
 0x723   : > { %v2564_v35 = vmul.f32 %v2563_v28, %v6022_v11  ;;  %v2629_v59 = vmul.f32 %v2626_v58, %v6024_v24  ;;  %v6027_v58 = vld [vmem:[#allocation51_spill] sm:$0xff] }
 0x725   : > { %v5572_v39 = vpop.permute.xlu0 %2680  ;;  %v2619_v25 = vpop.permute.xlu1 %2618  ;;  %v3898_v28 = vpack.c.bf16 %v2661_v26, %v2629_v59  ;;  %v3902_v59 = vpack.c.bf16 %v2693_v5, %v5367_v8 }
 0x726   : > { %v2627_v45 = vsel %vm1770_vm1, %v2619_v25, %v2605_v30 }
 0x729   : > { %v2587_v49 = vpop.permute.xlu0 %2586  ;;  %v5580_v21 = vpop.permute.xlu1 %2682 }
 0x72a   : > { %v2595_v19 = vsel %vm1692_vm0, %v2587_v49, %v2573_v22  ;;  %v2690_v22 = vsel %vm885_vm8, %v5544_v51, %v2671_v53 }
 0x72b   : > { %v2596_v18 = vmul.f32 %v2595_v19, %v6023_v1  ;;  %v6026_v19 = vld [vmem:[#allocation49_spill] sm:$0xff] }
 0x72c   : > { %v2628_v11 = vmul.f32 %v2627_v45, %v6026_v19  ;;  %v6030_v45 = vld [vmem:[#allocation26_spill] sm:$0xff] }
 0x72d   : > { %v3896_v63 = vpack.c.bf16 %v2596_v18, %v2564_v35  ;;  %v2651_v40 = vpop.permute.xlu0 %2650  ;;  %v5593_v60 = vpop.permute.xlu1 %2708  ;;  %v6028_v35 = vld [vmem:[#allocation44_spill] sm:$0xff] }
 0x72e   : > { %v2659_v37 = vsel %vm863_vm7, %v2651_v40, %v2637_v46  ;;  %v2719_v30 = vsel %vm2002_vm3, %v5490_v32, %v5593_v60  ;;  %v2692_v18 = vmul.f32 %v2690_v22, %v6028_v35  ;;  %v2754_v46 = vsel %vm2080_vm2, %v5548_v10, %v2735_v62  ;;  %v6029_v32 = vld [vmem:[#allocation28_spill] sm:$0xff] }
 0x72f   : > { %v2660_v1 = vmul.f32 %v2659_v37, %v6027_v58  ;;  %3897 = vmatpush1.bf16.msra.mxu0 %v3896_v63  ;;  %v2727_v26 = vmul.f32 %v2719_v30, %v6029_v32  ;;  %v2756_v62 = vmul.f32 %v2754_v46, %v4957_v38  ;;  %v2724_v58 = vmul.f32 %v2722_v4, %v4910_v17  ;;  %v6032_v38 = vld [vmem:[#allocation27_spill] sm:$0xff]  ;;  %v6036_v4 = vld [vmem:[#allocation33_spill] sm:$0xff] }
 0x730   : > { %3899 = vmatprep.subr.bf16.mxu0 %v3898_v28  ;;  %v3904_v37 = vpack.c.bf16 %v2692_v18, %v5356_v0  ;;  %v2785_v0 = vsel %vm2158_vm4, %v5562_v43, %v5497_v13  ;;  %v2786_v18 = vsel %vm2158_vm4, %v5522_v16, %v5562_v43  ;;  %v2652_v43 = vsel %vm863_vm7, %v5570_v2, %v2651_v40 }
 0x731   : > { %v3900_v53 = vpack.c.bf16 %v2660_v1, %v2628_v11  ;;  %v5608_v24 = vpop.permute.xlu0 %2714  ;;  %v5610_v56 = vpop.permute.xlu1 %2740  ;;  %v6031_v11 = vld [vmem:[#allocation24_spill] sm:$0xff]  ;;  %v3908_v1 = vpack.c.bf16 %v2756_v62, %v2724_v58  ;;  %v2667_v62 = vmul.f32 %v2652_v43, %v5033_v15  ;;  %v6040_v58 = vld [vmem:[#allocation55_spill] sm:$0xff] }
 0x732   : > { %v2751_v63 = vsel %vm2080_vm2, %v5495_v61, %v5610_v56  ;;  %v2694_v8 = vmul.f32 %v5518_v14, %v6031_v11  ;;  %v2588_v14 = vsel %vm1692_vm0, %v5556_v47, %v2587_v49  ;;  %v2556_v49 = vsel %vm1615_vm15, %v5566_v29, %v2555_v23 }
 0x733   : > { %v2759_v22 = vmul.f32 %v2751_v63, %v6030_v45  ;;  %3901 = vmatpush1.bf16.msra.mxu0 %v3900_v53  ;;  %v2789_v53 = vmul.f32 %v2785_v0, %v4984_v55 }
 0x734   : > { %3903 = vmatprep.subr.bf16.mxu0 %v3902_v59  ;;  %v3920_v17 = vpack.c.bf16 %v2694_v8, %v5319_v44  ;;  %v2620_v44 = vsel %vm1770_vm1, %v5564_v52, %v2619_v25  ;;  %v5678_v59 = vld [vmem:[%s5822_s8 + $0x10] sm:$0xff]  ;;  %v6038_v8 = vmov 0.0  }
 0x735   : > { %v5627_v28 = vpop.permute.xlu0 %2676  ;;  %v2581_v19 = vpop.permute.xlu1 %2580  ;;  %v3922_v61 = vpack.c.bf16 %v2759_v22, %v2727_v26  ;;  %v6035_v26 = vld [vmem:[#allocation43_spill] sm:$0xff]  ;;  %v2635_v45 = vmul.f32 %v2620_v44, %v5014_v9  ;;  %v2691_v22 = vsel %vm885_vm8, %v5580_v21, %v5544_v51  ;;  %v6037_v9 = vpack.c.bf16 %v5506_v31, %v5503_v6 }
 0x736   : > { %v2687_v5 = vsel %vm885_vm8, %v5512_v57, %v5627_v28  ;;  %v2591_v40 = vsel %vm1692_vm0, %v5472_v20, %v2581_v19 }
 0x737   : > { %v2695_v48 = vmul.f32 %v2687_v5, %v6032_v38  ;;  %3905 = vmatpush1.bf16.msra.mxu0 %v3904_v37  ;;  %v2600_v11 = vmul.f32 %v2591_v40, %v4998_v50  ;;  %v6041_v38 = vld [vmem:[#allocation52_spill] sm:$0xff] }
 0x738   : > { %3907 = vmatprep.subr.bf16.mxu0 %v3906_v27  ;;  %v2784_v27 = vsel %vm2158_vm4, %v5497_v13, %v5510_v41  ;;  %v2788_v13 = vmul.f32 %v2786_v18, %v5981_v3  ;;  %v2571_v3 = vmul.f32 %v2556_v49, %v6035_v26  ;;  %v6044_v18 = vld [vmem:[#allocation50_spill] sm:$0xff] }
 0x739   : > { %v2549_v30 = vpop.permute.xlu0 %2548  ;;  %v5644_v35 = vpop.permute.xlu1 %2772  ;;  %v3918_v57 = vpack.c.bf16 %v2695_v48, %v5325_v34  ;;  %v6033_v34 = vld [vmem:[#allocation41_spill] sm:$0xff] }
 0x73a   : > { %v2603_v46 = vmul.f32 %v2588_v14, %v6033_v34  ;;  %v2783_v55 = vsel %vm2158_vm4, %v5510_v41, %v5644_v35  ;;  %v2559_v23 = vsel %vm1615_vm15, %v5463_v7, %v2549_v30  ;;  %v6034_v41 = vld [vmem:[#allocation34_spill] sm:$0xff]  ;;  %v2684_v7 = vsel %vm885_vm8, %v5572_v39, %v5580_v21 }
 0x73b   : > { %3909 = vmatpush1.bf16.msra.mxu0 %v3908_v1  ;;  %3919 = vmatprep.subr.bf16.mxu1 %v3918_v57  ;;  %v2790_v32 = vmul.f32 %v2784_v27, %v6034_v41  ;;  %v2791_v37 = vmul.f32 %v2783_v55, %v6036_v4  ;;  %v6042_v1 = vld [vmem:[#allocation53_spill] sm:$0xff]  ;;  %v6043_v57 = vld [vmem:[#allocation63_spill] sm:$0xff]  ;;  %v6045_v27 = vld [vmem:[#allocation48_spill] sm:$0xff] }
 0x73c   : > { %2820 = vmatprep.subr.mxu0 %v2789_v53  ;;  %3921 = vmatpush1.bf16.msra.mxu1 %v3920_v17  ;;  %v3942_v20 = vpack.c.bf16 %v2603_v46, %v2571_v3  ;;  %v3946_v53 = vpack.c.bf16 %v2667_v62, %v2635_v45  ;;  %v6048_v3 = vld [vmem:[#allocation56_spill] sm:$0xff]  ;;  %v6049_v45 = vld [vmem:[#allocation57_spill] sm:$0xff] }
 0x73d   : > { %v2645_v25 = vpop.permute.xlu0 %2644  ;;  %3923 = vmatprep.subr.bf16.mxu1 %v3922_v61  ;;  %v2613_v63 = vpop.permute.xlu1 %2612  ;;  %v2568_v61 = vmul.f32 %v2559_v23, %v4994_v36  ;;  %v6046_v23 = vld [vmem:[#allocation58_spill] sm:$0xff] }
 0x73e   : > { %v2655_v51 = vsel %vm863_vm7, %v5488_v54, %v2645_v25  ;;  %v2623_v15 = vsel %vm1770_vm1, %v5486_v33, %v2613_v63  ;;  %v6039_v33 = vld [vmem:[#allocation54_spill] sm:$0xff] }
 0x73f   : > { %2821 = vmatpush1.msra.mxu0 %v2788_v13  ;;  %v3928_v17 = vpack.c.bf16 %v2600_v11, %v2568_v61 }
 0x740   : > { %3925 = vmatpush1.bf16.msra.mxu1 %v6037_v9  ;;  %3226 = vmatmul.mubr.msk.f32.vlgmr.msra.gmra.mrb[14].mxu0 %vm974_vm12, %v5678_v59 }
 0x741   : > { %v2583_v21 = vpop.permute.xlu0 %2582  ;;  %2891 = vmatprep.subr.mxu1 %v2791_v37  ;;  %v2551_v36 = vpop.permute.xlu1 %2550  ;;  %3010 = vmatprep.mubr.f32.mxu0 %v6038_v8 }
 0x742   : > { %v2589_v31 = vsel %vm1692_vm0, %v2583_v21, %v5556_v47  ;;  %v2590_v50 = vsel %vm1692_vm0, %v2581_v19, %v2583_v21  ;;  %v2557_v54 = vsel %vm1615_vm15, %v2551_v36, %v5566_v29  ;;  %v2558_v6 = vsel %vm1615_vm15, %v2549_v30, %v2551_v36  ;;  %v6054_v36 = vld [vmem:[#allocation22_spill] sm:$0xff] }
 0x743   : > { %v2601_v5 = vmul.f32 %v2590_v50, %v6039_v33  ;;  %v2602_v0 = vmul.f32 %v2589_v31, %v6040_v58  ;;  %v2569_v48 = vmul.f32 %v2558_v6, %v6041_v38  ;;  %v2570_v14 = vmul.f32 %v2557_v54, %v6042_v1  ;;  %v6055_v31 = vld [vmem:[#allocation8_spill] sm:$0xff]  ;;  %v6056_v6 = vld [vmem:[#allocation23_spill] sm:$0xff] }
 0x744   : > { %v2699_v47 = vmul.f32 %v2691_v22, %v6043_v57  ;;  %v2664_v19 = vmul.f32 %v2655_v51, %v6044_v18  ;;  %2892 = vmatpush1.msra.mxu1 %v2790_v32  ;;  %v2632_v29 = vmul.f32 %v2623_v15, %v6045_v27  ;;  %v6047_v32 = vld [vmem:[#allocation59_spill] sm:$0xff]  ;;  %v6052_v51 = vld [vmem:[#allocation25_spill] sm:$0xff] }
 0x745   : > { %v3944_v49 = vpack.c.bf16 %v2602_v0, %v2570_v14  ;;  %v2615_v44 = vpop.permute.xlu0 %2614  ;;  %3943 = vmatprep.subr.bf16.mxu1 %v3942_v20  ;;  %v2647_v30 = vpop.permute.xlu1 %2646  ;;  %3227 = vmatmul.mubr.msk.f32.vlgmr.msra.gmra.mrb[14].mxu1 %vm974_vm12, %v5678_v59  ;;  %v3926_v34 = vpack.c.bf16 %v2601_v5, %v2569_v48  ;;  %v6051_v20 = vld [vmem:[#allocation16_spill] sm:$0xff]  ;;  %v6057_v5 = vld [vmem:[#allocation29_spill] sm:$0xff]  ;;  %v6058_v48 = vld [vmem:[#allocation35_spill] sm:$0xff] }
 0x746   : > { %v2621_v46 = vsel %vm1770_vm1, %v2615_v44, %v5564_v52  ;;  %v2622_v55 = vsel %vm1770_vm1, %v2613_v63, %v2615_v44  ;;  %v2653_v13 = vsel %vm863_vm7, %v2647_v30, %v5570_v2  ;;  %v2654_v43 = vsel %vm863_vm7, %v2645_v25, %v2647_v30  ;;  %3081 = vmatprep.mubr.f32.mxu1 %v6038_v8  ;;  %v6050_v63 = vld [vmem:[#allocation62_spill] sm:$0xff]  ;;  %v6059_v14 = vld [vmem:[#allocation36_spill] sm:$0xff]  ;;  %v6061_v18 = vld [vmem:[#allocation7_spill] sm:$0xff] }
 0x747   : > { %v2633_v41 = vmul.f32 %v2622_v55, %v6046_v23  ;;  %v2634_v26 = vmul.f32 %v2621_v46, %v6047_v32  ;;  %v2665_v40 = vmul.f32 %v2654_v43, %v6048_v3  ;;  %v2666_v52 = vmul.f32 %v2653_v13, %v6049_v45  ;;  %3927 = vmatprep.subr.bf16.mxu0 %v3926_v34  ;;  %v6062_v34 = vld [vmem:[#allocation9_spill] sm:$0xff]  ;;  %v6063_v55 = vld [vmem:[#allocation19_spill] sm:$0xff]  ;;  %v6064_v43 = vld [vmem:[#allocation60_spill] sm:$0xff] }
 0x748   : > { %3945 = vmatpush1.bf16.msra.mxu1 %v3944_v49  ;;  %3929 = vmatpush1.bf16.msra.mxu0 %v3928_v17  ;;  %v2698_v22 = vmul.f32 %v2684_v7, %v6050_v63  ;;  %v3932_v62 = vpack.c.bf16 %v2664_v19, %v2632_v29  ;;  %v6053_v7 = vld [vmem:[#allocation5_spill] sm:$0xff] }
 0x749   : > { %v3948_v4 = vpack.c.bf16 %v2666_v52, %v2634_v26  ;;  %3947 = vmatprep.subr.bf16.mxu1 %v3946_v53  ;;  %v2745_v2 = vpop.permute.xlu0 %2744  ;;  %v2679_v37 = vpop.permute.xlu1 %2678  ;;  %v3930_v25 = vpack.c.bf16 %v2665_v40, %v2633_v41  ;;  %v3950_v21 = vpack.c.bf16 %v2699_v47, %v6053_v7  ;;  %v6060_v47 = vld [vmem:[#allocation6_spill] sm:$0xff]  ;;  %v2723_v53 = vsel %vm2002_vm3, %v5608_v24, %v5520_v12  ;;  %v6065_v12 = vld [vmem:[#allocation61_spill] sm:$0xff] }
 0x74a   : > { %v2685_v61 = vsel %vm885_vm8, %v2679_v37, %v5572_v39  ;;  %v2686_v9 = vsel %vm885_vm8, %v5627_v28, %v2679_v37  ;;  %v3952_v8 = vpack.c.bf16 %v2698_v22, %v6054_v36  ;;  %v2731_v13 = vmul.f32 %v2723_v53, %v6063_v55  ;;  %v6066_v52 = vld [vmem:[#allocation38_spill] sm:$0xff] }
 0x74b   : > { %v2696_v11 = vmul.f32 %v2686_v9, %v6051_v20  ;;  %v2697_v15 = vmul.f32 %v2685_v61, %v6052_v51  ;;  %3931 = vmatprep.subr.bf16.mxu0 %v3930_v25  ;;  %v6069_v25 = vld [vmem:[#allocation46_spill] sm:$0xff] }
 0x74c   : > { %3949 = vmatpush1.bf16.msra.mxu1 %v3948_v4  ;;  %3933 = vmatpush1.bf16.msra.mxu0 %v3932_v62  ;;  %v6067_v4 = vld [vmem:[#allocation47_spill] sm:$0xff] }
 0x74d   : > { %v3936_v50 = vpack.c.bf16 %v2696_v11, %v6055_v31  ;;  %3951 = vmatprep.subr.bf16.mxu1 %v3950_v21  ;;  %v2711_v54 = vpop.permute.xlu0 %2710  ;;  %v2743_v39 = vpop.permute.xlu1 %2742  ;;  %v3934_v33 = vpack.c.bf16 %v2697_v15, %v6056_v6 }
 0x74e   : > { %v2717_v28 = vsel %vm2002_vm3, %v2711_v54, %v6057_v5  ;;  %v2718_v58 = vsel %vm2002_vm3, %v5593_v60, %v2711_v54  ;;  %v2749_v0 = vsel %vm2080_vm2, %v2743_v39, %v2745_v2  ;;  %v2750_v38 = vsel %vm2080_vm2, %v5610_v56, %v2743_v39 }
 0x74f   : > { %v2728_v1 = vmul.f32 %v2718_v58, %v6058_v48  ;;  %v2729_v57 = vmul.f32 %v2717_v28, %v6059_v14  ;;  %v2760_v17 = vmul.f32 %v2750_v38, %v6060_v47  ;;  %v2761_v19 = vmul.f32 %v2749_v0, %v6061_v18  ;;  %3935 = vmatprep.subr.bf16.mxu0 %v3934_v33 }
 0x750   : > { %v2716_v60 = vsel %vm2002_vm3, %v6057_v5, %v5608_v24  ;;  %3953 = vmatpush1.bf16.msra.mxu1 %v3952_v8  ;;  %3937 = vmatpush1.bf16.msra.mxu0 %v3936_v50 }
 0x751   : > { %v3940_v56 = vpack.c.bf16 %v2760_v17, %v2728_v1  ;;  %v2775_v27 = vpop.permute.xlu0 %2774  ;;  %v2747_v29 = vpop.permute.xlu1 %2746  ;;  %v3938_v49 = vpack.c.bf16 %v2761_v19, %v2729_v57  ;;  %v2730_v46 = vmul.f32 %v2716_v60, %v6062_v34 }
 0x752   : > { %v2748_v44 = vsel %vm2080_vm2, %v2745_v2, %v2747_v29  ;;  %v2755_v30 = vsel %vm2080_vm2, %v2747_v29, %v5548_v10  ;;  %v2782_v41 = vsel %vm2158_vm4, %v5644_v35, %v2775_v27  ;;  %v6068_v35 = vld [vmem:[#allocation30_spill] sm:$0xff] }
 0x753   : > { %v2762_v23 = vmul.f32 %v2748_v44, %v6064_v43  ;;  %v2763_v24 = vmul.f32 %v2755_v30, %v6065_v12  ;;  %3939 = vmatprep.subr.bf16.mxu0 %v3938_v49  ;;  %v2792_v37 = vmul.f32 %v2782_v41, %v6068_v35 }
 0x754   : > { %3941 = vmatpush1.bf16.msra.mxu0 %v3940_v56 }
 0x755   : > { %v3956_v32 = vpack.c.bf16 %v2762_v23, %v2730_v46  ;;  %v2779_v26 = vpop.permute.xlu0 %2778  ;;  %v2777_v3 = vpop.permute.xlu1 %2776  ;;  %v3954_v40 = vpack.c.bf16 %v2763_v24, %v2731_v13 }
 0x756   : > { %v2787_v10 = vsel %vm2158_vm4, %v2779_v26, %v5522_v16  ;;  %v2781_v45 = vsel %vm2158_vm4, %v2775_v27, %v2777_v3  ;;  %v2780_v22 = vsel %vm2158_vm4, %v2777_v3, %v2779_v26 }
 0x757   : > { %v2795_v63 = vmul.f32 %v2787_v10, %v6066_v52  ;;  %v2793_v2 = vmul.f32 %v2781_v45, %v6067_v4  ;;  %3955 = vmatprep.subr.bf16.mxu1 %v3954_v40  ;;  %v2794_v62 = vmul.f32 %v2780_v22, %v6069_v25 }
 0x758   : > { %3957 = vmatpush1.bf16.msra.mxu1 %v3956_v32 }
 0x759   : > { %2962 = vmatprep.subr.mxu0 %v2793_v2  ;;  %3033 = vmatprep.subr.mxu1 %v2795_v63 }
 0x75a   : > { %2963 = vmatpush1.msra.mxu0 %v2792_v37 }
 0x75b   : > { %3228 = vmatmul.mubr.msk.f32.vlgmr.msra.gmra.mrb[16].mxu0 %vm974_vm12, %v5678_v59 }
 0x75c   : > { %3034 = vmatpush1.msra.mxu1 %v2794_v62 }
 0x75d   : > { %3229 = vmatmul.mubr.msk.f32.vlgmr.msra.gmra.mrb[16].mxu1 %vm974_vm12, %v5678_v59 }
 0x766   : > { %v2799_v42 = vpop.permute.xlu1 %2798 }
 0x813   : > { %v2870_v16 = vpop.f32.mrb[14].mxu0 }
 0x814   : > { %v2872_v61 = vpop.f32.mrb[15].mxu0  ;;  %v2871_v9 = vadd.f32 %v2870_v16, %v2799_v42 }
 0x815   : > { %v2873_v20 = vadd.f32 %v2872_v61, %v2799_v42 }
 0x816   : > { %4000 = vtanh.f32 %v2871_v9 }
 0x817   : > { %4002 = vtanh.f32 %v2873_v20 }
 0x818   : > { %v2941_v11 = vpop.f32.mrb[14].mxu1 }
 0x819   : > { %v2943_v51 = vpop.f32.mrb[15].mxu1  ;;  %v2942_v15 = vadd.f32 %v2941_v11, %v2799_v42 }
 0x81a   : > { %v2944_v7 = vadd.f32 %v2943_v51, %v2799_v42 }
 0x81b   : > { %4004 = vtanh.f32 %v2942_v15 }
 0x81c   : > { %4006 = vtanh.f32 %v2944_v7 }
 0x820   : > { %v4001_v21 = vpop.eup %4000 }
 0x821   : > { %v4003_v36 = vpop.eup %4002 }
 0x822   : > { %v3104_v59 = vcombine.low %v4001_v21, %v4003_v36 }
 0x824   : > { %3112 = vst [vmem:[%s371_s14] sm:$0x77] %v3104_v59 }
 0x825   : > { %v4005_v8 = vpop.eup %4004 }
 0x826   : > { %v4007_v31 = vpop.eup %4006 }
 0x827   : > { %v3105_v50 = vcombine.low %v4005_v8, %v4007_v31 }
 0x829   : > { %3113 = vst [vmem:[%s371_s14 + $0x8] sm:$0x77] %v3105_v50 }
 0x82e   : > { %v3012_v54 = vpop.f32.mrb[16].mxu0 }
 0x82f   : > { %v3013_v39 = vadd.f32 %v3012_v54, %v2799_v42  ;;  %v3014_v6 = vpop.f32.mrb[17].mxu0 }
 0x830   : > { %v3015_v33 = vadd.f32 %v3014_v6, %v2799_v42  ;;  %v3083_v5 = vpop.f32.mrb[16].mxu1 }
 0x831   : > { %4008 = vtanh.f32 %v3013_v39  ;;  %v3084_v28 = vadd.f32 %v3083_v5, %v2799_v42  ;;  %v3085_v58 = vpop.f32.mrb[17].mxu1 }
 0x832   : > { %4010 = vtanh.f32 %v3015_v33  ;;  %v3086_v0 = vadd.f32 %v3085_v58, %v2799_v42 }
 0x833   : > { %4012 = vtanh.f32 %v3084_v28 }
 0x834   : > { %4014 = vtanh.f32 %v3086_v0 }
 0x83b   : > { %v4009_v38 = vpop.eup %4008 }
 0x83c   : > { %v4011_v48 = vpop.eup %4010 }
 0x83d   : > { %v4013_v1 = vpop.eup %4012  ;;  %v3106_v14 = vcombine.low %v4009_v38, %v4011_v48 }
 0x83e   : > { %v4015_v57 = vpop.eup %4014 }
 0x83f   : > { %3114 = vst [vmem:[%s371_s14 + $0x10] sm:$0x77] %v3106_v14  ;;  %v3107_v47 = vcombine.low %v4013_v1, %v4015_v57 }
 0x841   : > { %3115 = vst [vmem:[%s371_s14 + $0x18] sm:$0x77] %v3107_v47 }
 0x842 PF: > { %s21_s13 = sadd.s32 1, %s4054_s13  }
 0x843   : > { %p18_p5 = scmp.ge.s32.totalorder %s21_s13, 4  }
 0x845   :  { %20 = sbr.rel (!%p18_p5) target bundleno = 1 (0x1), region = 113 }
 0x84c   :  { %3138 = vsyncpa [#allocation3], 1 }
 0x84d   :  { %3140 = vsyncpa [#allocation3 + $0x1], 1 }

</bundles_post_ra>
